<compile_context>
chip_gen: v7x
topology: tpu7x:2x2x1
jax: 0.10.0
libtpu: 0.0.40
codegen_flags: <defaults>
</compile_context>

<pallas_src>
import functools

import jax
import jax.numpy as jnp
from jax.experimental import pallas as pl
from jax.experimental.pallas import tpu as pltpu


def _round_up(x, m):
    return ((x + m - 1) // m) * m


# ----------------------------------------------------------------------------- kernels
def _fused_matmul_kernel(a_ref, b_ref, scale_ref, shift_ref, o_ref, *, apply_relu):
    """o = maybe_relu((A @ B) * scale + shift); accumulates directly into o_ref (f32)."""
    k = pl.program_id(1)

    @pl.when(k == 0)
    def _():
        o_ref[...] = jnp.zeros_like(o_ref)

    o_ref[...] += jnp.dot(a_ref[...], b_ref[...], preferred_element_type=jnp.float32)

    @pl.when(k == pl.num_programs(1) - 1)
    def _():
        y = o_ref[...] * scale_ref[...] + shift_ref[...]
        if apply_relu:
            y = jnp.maximum(y, 0.0)
        o_ref[...] = y


def _maxpool_kernel(p_ref, o_ref):
    """Running max over the pooling-window grid axis; output block stays VMEM-resident."""
    k = pl.program_id(0)
    window = p_ref[0]

    @pl.when(k == 0)
    def _():
        o_ref[...] = window

    @pl.when(k > 0)
    def _():
        o_ref[...] = jnp.maximum(o_ref[...], window)


def _avgpool_kernel(x_ref, o_ref):
    # x_ref: (N, S, C) -> mean over flattened spatial axis S (fallback path only)
    o_ref[...] = jnp.mean(x_ref[...], axis=1)


def _tail_kernel(x_ref,
                 w3_ref, s3_ref, t3_ref,
                 w4_ref, s4_ref, t4_ref,
                 w5_ref, s5_ref, t5_ref,
                 w6_ref, s6_ref, t6_ref,
                 fw1_ref, fb1_ref, fw2_ref, fb2_ref,
                 feat_ref, logit_ref):
    """conv3..conv6 (center-tap GEMMs) + avgpool(identity) + fc1 + fc2 in one kernel."""
    def conv_bn_relu(h, w_ref, s_ref, t_ref):
        y = jnp.dot(h, w_ref[...], preferred_element_type=jnp.float32)
        return jnp.maximum(y * s_ref[...] + t_ref[...], 0.0)

    h = x_ref[...]                                                    # (N, 128) bf16
    h = conv_bn_relu(h, w3_ref, s3_ref, t3_ref).astype(jnp.bfloat16)  # (N, 192)
    h = conv_bn_relu(h, w4_ref, s4_ref, t4_ref).astype(jnp.bfloat16)  # (N, 384)
    h = conv_bn_relu(h, w5_ref, s5_ref, t5_ref).astype(jnp.bfloat16)  # (N, 256)
    feat = conv_bn_relu(h, w6_ref, s6_ref, t6_ref)                    # (N, 256) f32
    feat_ref[...] = feat          # AdaptiveAvgPool3d over a 1x1x1 volume == identity
    h = jnp.maximum(
        jnp.dot(feat.astype(jnp.bfloat16), fw1_ref[...],
                preferred_element_type=jnp.float32) + fb1_ref[...], 0.0)
    logit_ref[...] = (jnp.dot(h.astype(jnp.bfloat16), fw2_ref[...],
                              preferred_element_type=jnp.float32) + fb2_ref[...])


# ----------------------------------------------------------------------------- wrappers
def fused_matmul(a, b, scale, shift, *, relu):
    """maybe_relu((a @ b) * scale + shift); a:(M,K) b:(K,N) scale/shift:(1,N) f32 out."""
    M, K = a.shape
    K2, N = b.shape
    assert K == K2
    a = a.astype(jnp.bfloat16)
    b = b.astype(jnp.bfloat16)

    # K tiling: take the full contraction in one MXU pass when it is small (conv1/conv2
    # become a single K step); otherwise tile at 512.  K is padded to a lane-aligned size.
    if K <= 2048:
        tk = _round_up(K, 128)
        Kp = tk
    else:
        tk = 512
        Kp = _round_up(K, tk)
    if Kp != K:
        a = jnp.pad(a, ((0, 0), (0, Kp - K)))
        b = jnp.pad(b, ((0, Kp - K), (0, 0)))

    # M tiling: big-M layers (conv1) get an M grid axis marked "parallel" so the A-tile
    # DMA pipelines against the MXU and the layer shards across TensorCores on megacore
    # parts; small M runs as one full block.
    if M <= 1024:
        tm, Mp = M, M
    else:
        nm = pl.cdiv(M, 1024)
        nm += nm % 2                      # even tile count -> clean 2-core split on v7x
        tm = _round_up(pl.cdiv(M, nm), 8)
        Mp = nm * tm
        a = jnp.pad(a, ((0, Mp - M), (0, 0)))

    grid = (Mp // tm, Kp // tk)
    out = pl.pallas_call(
        functools.partial(_fused_matmul_kernel, apply_relu=relu),
        out_shape=jax.ShapeDtypeStruct((Mp, N), jnp.float32),
        grid=grid,
        in_specs=[
            pl.BlockSpec((tm, tk), lambda m, k: (m, k)),
            pl.BlockSpec((tk, N), lambda m, k: (k, 0)),
            pl.BlockSpec((1, N), lambda m, k: (0, 0)),
            pl.BlockSpec((1, N), lambda m, k: (0, 0)),
        ],
        out_specs=pl.BlockSpec((tm, N), lambda m, k: (m, 0)),
        # Per-call VMEM use is far below the default scoped limit; no override needed.
        compiler_params=pltpu.CompilerParams(
            dimension_semantics=("parallel", "arbitrary"),
        ),
    )(a, b, scale, shift)
    return out[:M] if Mp != M else out


def _im2col_slices(x, ksize, stride, padding):
    """x: (N,D,H,W,C) -> list of Kvol slices of shape (N*Do*Ho*Wo, C) (plain-JAX glue)."""
    N, D, H, W, C = x.shape
    if padding:
        p = padding
        x = jnp.pad(x, ((0, 0), (p, p), (p, p), (p, p), (0, 0)))
        D, H, W = D + 2 * p, H + 2 * p, W + 2 * p
    Do = (D - ksize) // stride + 1
    Ho = (H - ksize) // stride + 1
    Wo = (W - ksize) // stride + 1
    slices = []
    for kd in range(ksize):
        for kh in range(ksize):
            for kw in range(ksize):
                sl = x[:, kd:kd + stride * Do:stride,
                          kh:kh + stride * Ho:stride,
                          kw:kw + stride * Wo:stride, :]
                slices.append(sl.reshape(N * Do * Ho * Wo, C))
    return slices, (Do, Ho, Wo)


def conv3d_bn_relu(x, w, b, bn_scale, bn_shift, *, ksize, stride, padding):
    """Conv3d + (inference) BatchNorm3d + ReLU.  x:(N,D,H,W,Cin), w:(k,k,k,Cin,Cout)."""
    N, Cout = x.shape[0], w.shape[-1]
    x = x.astype(jnp.bfloat16)  # cast before im2col so A is built (and DMA'd) in bf16
    slices, (Do, Ho, Wo) = _im2col_slices(x, ksize, stride, padding)
    A = jnp.concatenate(slices, axis=1)           # (M, Kvol*Cin), matches w.reshape order
    B = w.reshape(-1, Cout)
    scale = bn_scale.reshape(1, Cout)
    shift = (b * bn_scale + bn_shift).reshape(1, Cout)  # conv bias folded through BN
    out = fused_matmul(A, B, scale, shift, relu=True)
    return out.reshape(N, Do, Ho, Wo, Cout)


def maxpool3d(x, ksize, stride):
    N, D, H, W, C = x.shape
    slices, (Do, Ho, Wo) = _im2col_slices(x, ksize, stride, 0)
    patches = jnp.stack(slices, axis=0)           # (Kvol, M, C)
    Kvol, M, _ = patches.shape
    out = pl.pallas_call(
        _maxpool_kernel,
        out_shape=jax.ShapeDtypeStruct((M, C), jnp.float32),
        grid=(Kvol,),
        in_specs=[pl.BlockSpec((1, M, C), lambda k: (k, 0, 0))],
        out_specs=pl.BlockSpec((M, C), lambda k: (0, 0)),
        compiler_params=pltpu.CompilerParams(dimension_semantics=("arbitrary",)),
    )(patches)
    return out.reshape(N, Do, Ho, Wo, C)


def adaptive_avgpool3d_to_1(x):
    # Fallback path only (fast path handles avgpool inside the fused tail kernel).
    N, D, H, W, C = x.shape
    xs = x.reshape(N, D * H * W, C)
    return pl.pallas_call(
        _avgpool_kernel,
        out_shape=jax.ShapeDtypeStruct((N, C), jnp.float32),
    )(xs)


def linear(x, w_io, b, *, relu):
    """PyTorch Linear with weights stored pre-transposed as (in, out)."""
    ones = jnp.ones((1, w_io.shape[1]), jnp.float32)
    return fused_matmul(x, w_io, ones, b.reshape(1, -1), relu=relu)


def fused_tail(x, params):
    """conv3..conv6 + avgpool + classifier fused into a single Pallas kernel.

    Valid only when conv3's input is 1x1x1 spatial: with padding=1 only the 3x3x3
    kernels' center tap multiplies non-zero data, so each conv is a (Cin x Cout) GEMM.
    """
    N = x.shape[0]
    args = [x.reshape(N, -1).astype(jnp.bfloat16)]
    for name in ("conv3", "conv4", "conv5", "conv6"):
        w, b, bn_scale, bn_shift = params[name]
        k = w.shape[0]
        cout = w.shape[-1]
        w_center = w[k // 2, k // 2, k // 2]      # (Cin, Cout): the only tap that sees data
        args += [w_center.astype(jnp.bfloat16),
                 bn_scale.reshape(1, cout),
                 (b * bn_scale + bn_shift).reshape(1, cout)]
    args += [params["fc1_w"].astype(jnp.bfloat16), params["fc1_b"].reshape(1, -1),
             params["fc2_w"].astype(jnp.bfloat16), params["fc2_b"].reshape(1, -1)]
    cfeat = params["conv6"][0].shape[-1]
    ncls = params["fc2_w"].shape[-1]
    feat, logits = pl.pallas_call(
        _tail_kernel,
        out_shape=(jax.ShapeDtypeStruct((N, cfeat), jnp.float32),
                   jax.ShapeDtypeStruct((N, ncls), jnp.float32)),
    )(*args)
    return feat, logits


# ----------------------------------------------------------------------------- model
def alexnet3d_forward(x_ncdhw, params):
    x = jnp.transpose(x_ncdhw, (0, 2, 3, 4, 1)).astype(jnp.float32)  # NCDHW -> NDHWC
    # features
    x = conv3d_bn_relu(x, *params["conv1"], ksize=5, stride=2, padding=0)
    x = maxpool3d(x, 3, 3)
    x = conv3d_bn_relu(x, *params["conv2"], ksize=3, stride=1, padding=0)
    x = maxpool3d(x, 3, 3)
    N, D, H, W, C = x.shape
    if (D, H, W) == (1, 1, 1):
        # Fast path (holds for the 33^3 reference input): the whole tail is one kernel.
        pooled, logits = fused_tail(x, params)
    else:
        # General fallback for larger spatial inputs: full im2col convs + avgpool + FCs.
        x = conv3d_bn_relu(x, *params["conv3"], ksize=3, stride=1, padding=1)
        x = conv3d_bn_relu(x, *params["conv4"], ksize=3, stride=1, padding=1)
        x = conv3d_bn_relu(x, *params["conv5"], ksize=3, stride=1, padding=1)
        x = conv3d_bn_relu(x, *params["conv6"], ksize=3, stride=1, padding=1)
        pooled = adaptive_avgpool3d_to_1(x)                     # (N, 256)
        h = linear(pooled, params["fc1_w"], params["fc1_b"], relu=True)
        logits = linear(h, params["fc2_w"], params["fc2_b"], relu=False)
    xp = pooled[:, :, None, None, None]                         # (N, 256, 1, 1, 1)
    return [logits, xp]


def init_params(key):
    eps = 1e-5
    convs = [  # (kernel, Cin, Cout)
        (5, 1, 64), (3, 64, 128), (3, 128, 192),
        (3, 192, 384), (3, 384, 256), (3, 256, 256),
    ]
    params = {}
    for idx, (k, cin, cout) in enumerate(convs, start=1):
        key, kw, kb = jax.random.split(key, 3)
        fan_in = k * k * k * cin
        w = jax.random.normal(kw, (k, k, k, cin, cout), jnp.float32) * jnp.sqrt(2.0 / fan_in)
        b = jax.random.normal(kb, (cout,), jnp.float32) * 0.01
        # Inference-mode BatchNorm3d folded into a per-channel affine (gamma=1, beta=0,
        # running_mean=0, running_var=1 as at module init).
        bn_scale = jnp.full((cout,), 1.0 / jnp.sqrt(1.0 + eps), jnp.float32)
        bn_shift = jnp.zeros((cout,), jnp.float32)
        params[f"conv{idx}"] = (w, b, bn_scale, bn_shift)
    # FC weights stored pre-transposed as (in, out) to avoid call-time transposes.
    key, k1, k2, k3, k4 = jax.random.split(key, 5)
    params["fc1_w"] = jax.random.normal(k1, (256, 64), jnp.float32) * jnp.sqrt(2.0 / 256)
    params["fc1_b"] = jax.random.normal(k2, (64,), jnp.float32) * 0.01
    params["fc2_w"] = jax.random.normal(k3, (64, 3), jnp.float32) * jnp.sqrt(2.0 / 64)
    params["fc2_b"] = jax.random.normal(k4, (3,), jnp.float32) * 0.01
    return params


if __name__ == "__main__":
    key = jax.random.PRNGKey(0)
    pkey, xkey = jax.random.split(key)
    params = init_params(pkey)
    # Smallest spatial size the feature stack supports is 33 (stride-2 conv + two
    # stride-3 maxpools); batch=2, num_channels=1 as in the module.
    x = jax.random.normal(xkey, (2, 1, 33, 33, 33), jnp.float32)

    fwd = jax.jit(alexnet3d_forward)
    logits, xp = fwd(x, params)
    jax.block_until_ready(logits)
    jax.block_until_ready(xp)

    assert logits.shape == (2, 3), logits.shape
    assert xp.shape == (2, 256, 1, 1, 1), xp.shape
    assert bool(jnp.all(jnp.isfinite(logits))) and bool(jnp.all(jnp.isfinite(xp)))
    print("KERNEL_OK")
</pallas_src>

<mosaic_0001>
module attributes {stable_mosaic.version = 11 : i64} {
  func.func @_fused_matmul_kernel(%arg0: i32, %arg1: i32, %arg2: memref<848x128xbf16, #tpu.memory_space<vmem>>, %arg3: memref<128x64xbf16, #tpu.memory_space<vmem>>, %arg4: memref<1x64xf32, #tpu.memory_space<vmem>>, %arg5: memref<1x64xf32, #tpu.memory_space<vmem>>, %arg6: memref<848x64xf32, #tpu.memory_space<vmem>>) attributes {dimension_semantics = [#tpu.dimension_semantics<parallel>, #tpu.dimension_semantics<arbitrary>], iteration_bounds = array<i64: 8, 1>, scalar_prefetch = 0 : i64, scratch_operands = 0 : i64, tpu.core_type = #tpu.core_type<tc>, window_params = [{transform_indices = @transform_0, window_bounds = array<i64: 848, 128>}, {transform_indices = @transform_1, window_bounds = array<i64: 128, 64>}, {pipeline_mode = #tpu.pipeline_mode<synchronous>, transform_indices = @transform_2, window_bounds = array<i64: 1, 64>}, {pipeline_mode = #tpu.pipeline_mode<synchronous>, transform_indices = @transform_3, window_bounds = array<i64: 1, 64>}, {transform_indices = @transform_4, window_bounds = array<i64: 848, 64>}]} {
    %c0_i32 = arith.constant 0 : i32
    %0 = arith.cmpi eq, %arg1, %c0_i32 : i32
    %1 = arith.extui %0 : i1 to i32
    %c0_i32_0 = arith.constant 0 : i32
    %2 = arith.cmpi ne, %1, %c0_i32_0 : i32
    scf.if %2 {
      %cst_10 = arith.constant 0.000000e+00 : f32
      %12 = vector.broadcast %cst_10 : f32 to vector<848x64xf32>
      %c0_11 = arith.constant 0 : index
      %c0_12 = arith.constant 0 : index
      %13 = vector.load %arg6[%c0_11, %c0_12] : memref<848x64xf32, #tpu.memory_space<vmem>>, vector<848x64xf32>
      tpu.vector_store %arg6[%c0_11, %c0_12], %12 {strides = array<i32>} : memref<848x64xf32, #tpu.memory_space<vmem>>, vector<848x64xf32>,
    } else {
    }
    %c0 = arith.constant 0 : index
    %c0_1 = arith.constant 0 : index
    %3 = vector.load %arg6[%c0, %c0_1] : memref<848x64xf32, #tpu.memory_space<vmem>>, vector<848x64xf32>
    %c0_2 = arith.constant 0 : index
    %c0_3 = arith.constant 0 : index
    %4 = vector.load %arg2[%c0_2, %c0_3] : memref<848x128xbf16, #tpu.memory_space<vmem>>, vector<848x128xbf16>
    %c0_4 = arith.constant 0 : index
    %c0_5 = arith.constant 0 : index
    %5 = vector.load %arg3[%c0_4, %c0_5] : memref<128x64xbf16, #tpu.memory_space<vmem>>, vector<128x64xbf16>
    %cst = arith.constant dense<0.000000e+00> : vector<848x64xf32>
    %6 = tpu.matmul %4, %5, %cst {dimension_numbers = #tpu.dot_dimension_numbers<[1], [0], [0], [1], [0, 0, 1, 1], [], []>} : vector<848x128xbf16>, vector<128x64xbf16>, vector<848x64xf32> -> vector<848x64xf32>
    %7 = arith.addf %3, %6 : vector<848x64xf32>
    %c0_6 = arith.constant 0 : index
    %c0_7 = arith.constant 0 : index
    %8 = vector.load %arg6[%c0_6, %c0_7] : memref<848x64xf32, #tpu.memory_space<vmem>>, vector<848x64xf32>
    tpu.vector_store %arg6[%c0_6, %c0_7], %7 {strides = array<i32>} : memref<848x64xf32, #tpu.memory_space<vmem>>, vector<848x64xf32>,
    %c0_i32_8 = arith.constant 0 : i32
    %9 = arith.cmpi eq, %arg1, %c0_i32_8 : i32
    %10 = arith.extui %9 : i1 to i32
    %c0_i32_9 = arith.constant 0 : i32
    %11 = arith.cmpi ne, %10, %c0_i32_9 : i32
    scf.if %11 {
      %c0_10 = arith.constant 0 : index
      %c0_11 = arith.constant 0 : index
      %12 = vector.load %arg6[%c0_10, %c0_11] : memref<848x64xf32, #tpu.memory_space<vmem>>, vector<848x64xf32>
      %c0_12 = arith.constant 0 : index
      %c0_13 = arith.constant 0 : index
      %13 = vector.load %arg4[%c0_12, %c0_13] : memref<1x64xf32, #tpu.memory_space<vmem>>, vector<1x64xf32>
      %14 = vector.broadcast %13 : vector<1x64xf32> to vector<848x64xf32>
      %15 = arith.mulf %12, %14 : vector<848x64xf32>
      %c0_14 = arith.constant 0 : index
      %c0_15 = arith.constant 0 : index
      %16 = vector.load %arg5[%c0_14, %c0_15] : memref<1x64xf32, #tpu.memory_space<vmem>>, vector<1x64xf32>
      %17 = vector.broadcast %16 : vector<1x64xf32> to vector<848x64xf32>
      %18 = arith.addf %15, %17 : vector<848x64xf32>
      %cst_16 = arith.constant 0.000000e+00 : f32
      %19 = vector.broadcast %cst_16 : f32 to vector<848x64xf32>
      %20 = arith.maximumf %18, %19 : vector<848x64xf32>
      %c0_17 = arith.constant 0 : index
      %c0_18 = arith.constant 0 : index
      %21 = vector.load %arg6[%c0_17, %c0_18] : memref<848x64xf32, #tpu.memory_space<vmem>>, vector<848x64xf32>
      tpu.vector_store %arg6[%c0_17, %c0_18], %20 {strides = array<i32>} : memref<848x64xf32, #tpu.memory_space<vmem>>, vector<848x64xf32>,
    } else {
    }
    return
  }
  func.func @transform_0(%arg0: i32, %arg1: i32) -> (i32, i32) {
    %c0_i32 = arith.constant 0 : i32
    return %arg0, %arg1 : i32, i32
  }
  func.func @transform_1(%arg0: i32, %arg1: i32) -> (i32, i32) {
    %c0_i32 = arith.constant 0 : i32
    %c0_i32_0 = arith.constant 0 : i32
    return %arg1, %c0_i32 : i32, i32
  }
  func.func @transform_2(%arg0: i32, %arg1: i32) -> (i32, i32) {
    %c0_i32 = arith.constant 0 : i32
    %c0_i32_0 = arith.constant 0 : i32
    %c0_i32_1 = arith.constant 0 : i32
    return %c0_i32, %c0_i32_0 : i32, i32
  }
  func.func @transform_3(%arg0: i32, %arg1: i32) -> (i32, i32) {
    %c0_i32 = arith.constant 0 : i32
    %c0_i32_0 = arith.constant 0 : i32
    %c0_i32_1 = arith.constant 0 : i32
    return %c0_i32, %c0_i32_0 : i32, i32
  }
  func.func @transform_4(%arg0: i32, %arg1: i32) -> (i32, i32) {
    %c0_i32 = arith.constant 0 : i32
    %c0_i32_0 = arith.constant 0 : i32
    return %arg0, %c0_i32 : i32, i32
  }
}

module attributes {stable_mosaic.version = 11 : i64} {
  func.func @_maxpool_kernel(%arg0: i32, %arg1: memref<1x250x64xf32, #tpu.memory_space<vmem>>, %arg2: memref<250x64xf32, #tpu.memory_space<vmem>>) attributes {dimension_semantics = [#tpu.dimension_semantics<arbitrary>], iteration_bounds = array<i64: 27>, scalar_prefetch = 0 : i64, scratch_operands = 0 : i64, tpu.core_type = #tpu.core_type<tc>, window_params = [{transform_indices = @transform_0, window_bounds = array<i64: 1, 250, 64>}, {pipeline_mode = #tpu.pipeline_mode<synchronous>, transform_indices = @transform_1, window_bounds = array<i64: 250, 64>}]} {
    %c0 = arith.constant 0 : index
    %c0_0 = arith.constant 0 : index
    %c0_1 = arith.constant 0 : index
    %0 = vector.load %arg1[%c0, %c0_0, %c0_1] : memref<1x250x64xf32, #tpu.memory_space<vmem>>, vector<1x250x64xf32>
    %1 = vector.shape_cast %0 : vector<1x250x64xf32> to vector<250x64xf32>
    %c0_i32 = arith.constant 0 : i32
    %2 = arith.cmpi eq, %arg0, %c0_i32 : i32
    %3 = arith.extui %2 : i1 to i32
    %c0_i32_2 = arith.constant 0 : i32
    %4 = arith.cmpi ne, %3, %c0_i32_2 : i32
    scf.if %4 {
      %c0_5 = arith.constant 0 : index
      %c0_6 = arith.constant 0 : index
      %8 = vector.load %arg2[%c0_5, %c0_6] : memref<250x64xf32, #tpu.memory_space<vmem>>, vector<250x64xf32>
      tpu.vector_store %arg2[%c0_5, %c0_6], %1 {strides = array<i32>} : memref<250x64xf32, #tpu.memory_space<vmem>>, vector<250x64xf32>,
    } else {
    }
    %c0_i32_3 = arith.constant 0 : i32
    %5 = arith.cmpi sgt, %arg0, %c0_i32_3 : i32
    %6 = arith.extui %5 : i1 to i32
    %c0_i32_4 = arith.constant 0 : i32
    %7 = arith.cmpi ne, %6, %c0_i32_4 : i32
    scf.if %7 {
      %c0_5 = arith.constant 0 : index
      %c0_6 = arith.constant 0 : index
      %8 = vector.load %arg2[%c0_5, %c0_6] : memref<250x64xf32, #tpu.memory_space<vmem>>, vector<250x64xf32>
      %9 = arith.maximumf %8, %1 : vector<250x64xf32>
      %c0_7 = arith.constant 0 : index
      %c0_8 = arith.constant 0 : index
      %10 = vector.load %arg2[%c0_7, %c0_8] : memref<250x64xf32, #tpu.memory_space<vmem>>, vector<250x64xf32>
      tpu.vector_store %arg2[%c0_7, %c0_8], %9 {strides = array<i32>} : memref<250x64xf32, #tpu.memory_space<vmem>>, vector<250x64xf32>,
    } else {
    }
    return
  }
  func.func @transform_0(%arg0: i32) -> (i32, i32, i32) {
    %c0_i32 = arith.constant 0 : i32
    %c0_i32_0 = arith.constant 0 : i32
    %c0_i32_1 = arith.constant 0 : i32
    return %arg0, %c0_i32, %c0_i32_0 : i32, i32, i32
  }
  func.func @transform_1(%arg0: i32) -> (i32, i32) {
    %c0_i32 = arith.constant 0 : i32
    %c0_i32_0 = arith.constant 0 : i32
    %c0_i32_1 = arith.constant 0 : i32
    return %c0_i32, %c0_i32_0 : i32, i32
  }
}

module attributes {stable_mosaic.version = 11 : i64} {
  func.func @_fused_matmul_kernel(%arg0: i32, %arg1: i32, %arg2: memref<54x1792xbf16, #tpu.memory_space<vmem>>, %arg3: memref<1792x128xbf16, #tpu.memory_space<vmem>>, %arg4: memref<1x128xf32, #tpu.memory_space<vmem>>, %arg5: memref<1x128xf32, #tpu.memory_space<vmem>>, %arg6: memref<54x128xf32, #tpu.memory_space<vmem>>) attributes {dimension_semantics = [#tpu.dimension_semantics<parallel>, #tpu.dimension_semantics<arbitrary>], iteration_bounds = array<i64: 1, 1>, scalar_prefetch = 0 : i64, scratch_operands = 0 : i64, tpu.core_type = #tpu.core_type<tc>, window_params = [{transform_indices = @transform_0, window_bounds = array<i64: 54, 1792>}, {transform_indices = @transform_1, window_bounds = array<i64: 1792, 128>}, {pipeline_mode = #tpu.pipeline_mode<synchronous>, transform_indices = @transform_2, window_bounds = array<i64: 1, 128>}, {pipeline_mode = #tpu.pipeline_mode<synchronous>, transform_indices = @transform_3, window_bounds = array<i64: 1, 128>}, {transform_indices = @transform_4, window_bounds = array<i64: 54, 128>}]} {
    %c0_i32 = arith.constant 0 : i32
    %0 = arith.cmpi eq, %arg1, %c0_i32 : i32
    %1 = arith.extui %0 : i1 to i32
    %c0_i32_0 = arith.constant 0 : i32
    %2 = arith.cmpi ne, %1, %c0_i32_0 : i32
    scf.if %2 {
      %cst_10 = arith.constant 0.000000e+00 : f32
      %12 = vector.broadcast %cst_10 : f32 to vector<54x128xf32>
      %c0_11 = arith.constant 0 : index
      %c0_12 = arith.constant 0 : index
      %13 = vector.load %arg6[%c0_11, %c0_12] : memref<54x128xf32, #tpu.memory_space<vmem>>, vector<54x128xf32>
      tpu.vector_store %arg6[%c0_11, %c0_12], %12 {strides = array<i32>} : memref<54x128xf32, #tpu.memory_space<vmem>>, vector<54x128xf32>,
    } else {
    }
    %c0 = arith.constant 0 : index
    %c0_1 = arith.constant 0 : index
    %3 = vector.load %arg6[%c0, %c0_1] : memref<54x128xf32, #tpu.memory_space<vmem>>, vector<54x128xf32>
    %c0_2 = arith.constant 0 : index
    %c0_3 = arith.constant 0 : index
    %4 = vector.load %arg2[%c0_2, %c0_3] : memref<54x1792xbf16, #tpu.memory_space<vmem>>, vector<54x1792xbf16>
    %c0_4 = arith.constant 0 : index
    %c0_5 = arith.constant 0 : index
    %5 = vector.load %arg3[%c0_4, %c0_5] : memref<1792x128xbf16, #tpu.memory_space<vmem>>, vector<1792x128xbf16>
    %cst = arith.constant dense<0.000000e+00> : vector<54x128xf32>
    %6 = tpu.matmul %4, %5, %cst {dimension_numbers = #tpu.dot_dimension_numbers<[1], [0], [0], [1], [0, 0, 1, 1], [], []>} : vector<54x1792xbf16>, vector<1792x128xbf16>, vector<54x128xf32> -> vector<54x128xf32>
    %7 = arith.addf %3, %6 : vector<54x128xf32>
    %c0_6 = arith.constant 0 : index
    %c0_7 = arith.constant 0 : index
    %8 = vector.load %arg6[%c0_6, %c0_7] : memref<54x128xf32, #tpu.memory_space<vmem>>, vector<54x128xf32>
    tpu.vector_store %arg6[%c0_6, %c0_7], %7 {strides = array<i32>} : memref<54x128xf32, #tpu.memory_space<vmem>>, vector<54x128xf32>,
    %c0_i32_8 = arith.constant 0 : i32
    %9 = arith.cmpi eq, %arg1, %c0_i32_8 : i32
    %10 = arith.extui %9 : i1 to i32
    %c0_i32_9 = arith.constant 0 : i32
    %11 = arith.cmpi ne, %10, %c0_i32_9 : i32
    scf.if %11 {
      %c0_10 = arith.constant 0 : index
      %c0_11 = arith.constant 0 : index
      %12 = vector.load %arg6[%c0_10, %c0_11] : memref<54x128xf32, #tpu.memory_space<vmem>>, vector<54x128xf32>
      %c0_12 = arith.constant 0 : index
      %c0_13 = arith.constant 0 : index
      %13 = vector.load %arg4[%c0_12, %c0_13] : memref<1x128xf32, #tpu.memory_space<vmem>>, vector<1x128xf32>
      %14 = vector.broadcast %13 : vector<1x128xf32> to vector<54x128xf32>
      %15 = arith.mulf %12, %14 : vector<54x128xf32>
      %c0_14 = arith.constant 0 : index
      %c0_15 = arith.constant 0 : index
      %16 = vector.load %arg5[%c0_14, %c0_15] : memref<1x128xf32, #tpu.memory_space<vmem>>, vector<1x128xf32>
      %17 = vector.broadcast %16 : vector<1x128xf32> to vector<54x128xf32>
      %18 = arith.addf %15, %17 : vector<54x128xf32>
      %cst_16 = arith.constant 0.000000e+00 : f32
      %19 = vector.broadcast %cst_16 : f32 to vector<54x128xf32>
      %20 = arith.maximumf %18, %19 : vector<54x128xf32>
      %c0_17 = arith.constant 0 : index
      %c0_18 = arith.constant 0 : index
      %21 = vector.load %arg6[%c0_17, %c0_18] : memref<54x128xf32, #tpu.memory_space<vmem>>, vector<54x128xf32>
      tpu.vector_store %arg6[%c0_17, %c0_18], %20 {strides = array<i32>} : memref<54x128xf32, #tpu.memory_space<vmem>>, vector<54x128xf32>,
    } else {
    }
    return
  }
  func.func @transform_0(%arg0: i32, %arg1: i32) -> (i32, i32) {
    %c0_i32 = arith.constant 0 : i32
    return %arg0, %arg1 : i32, i32
  }
  func.func @transform_1(%arg0: i32, %arg1: i32) -> (i32, i32) {
    %c0_i32 = arith.constant 0 : i32
    %c0_i32_0 = arith.constant 0 : i32
    return %arg1, %c0_i32 : i32, i32
  }
  func.func @transform_2(%arg0: i32, %arg1: i32) -> (i32, i32) {
    %c0_i32 = arith.constant 0 : i32
    %c0_i32_0 = arith.constant 0 : i32
    %c0_i32_1 = arith.constant 0 : i32
    return %c0_i32, %c0_i32_0 : i32, i32
  }
  func.func @transform_3(%arg0: i32, %arg1: i32) -> (i32, i32) {
    %c0_i32 = arith.constant 0 : i32
    %c0_i32_0 = arith.constant 0 : i32
    %c0_i32_1 = arith.constant 0 : i32
    return %c0_i32, %c0_i32_0 : i32, i32
  }
  func.func @transform_4(%arg0: i32, %arg1: i32) -> (i32, i32) {
    %c0_i32 = arith.constant 0 : i32
    %c0_i32_0 = arith.constant 0 : i32
    return %arg0, %c0_i32 : i32, i32
  }
}

module attributes {stable_mosaic.version = 11 : i64} {
  func.func @_maxpool_kernel(%arg0: i32, %arg1: memref<1x2x128xf32, #tpu.memory_space<vmem>>, %arg2: memref<2x128xf32, #tpu.memory_space<vmem>>) attributes {dimension_semantics = [#tpu.dimension_semantics<arbitrary>], iteration_bounds = array<i64: 27>, scalar_prefetch = 0 : i64, scratch_operands = 0 : i64, tpu.core_type = #tpu.core_type<tc>, window_params = [{transform_indices = @transform_0, window_bounds = array<i64: 1, 2, 128>}, {pipeline_mode = #tpu.pipeline_mode<synchronous>, transform_indices = @transform_1, window_bounds = array<i64: 2, 128>}]} {
    %c0 = arith.constant 0 : index
    %c0_0 = arith.constant 0 : index
    %c0_1 = arith.constant 0 : index
    %0 = vector.load %arg1[%c0, %c0_0, %c0_1] : memref<1x2x128xf32, #tpu.memory_space<vmem>>, vector<1x2x128xf32>
    %1 = vector.shape_cast %0 : vector<1x2x128xf32> to vector<2x128xf32>
    %c0_i32 = arith.constant 0 : i32
    %2 = arith.cmpi eq, %arg0, %c0_i32 : i32
    %3 = arith.extui %2 : i1 to i32
    %c0_i32_2 = arith.constant 0 : i32
    %4 = arith.cmpi ne, %3, %c0_i32_2 : i32
    scf.if %4 {
      %c0_5 = arith.constant 0 : index
      %c0_6 = arith.constant 0 : index
      %8 = vector.load %arg2[%c0_5, %c0_6] : memref<2x128xf32, #tpu.memory_space<vmem>>, vector<2x128xf32>
      tpu.vector_store %arg2[%c0_5, %c0_6], %1 {strides = array<i32>} : memref<2x128xf32, #tpu.memory_space<vmem>>, vector<2x128xf32>,
    } else {
    }
    %c0_i32_3 = arith.constant 0 : i32
    %5 = arith.cmpi sgt, %arg0, %c0_i32_3 : i32
    %6 = arith.extui %5 : i1 to i32
    %c0_i32_4 = arith.constant 0 : i32
    %7 = arith.cmpi ne, %6, %c0_i32_4 : i32
    scf.if %7 {
      %c0_5 = arith.constant 0 : index
      %c0_6 = arith.constant 0 : index
      %8 = vector.load %arg2[%c0_5, %c0_6] : memref<2x128xf32, #tpu.memory_space<vmem>>, vector<2x128xf32>
      %9 = arith.maximumf %8, %1 : vector<2x128xf32>
      %c0_7 = arith.constant 0 : index
      %c0_8 = arith.constant 0 : index
      %10 = vector.load %arg2[%c0_7, %c0_8] : memref<2x128xf32, #tpu.memory_space<vmem>>, vector<2x128xf32>
      tpu.vector_store %arg2[%c0_7, %c0_8], %9 {strides = array<i32>} : memref<2x128xf32, #tpu.memory_space<vmem>>, vector<2x128xf32>,
    } else {
    }
    return
  }
  func.func @transform_0(%arg0: i32) -> (i32, i32, i32) {
    %c0_i32 = arith.constant 0 : i32
    %c0_i32_0 = arith.constant 0 : i32
    %c0_i32_1 = arith.constant 0 : i32
    return %arg0, %c0_i32, %c0_i32_0 : i32, i32, i32
  }
  func.func @transform_1(%arg0: i32) -> (i32, i32) {
    %c0_i32 = arith.constant 0 : i32
    %c0_i32_0 = arith.constant 0 : i32
    %c0_i32_1 = arith.constant 0 : i32
    return %c0_i32, %c0_i32_0 : i32, i32
  }
}

module attributes {stable_mosaic.version = 11 : i64} {
  func.func @_tail_kernel(%arg0: memref<2x128xbf16, #tpu.memory_space<vmem>>, %arg1: memref<128x192xbf16, #tpu.memory_space<vmem>>, %arg2: memref<1x192xf32, #tpu.memory_space<vmem>>, %arg3: memref<1x192xf32, #tpu.memory_space<vmem>>, %arg4: memref<192x384xbf16, #tpu.memory_space<vmem>>, %arg5: memref<1x384xf32, #tpu.memory_space<vmem>>, %arg6: memref<1x384xf32, #tpu.memory_space<vmem>>, %arg7: memref<384x256xbf16, #tpu.memory_space<vmem>>, %arg8: memref<1x256xf32, #tpu.memory_space<vmem>>, %arg9: memref<1x256xf32, #tpu.memory_space<vmem>>, %arg10: memref<256x256xbf16, #tpu.memory_space<vmem>>, %arg11: memref<1x256xf32, #tpu.memory_space<vmem>>, %arg12: memref<1x256xf32, #tpu.memory_space<vmem>>, %arg13: memref<256x64xbf16, #tpu.memory_space<vmem>>, %arg14: memref<1x64xf32, #tpu.memory_space<vmem>>, %arg15: memref<64x3xbf16, #tpu.memory_space<vmem>>, %arg16: memref<1x3xf32, #tpu.memory_space<vmem>>, %arg17: memref<2x256xf32, #tpu.memory_space<vmem>>, %arg18: memref<2x3xf32, #tpu.memory_space<vmem>>) attributes {dimension_semantics = [], scalar_prefetch = 0 : i64, scratch_operands = 0 : i64, tpu.core_type = #tpu.core_type<tc>} {
    %c0 = arith.constant 0 : index
    %c0_0 = arith.constant 0 : index
    %0 = vector.load %arg0[%c0, %c0_0] : memref<2x128xbf16, #tpu.memory_space<vmem>>, vector<2x128xbf16>
    %c0_1 = arith.constant 0 : index
    %c0_2 = arith.constant 0 : index
    %1 = vector.load %arg1[%c0_1, %c0_2] : memref<128x192xbf16, #tpu.memory_space<vmem>>, vector<128x192xbf16>
    %cst = arith.constant dense<0.000000e+00> : vector<2x192xf32>
    %2 = tpu.matmul %0, %1, %cst {dimension_numbers = #tpu.dot_dimension_numbers<[1], [0], [0], [1], [0, 0, 1, 1], [], []>} : vector<2x128xbf16>, vector<128x192xbf16>, vector<2x192xf32> -> vector<2x192xf32>
    %c0_3 = arith.constant 0 : index
    %c0_4 = arith.constant 0 : index
    %3 = vector.load %arg2[%c0_3, %c0_4] : memref<1x192xf32, #tpu.memory_space<vmem>>, vector<1x192xf32>
    %4 = vector.broadcast %3 : vector<1x192xf32> to vector<2x192xf32>
    %5 = arith.mulf %2, %4 : vector<2x192xf32>
    %c0_5 = arith.constant 0 : index
    %c0_6 = arith.constant 0 : index
    %6 = vector.load %arg3[%c0_5, %c0_6] : memref<1x192xf32, #tpu.memory_space<vmem>>, vector<1x192xf32>
    %7 = vector.broadcast %6 : vector<1x192xf32> to vector<2x192xf32>
    %8 = arith.addf %5, %7 : vector<2x192xf32>
    %cst_7 = arith.constant 0.000000e+00 : f32
    %9 = vector.broadcast %cst_7 : f32 to vector<2x192xf32>
    %10 = arith.maximumf %8, %9 : vector<2x192xf32>
    %11 = arith.truncf %10 : vector<2x192xf32> to vector<2x192xbf16>
    %c0_8 = arith.constant 0 : index
    %c0_9 = arith.constant 0 : index
    %12 = vector.load %arg4[%c0_8, %c0_9] : memref<192x384xbf16, #tpu.memory_space<vmem>>, vector<192x384xbf16>
    %cst_10 = arith.constant dense<0.000000e+00> : vector<2x384xf32>
    %13 = tpu.matmul %11, %12, %cst_10 {dimension_numbers = #tpu.dot_dimension_numbers<[1], [0], [0], [1], [0, 0, 1, 1], [], []>} : vector<2x192xbf16>, vector<192x384xbf16>, vector<2x384xf32> -> vector<2x384xf32>
    %c0_11 = arith.constant 0 : index
    %c0_12 = arith.constant 0 : index
    %14 = vector.load %arg5[%c0_11, %c0_12] : memref<1x384xf32, #tpu.memory_space<vmem>>, vector<1x384xf32>
    %15 = vector.broadcast %14 : vector<1x384xf32> to vector<2x384xf32>
    %16 = arith.mulf %13, %15 : vector<2x384xf32>
    %c0_13 = arith.constant 0 : index
    %c0_14 = arith.constant 0 : index
    %17 = vector.load %arg6[%c0_13, %c0_14] : memref<1x384xf32, #tpu.memory_space<vmem>>, vector<1x384xf32>
    %18 = vector.broadcast %17 : vector<1x384xf32> to vector<2x384xf32>
    %19 = arith.addf %16, %18 : vector<2x384xf32>
    %cst_15 = arith.constant 0.000000e+00 : f32
    %20 = vector.broadcast %cst_15 : f32 to vector<2x384xf32>
    %21 = arith.maximumf %19, %20 : vector<2x384xf32>
    %22 = arith.truncf %21 : vector<2x384xf32> to vector<2x384xbf16>
    %c0_16 = arith.constant 0 : index
    %c0_17 = arith.constant 0 : index
    %23 = vector.load %arg7[%c0_16, %c0_17] : memref<384x256xbf16, #tpu.memory_space<vmem>>, vector<384x256xbf16>
    %cst_18 = arith.constant dense<0.000000e+00> : vector<2x256xf32>
    %24 = tpu.matmul %22, %23, %cst_18 {dimension_numbers = #tpu.dot_dimension_numbers<[1], [0], [0], [1], [0, 0, 1, 1], [], []>} : vector<2x384xbf16>, vector<384x256xbf16>, vector<2x256xf32> -> vector<2x256xf32>
    %c0_19 = arith.constant 0 : index
    %c0_20 = arith.constant 0 : index
    %25 = vector.load %arg8[%c0_19, %c0_20] : memref<1x256xf32, #tpu.memory_space<vmem>>, vector<1x256xf32>
    %26 = vector.broadcast %25 : vector<1x256xf32> to vector<2x256xf32>
    %27 = arith.mulf %24, %26 : vector<2x256xf32>
    %c0_21 = arith.constant 0 : index
    %c0_22 = arith.constant 0 : index
    %28 = vector.load %arg9[%c0_21, %c0_22] : memref<1x256xf32, #tpu.memory_space<vmem>>, vector<1x256xf32>
    %29 = vector.broadcast %28 : vector<1x256xf32> to vector<2x256xf32>
    %30 = arith.addf %27, %29 : vector<2x256xf32>
    %cst_23 = arith.constant 0.000000e+00 : f32
    %31 = vector.broadcast %cst_23 : f32 to vector<2x256xf32>
    %32 = arith.maximumf %30, %31 : vector<2x256xf32>
    %33 = arith.truncf %32 : vector<2x256xf32> to vector<2x256xbf16>
    %c0_24 = arith.constant 0 : index
    %c0_25 = arith.constant 0 : index
    %34 = vector.load %arg10[%c0_24, %c0_25] : memref<256x256xbf16, #tpu.memory_space<vmem>>, vector<256x256xbf16>
    %cst_26 = arith.constant dense<0.000000e+00> : vector<2x256xf32>
    %35 = tpu.matmul %33, %34, %cst_26 {dimension_numbers = #tpu.dot_dimension_numbers<[1], [0], [0], [1], [0, 0, 1, 1], [], []>} : vector<2x256xbf16>, vector<256x256xbf16>, vector<2x256xf32> -> vector<2x256xf32>
    %c0_27 = arith.constant 0 : index
    %c0_28 = arith.constant 0 : index
    %36 = vector.load %arg11[%c0_27, %c0_28] : memref<1x256xf32, #tpu.memory_space<vmem>>, vector<1x256xf32>
    %37 = vector.broadcast %36 : vector<1x256xf32> to vector<2x256xf32>
    %38 = arith.mulf %35, %37 : vector<2x256xf32>
    %c0_29 = arith.constant 0 : index
    %c0_30 = arith.constant 0 : index
    %39 = vector.load %arg12[%c0_29, %c0_30] : memref<1x256xf32, #tpu.memory_space<vmem>>, vector<1x256xf32>
    %40 = vector.broadcast %39 : vector<1x256xf32> to vector<2x256xf32>
    %41 = arith.addf %38, %40 : vector<2x256xf32>
    %cst_31 = arith.constant 0.000000e+00 : f32
    %42 = vector.broadcast %cst_31 : f32 to vector<2x256xf32>
    %43 = arith.maximumf %41, %42 : vector<2x256xf32>
    %c0_32 = arith.constant 0 : index
    %c0_33 = arith.constant 0 : index
    %44 = vector.load %arg17[%c0_32, %c0_33] : memref<2x256xf32, #tpu.memory_space<vmem>>, vector<2x256xf32>
    tpu.vector_store %arg17[%c0_32, %c0_33], %43 {strides = array<i32>} : memref<2x256xf32, #tpu.memory_space<vmem>>, vector<2x256xf32>,
    %45 = arith.truncf %43 : vector<2x256xf32> to vector<2x256xbf16>
    %c0_34 = arith.constant 0 : index
    %c0_35 = arith.constant 0 : index
    %46 = vector.load %arg13[%c0_34, %c0_35] : memref<256x64xbf16, #tpu.memory_space<vmem>>, vector<256x64xbf16>
    %cst_36 = arith.constant dense<0.000000e+00> : vector<2x64xf32>
    %47 = tpu.matmul %45, %46, %cst_36 {dimension_numbers = #tpu.dot_dimension_numbers<[1], [0], [0], [1], [0, 0, 1, 1], [], []>} : vector<2x256xbf16>, vector<256x64xbf16>, vector<2x64xf32> -> vector<2x64xf32>
    %c0_37 = arith.constant 0 : index
    %c0_38 = arith.constant 0 : index
    %48 = vector.load %arg14[%c0_37, %c0_38] : memref<1x64xf32, #tpu.memory_space<vmem>>, vector<1x64xf32>
    %49 = vector.broadcast %48 : vector<1x64xf32> to vector<2x64xf32>
    %50 = arith.addf %47, %49 : vector<2x64xf32>
    %cst_39 = arith.constant 0.000000e+00 : f32
    %51 = vector.broadcast %cst_39 : f32 to vector<2x64xf32>
    %52 = arith.maximumf %50, %51 : vector<2x64xf32>
    %53 = arith.truncf %52 : vector<2x64xf32> to vector<2x64xbf16>
    %c0_40 = arith.constant 0 : index
    %c0_41 = arith.constant 0 : index
    %54 = vector.load %arg15[%c0_40, %c0_41] : memref<64x3xbf16, #tpu.memory_space<vmem>>, vector<64x3xbf16>
    %cst_42 = arith.constant dense<0.000000e+00> : vector<2x3xf32>
    %55 = tpu.matmul %53, %54, %cst_42 {dimension_numbers = #tpu.dot_dimension_numbers<[1], [0], [0], [1], [0, 0, 1, 1], [], []>} : vector<2x64xbf16>, vector<64x3xbf16>, vector<2x3xf32> -> vector<2x3xf32>
    %c0_43 = arith.constant 0 : index
    %c0_44 = arith.constant 0 : index
    %56 = vector.load %arg16[%c0_43, %c0_44] : memref<1x3xf32, #tpu.memory_space<vmem>>, vector<1x3xf32>
    %57 = vector.broadcast %56 : vector<1x3xf32> to vector<2x3xf32>
    %58 = arith.addf %55, %57 : vector<2x3xf32>
    %c0_45 = arith.constant 0 : index
    %c0_46 = arith.constant 0 : index
    %59 = vector.load %arg18[%c0_45, %c0_46] : memref<2x3xf32, #tpu.memory_space<vmem>>, vector<2x3xf32>
    tpu.vector_store %arg18[%c0_45, %c0_46], %58 {strides = array<i32>} : memref<2x3xf32, #tpu.memory_space<vmem>>, vector<2x3xf32>,
    return
  }
}

</mosaic_0001>

<bundles_post_ra>
// kernel: alexnet3d_forward.5
= control target key start
LH: loop header
LB: loop body
LE: loop exit
PB: predicated region body
PF: predicated region fallthrough
CT: control target
= control target key end

     0   :  { %s2770_s15 = smov 0   ;;  %s2772_s16 = smov 0   ;;  %s4202_s0 = inlined_call_operand.vmem [shape: bf16[6784,128], index: 0, kind: input, shape index: {}]   ;;  %s4203_s1 = inlined_call_operand.vmem [shape: bf16[128,64], index: 1, kind: input, shape index: {}]   ;;  %s4204_s2 = inlined_call_operand.vmem [shape: f32[1,64], index: 2, kind: input, shape index: {}]   ;;  %s4205_s3 = inlined_call_operand.vmem [shape: f32[1,64], index: 3, kind: input, shape index: {}]   ;;  %s4206_s4 = inlined_call_operand.vmem [shape: f32[6784,64], index: 4, kind: output, shape index: {}]  }
   0x1   :  { %s2774_s17 = smov 0  }
   0x2 LB: > { %s26_s18 = sadd.s32 1, %s2737_s16  ;;  %p2257_p0 = scmp.ge.s32.totalorder %s2741_s17, 1  ;;  %s2741_s17 = sphi %s2774_s17, %s14_s17   ;;  %s2737_s16 = sphi %s2772_s16, %s4208_s16   ;;  %s2733_s15 = sphi %s2770_s15, %s4207_s15  }
   0x3   : > { %p28_p1 = scmp.ge.s32.totalorder %s26_s18, 8  ;;  %p191_p2 = scmp.lt.s32.totalorder %s2741_s17, 9 }
   0x5   : > { %s4210_s18 = smov (%p28_p1, %s26_s18), 0  ;;  %p192_p3 = pnand %p2257_p0, %p191_p2 }
   0x6   : > { %v2656_v0 = vld [vmem:[%s4203_s1] sm:$0xff] (!%p192_p3)   ;;  %v2743_v1 = vmov (!%p192_p3), 0.0   ;;  %v2657_v2 = vld [vmem:[%s4203_s1 + $0x8] sm:$0xff] (!%p192_p3)   ;;  %s225_s23 = smul.u32 (!%p192_p3), 106, %s2733_s15  ;;  %vm2744_vm0 = vmmov (!%p192_p3), 0   ;;  %v2658_v3 = vld [vmem:[%s4203_s1 + $0x10] sm:$0xff] (!%p192_p3)  }
   0x7   : > { %195 = sbr.rel (%p192_p3) target bundleno = 478 (0x1de), region = 36  ;;  %2386 = vmatprep.subr.bf16.mxu0 (!%p192_p3), %v2743_v1  ;;  %2614 = vmatprep.subr.bf16.mxu1 (!%p192_p3), %v2743_v1  ;;  %v2659_v4 = vld [vmem:[%s4203_s1 + $0x18] sm:$0xff] (!%p192_p3)   ;;  %v2660_v5 = vld [vmem:[%s4203_s1 + $0x20] sm:$0xff] (!%p192_p3)   ;;  %v2661_v6 = vld [vmem:[%s4203_s1 + $0x28] sm:$0xff] (!%p192_p3)   ;;  %vm251_vm1 = vcmask (!%p192_p3), 523264  }
   0x8   : > { %2387 = vmatpush3.bf16.msra.mxu0 (!%p192_p3), %v2656_v0  ;;  %2622 = vmatpush3.bf16.msra.mxu1 (!%p192_p3), %v2656_v0  ;;  %p226_p4 = scmp.lt.s32.totalorder (!%p192_p3), %s225_s23, 847  ;;  %v2662_v7 = vld [vmem:[%s4203_s1 + $0x30] sm:$0xff] (!%p192_p3)   ;;  %v2663_v8 = vld [vmem:[%s4203_s1 + $0x38] sm:$0xff] (!%p192_p3)  }
   0x9   : > { %2388 = vmatprep.subr.bf16.mxu0 (!%p192_p3), %v2743_v1  ;;  %2615 = vmatprep.subr.bf16.mxu1 (!%p192_p3), %v2743_v1 }
   0xa   : > { %2402 = vmatprep.mubr.msk.bf16.mxu0 (!%p192_p3), %vm2744_vm0, %v2743_v1  ;;  %2510 = vmatprep.mubr.msk.bf16.mxu1 (!%p192_p3), %vm2744_vm0, %v2743_v1 }
   0xc   : > { %2389 = vmatpush3.bf16.msra.mxu0 (!%p192_p3), %v2657_v2  ;;  %2623 = vmatpush3.bf16.msra.mxu1 (!%p192_p3), %v2657_v2 }
   0xd   : > { %2390 = vmatprep.subr.bf16.mxu0 (!%p192_p3), %v2743_v1  ;;  %2616 = vmatprep.subr.bf16.mxu1 (!%p192_p3), %v2743_v1 }
   0xe   : > { %s4212_s23 = smov (!%p226_p4, %s225_s23), 847 }
   0xf   : > { %s2258_s26 = sshll.u32 %s4212_s23, 2  ;;  %s2259_s14 = sshll.u32 %s4212_s23, 3 }
  0x10   : > { %s2813_s29 = scalar_lea.vmem %s4202_s0, %s2258_s26  ;;  %2391 = vmatpush3.bf16.msra.mxu0 %v2658_v3  ;;  %2624 = vmatpush3.bf16.msra.mxu1 %v2658_v3  ;;  %s2900_s20 = scalar_lea.vmem %s4206_s4, %s2259_s14 }
  0x11   : > { %2392 = vmatprep.subr.bf16.mxu0 %v2743_v1  ;;  %2617 = vmatprep.subr.bf16.mxu1 %v2743_v1  ;;  %v2664_v9 = vld [vmem:[%s2813_s29] sm:$0xff]   ;;  %v2665_v10 = vld [vmem:[%s2813_s29 + $0xd8] sm:$0xff]   ;;  %v2666_v11 = vld [vmem:[%s2813_s29 + $0x8] sm:$0xff]   ;;  %252 = vst.msk [vmem:[%s2900_s20] sm:$0xff] %vm251_vm1, %v2743_v1 }
  0x12   : > { %v2667_v12 = vld [vmem:[%s2813_s29 + $0xe0] sm:$0xff]   ;;  %v2668_v13 = vld [vmem:[%s2813_s29 + $0x10] sm:$0xff]   ;;  %v2669_v14 = vld [vmem:[%s2813_s29 + $0xe8] sm:$0xff]   ;;  %253 = vst.msk [vmem:[%s2900_s20 + $0x8] sm:$0xff] %vm251_vm1, %v2743_v1 }
  0x13   : > { %v2670_v15 = vld [vmem:[%s2813_s29 + $0x18] sm:$0xff]   ;;  %v2671_v16 = vld [vmem:[%s2813_s29 + $0xf0] sm:$0xff]   ;;  %v2672_v17 = vld [vmem:[%s2813_s29 + $0x20] sm:$0xff]   ;;  %254 = vst.msk [vmem:[%s2900_s20 + $0x10] sm:$0xff] %vm251_vm1, %v2743_v1 }
  0x14   : > { %2393 = vmatpush3.bf16.msra.mxu0 %v2659_v4  ;;  %2625 = vmatpush3.bf16.msra.mxu1 %v2659_v4  ;;  %v2673_v18 = vld [vmem:[%s2813_s29 + $0xf8] sm:$0xff]   ;;  %v2674_v19 = vld [vmem:[%s2813_s29 + $0x28] sm:$0xff]   ;;  %v2675_v20 = vld [vmem:[%s2813_s29 + $0x100] sm:$0xff]   ;;  %255 = vst.msk [vmem:[%s2900_s20 + $0x18] sm:$0xff] %vm251_vm1, %v2743_v1 }
  0x15   : > { %2394 = vmatprep.subr.bf16.mxu0 %v2743_v1  ;;  %2618 = vmatprep.subr.bf16.mxu1 %v2743_v1  ;;  %v2676_v21 = vld [vmem:[%s2813_s29 + $0x30] sm:$0xff]   ;;  %v2677_v22 = vld [vmem:[%s2813_s29 + $0x108] sm:$0xff]   ;;  %v2678_v23 = vld [vmem:[%s2813_s29 + $0x38] sm:$0xff]   ;;  %256 = vst.msk [vmem:[%s2900_s20 + $0x20] sm:$0xff] %vm251_vm1, %v2743_v1 }
  0x16   : > { %v2679_v24 = vld [vmem:[%s2813_s29 + $0x110] sm:$0xff]   ;;  %v2680_v25 = vld [vmem:[%s2813_s29 + $0x40] sm:$0xff]   ;;  %v2681_v26 = vld [vmem:[%s2813_s29 + $0x118] sm:$0xff]   ;;  %257 = vst.msk [vmem:[%s2900_s20 + $0x28] sm:$0xff] %vm251_vm1, %v2743_v1 }
  0x17   : > { %v2682_v27 = vld [vmem:[%s2813_s29 + $0x48] sm:$0xff]   ;;  %v2683_v28 = vld [vmem:[%s2813_s29 + $0x120] sm:$0xff]   ;;  %v2907_v29 = vld [vmem:[%s2813_s29 + $0x50] sm:$0xff]   ;;  %258 = vst.msk [vmem:[%s2900_s20 + $0x30] sm:$0xff] %vm251_vm1, %v2743_v1 }
  0x18   : > { %2395 = vmatpush3.bf16.msra.mxu0 %v2660_v5  ;;  %2626 = vmatpush3.bf16.msra.mxu1 %v2660_v5  ;;  %v2910_v30 = vld [vmem:[%s2813_s29 + $0x128] sm:$0xff]   ;;  %259 = vst.msk [vmem:[%s2900_s20 + $0x38] sm:$0xff] %vm251_vm1, %v2743_v1  ;;  %260 = vst.msk [vmem:[%s2900_s20 + $0x40] sm:$0xff] %vm251_vm1, %v2743_v1  ;;  %v2686_v31 = vld [vmem:[%s2813_s29 + $0x58] sm:$0xff]  }
  0x19   : > { %2396 = vmatprep.subr.bf16.mxu0 %v2743_v1  ;;  %2619 = vmatprep.subr.bf16.mxu1 %v2743_v1  ;;  %261 = vst.msk [vmem:[%s2900_s20 + $0x48] sm:$0xff] %vm251_vm1, %v2743_v1  ;;  %262 = vst.msk [vmem:[%s2900_s20 + $0x50] sm:$0xff] %vm251_vm1, %v2743_v1  ;;  %v2687_v32 = vld [vmem:[%s2813_s29 + $0x130] sm:$0xff]   ;;  %v2688_v33 = vld [vmem:[%s2813_s29 + $0x60] sm:$0xff]  }
  0x1a   : > { %263 = vst.msk [vmem:[%s2900_s20 + $0x58] sm:$0xff] %vm251_vm1, %v2743_v1  ;;  %264 = vst.msk [vmem:[%s2900_s20 + $0x60] sm:$0xff] %vm251_vm1, %v2743_v1  ;;  %v2689_v34 = vld [vmem:[%s2813_s29 + $0x138] sm:$0xff]   ;;  %v2690_v35 = vld [vmem:[%s2813_s29 + $0x68] sm:$0xff]  }
  0x1b   : > { %265 = vst.msk [vmem:[%s2900_s20 + $0x68] sm:$0xff] %vm251_vm1, %v2743_v1  ;;  %266 = vst.msk [vmem:[%s2900_s20 + $0x70] sm:$0xff] %vm251_vm1, %v2743_v1  ;;  %v2691_v36 = vld [vmem:[%s2813_s29 + $0x140] sm:$0xff]   ;;  %v2692_v37 = vld [vmem:[%s2813_s29 + $0x70] sm:$0xff]  }
  0x1c   : > { %2397 = vmatpush3.bf16.msra.mxu0 %v2661_v6  ;;  %2627 = vmatpush3.bf16.msra.mxu1 %v2661_v6  ;;  %267 = vst.msk [vmem:[%s2900_s20 + $0x78] sm:$0xff] %vm251_vm1, %v2743_v1  ;;  %268 = vst.msk [vmem:[%s2900_s20 + $0x80] sm:$0xff] %vm251_vm1, %v2743_v1  ;;  %v2693_v38 = vld [vmem:[%s2813_s29 + $0x148] sm:$0xff]   ;;  %v2694_v39 = vld [vmem:[%s2813_s29 + $0x78] sm:$0xff]  }
  0x1d   : > { %2398 = vmatprep.subr.bf16.mxu0 %v2743_v1  ;;  %2620 = vmatprep.subr.bf16.mxu1 %v2743_v1  ;;  %269 = vst.msk [vmem:[%s2900_s20 + $0x88] sm:$0xff] %vm251_vm1, %v2743_v1  ;;  %270 = vst.msk [vmem:[%s2900_s20 + $0x90] sm:$0xff] %vm251_vm1, %v2743_v1  ;;  %v2695_v40 = vld [vmem:[%s2813_s29 + $0x150] sm:$0xff]   ;;  %v2696_v41 = vld [vmem:[%s2813_s29 + $0x80] sm:$0xff]  }
  0x1e   : > { %271 = vst.msk [vmem:[%s2900_s20 + $0x98] sm:$0xff] %vm251_vm1, %v2743_v1  ;;  %272 = vst.msk [vmem:[%s2900_s20 + $0xa0] sm:$0xff] %vm251_vm1, %v2743_v1  ;;  %v2697_v42 = vld [vmem:[%s2813_s29 + $0x158] sm:$0xff]   ;;  %v2698_v43 = vld [vmem:[%s2813_s29 + $0x88] sm:$0xff]  }
  0x1f   : > { %273 = vst.msk [vmem:[%s2900_s20 + $0xa8] sm:$0xff] %vm251_vm1, %v2743_v1  ;;  %274 = vst.msk [vmem:[%s2900_s20 + $0xb0] sm:$0xff] %vm251_vm1, %v2743_v1  ;;  %v2699_v44 = vld [vmem:[%s2813_s29 + $0x160] sm:$0xff]   ;;  %v2700_v45 = vld [vmem:[%s2813_s29 + $0x90] sm:$0xff]  }
  0x20   : > { %2399 = vmatpush3.bf16.msra.mxu0 %v2662_v7  ;;  %2628 = vmatpush3.bf16.msra.mxu1 %v2662_v7  ;;  %275 = vst.msk [vmem:[%s2900_s20 + $0xb8] sm:$0xff] %vm251_vm1, %v2743_v1  ;;  %276 = vst.msk [vmem:[%s2900_s20 + $0xc0] sm:$0xff] %vm251_vm1, %v2743_v1  ;;  %v2701_v46 = vld [vmem:[%s2813_s29 + $0x168] sm:$0xff]   ;;  %v2702_v47 = vld [vmem:[%s2813_s29 + $0x98] sm:$0xff]  }
  0x21   : > { %2400 = vmatprep.subr.bf16.mxu0 %v2743_v1  ;;  %2621 = vmatprep.subr.bf16.mxu1 %v2743_v1  ;;  %277 = vst.msk [vmem:[%s2900_s20 + $0xc8] sm:$0xff] %vm251_vm1, %v2743_v1  ;;  %278 = vst.msk [vmem:[%s2900_s20 + $0xd0] sm:$0xff] %vm251_vm1, %v2743_v1  ;;  %v2703_v48 = vld [vmem:[%s2813_s29 + $0x170] sm:$0xff]   ;;  %v2704_v49 = vld [vmem:[%s2813_s29 + $0xa0] sm:$0xff]  }
  0x22   : > { %279 = vst.msk [vmem:[%s2900_s20 + $0xd8] sm:$0xff] %vm251_vm1, %v2743_v1  ;;  %280 = vst.msk [vmem:[%s2900_s20 + $0xe0] sm:$0xff] %vm251_vm1, %v2743_v1  ;;  %v2705_v50 = vld [vmem:[%s2813_s29 + $0x178] sm:$0xff]   ;;  %v2706_v51 = vld [vmem:[%s2813_s29 + $0xa8] sm:$0xff]  }
  0x23   : > { %281 = vst.msk [vmem:[%s2900_s20 + $0xe8] sm:$0xff] %vm251_vm1, %v2743_v1  ;;  %282 = vst.msk [vmem:[%s2900_s20 + $0xf0] sm:$0xff] %vm251_vm1, %v2743_v1  ;;  %v2707_v52 = vld [vmem:[%s2813_s29 + $0x180] sm:$0xff]   ;;  %v2708_v53 = vld [vmem:[%s2813_s29 + $0xb0] sm:$0xff]  }
  0x24   : > { %2401 = vmatpush3.bf16.msra.mxu0 %v2663_v8  ;;  %2629 = vmatpush3.bf16.msra.mxu1 %v2663_v8  ;;  %283 = vst.msk [vmem:[%s2900_s20 + $0xf8] sm:$0xff] %vm251_vm1, %v2743_v1  ;;  %284 = vst.msk [vmem:[%s2900_s20 + $0x100] sm:$0xff] %vm251_vm1, %v2743_v1  ;;  %v2709_v54 = vld [vmem:[%s2813_s29 + $0x188] sm:$0xff]   ;;  %v2710_v55 = vld [vmem:[%s2813_s29 + $0xb8] sm:$0xff]  }
  0x25   : > { %285 = vst.msk [vmem:[%s2900_s20 + $0x108] sm:$0xff] %vm251_vm1, %v2743_v1  ;;  %286 = vst.msk [vmem:[%s2900_s20 + $0x110] sm:$0xff] %vm251_vm1, %v2743_v1  ;;  %v2711_v56 = vld [vmem:[%s2813_s29 + $0x190] sm:$0xff]   ;;  %v2712_v57 = vld [vmem:[%s2813_s29 + $0xc0] sm:$0xff]  }
  0x26   : > { %287 = vst.msk [vmem:[%s2900_s20 + $0x118] sm:$0xff] %vm251_vm1, %v2743_v1  ;;  %288 = vst.msk [vmem:[%s2900_s20 + $0x120] sm:$0xff] %vm251_vm1, %v2743_v1  ;;  %v2713_v58 = vld [vmem:[%s2813_s29 + $0x198] sm:$0xff]   ;;  %v2714_v59 = vld [vmem:[%s2813_s29 + $0xc8] sm:$0xff]  }
  0x27   : > { %2403 = vmatmul.mubr.bf16.vlgmr.msra.gmra.mrb[0].mxu0 %v2664_v9  ;;  %2511 = vmatmul.mubr.bf16.vlgmr.msra.gmra.mrb[0].mxu1 %v2665_v10  ;;  %289 = vst.msk [vmem:[%s2900_s20 + $0x128] sm:$0xff] %vm251_vm1, %v2743_v1  ;;  %290 = vst.msk [vmem:[%s2900_s20 + $0x130] sm:$0xff] %vm251_vm1, %v2743_v1  ;;  %v2715_v60 = vld [vmem:[%s2813_s29 + $0x1a0] sm:$0xff]   ;;  %v2716_v61 = vld [vmem:[%s2813_s29 + $0xd0] sm:$0xff]  }
  0x28   : > { %2406 = vmatprep.mubr.msk.bf16.mxu0 %vm2744_vm0, %v2743_v1  ;;  %2514 = vmatprep.mubr.msk.bf16.mxu1 %vm2744_vm0, %v2743_v1  ;;  %291 = vst.msk [vmem:[%s2900_s20 + $0x138] sm:$0xff] %vm251_vm1, %v2743_v1  ;;  %292 = vst.msk [vmem:[%s2900_s20 + $0x140] sm:$0xff] %vm251_vm1, %v2743_v1  ;;  %v358_v62 = vld [vmem:[%s2900_s20] sm:$0xff]  ;;  %v359_v2 = vld [vmem:[%s2900_s20 + $0x8] sm:$0xff] }
  0x29   : > { %293 = vst.msk [vmem:[%s2900_s20 + $0x148] sm:$0xff] %vm251_vm1, %v2743_v1  ;;  %294 = vst.msk [vmem:[%s2900_s20 + $0x150] sm:$0xff] %vm251_vm1, %v2743_v1 }
  0x2a   : > { %295 = vst.msk [vmem:[%s2900_s20 + $0x158] sm:$0xff] %vm251_vm1, %v2743_v1  ;;  %296 = vst.msk [vmem:[%s2900_s20 + $0x160] sm:$0xff] %vm251_vm1, %v2743_v1 }
  0x2b   : > { %297 = vst.msk [vmem:[%s2900_s20 + $0x168] sm:$0xff] %vm251_vm1, %v2743_v1  ;;  %298 = vst.msk [vmem:[%s2900_s20 + $0x170] sm:$0xff] %vm251_vm1, %v2743_v1 }
  0x2c   : > { %299 = vst.msk [vmem:[%s2900_s20 + $0x178] sm:$0xff] %vm251_vm1, %v2743_v1  ;;  %300 = vst.msk [vmem:[%s2900_s20 + $0x180] sm:$0xff] %vm251_vm1, %v2743_v1 }
  0x2d   : > { %301 = vst.msk [vmem:[%s2900_s20 + $0x188] sm:$0xff] %vm251_vm1, %v2743_v1  ;;  %302 = vst.msk [vmem:[%s2900_s20 + $0x190] sm:$0xff] %vm251_vm1, %v2743_v1 }
  0x2e   : > { %303 = vst.msk [vmem:[%s2900_s20 + $0x198] sm:$0xff] %vm251_vm1, %v2743_v1  ;;  %304 = vst.msk [vmem:[%s2900_s20 + $0x1a0] sm:$0xff] %vm251_vm1, %v2743_v1 }
  0x2f   : > { %2407 = vmatmul.mubr.bf16.gmra.mrb[4].mxu0 %v2666_v11  ;;  %2515 = vmatmul.mubr.bf16.gmra.mrb[4].mxu1 %v2667_v12  ;;  %305 = vst.msk [vmem:[%s2900_s20 + $0x1a8] sm:$0xff] %vm251_vm1, %v2743_v1  ;;  %306 = vst.msk [vmem:[%s2900_s20 + $0x1b0] sm:$0xff] %vm251_vm1, %v2743_v1 }
  0x30   : > { %2410 = vmatprep.mubr.msk.bf16.mxu0 %vm2744_vm0, %v2743_v1  ;;  %2518 = vmatprep.mubr.msk.bf16.mxu1 %vm2744_vm0, %v2743_v1  ;;  %307 = vst.msk [vmem:[%s2900_s20 + $0x1b8] sm:$0xff] %vm251_vm1, %v2743_v1  ;;  %308 = vst.msk [vmem:[%s2900_s20 + $0x1c0] sm:$0xff] %vm251_vm1, %v2743_v1 }
  0x31   : > { %309 = vst.msk [vmem:[%s2900_s20 + $0x1c8] sm:$0xff] %vm251_vm1, %v2743_v1  ;;  %310 = vst.msk [vmem:[%s2900_s20 + $0x1d0] sm:$0xff] %vm251_vm1, %v2743_v1 }
  0x32   : > { %311 = vst.msk [vmem:[%s2900_s20 + $0x1d8] sm:$0xff] %vm251_vm1, %v2743_v1  ;;  %312 = vst.msk [vmem:[%s2900_s20 + $0x1e0] sm:$0xff] %vm251_vm1, %v2743_v1 }
  0x33   : > { %313 = vst.msk [vmem:[%s2900_s20 + $0x1e8] sm:$0xff] %vm251_vm1, %v2743_v1  ;;  %314 = vst.msk [vmem:[%s2900_s20 + $0x1f0] sm:$0xff] %vm251_vm1, %v2743_v1 }
  0x34   : > { %315 = vst.msk [vmem:[%s2900_s20 + $0x1f8] sm:$0xff] %vm251_vm1, %v2743_v1  ;;  %316 = vst.msk [vmem:[%s2900_s20 + $0x200] sm:$0xff] %vm251_vm1, %v2743_v1 }
  0x35   : > { %317 = vst.msk [vmem:[%s2900_s20 + $0x208] sm:$0xff] %vm251_vm1, %v2743_v1  ;;  %318 = vst.msk [vmem:[%s2900_s20 + $0x210] sm:$0xff] %vm251_vm1, %v2743_v1 }
  0x36   : > { %319 = vst.msk [vmem:[%s2900_s20 + $0x218] sm:$0xff] %vm251_vm1, %v2743_v1  ;;  %320 = vst.msk [vmem:[%s2900_s20 + $0x220] sm:$0xff] %vm251_vm1, %v2743_v1  ;;  %v412_v63 = vld [vmem:[%s2900_s20 + $0x1b0] sm:$0xff] }
  0x37   : > { %2411 = vmatmul.mubr.bf16.gmra.mrb[8].mxu0 %v2668_v13  ;;  %2519 = vmatmul.mubr.bf16.gmra.mrb[8].mxu1 %v2669_v14  ;;  %321 = vst.msk [vmem:[%s2900_s20 + $0x228] sm:$0xff] %vm251_vm1, %v2743_v1  ;;  %322 = vst.msk [vmem:[%s2900_s20 + $0x230] sm:$0xff] %vm251_vm1, %v2743_v1  ;;  %v413_v4 = vld [vmem:[%s2900_s20 + $0x1b8] sm:$0xff]  ;;  %v360_v14 = vld [vmem:[%s2900_s20 + $0x10] sm:$0xff] }
  0x38   : > { %2414 = vmatprep.mubr.msk.bf16.mxu0 %vm2744_vm0, %v2743_v1  ;;  %2522 = vmatprep.mubr.msk.bf16.mxu1 %vm2744_vm0, %v2743_v1  ;;  %323 = vst.msk [vmem:[%s2900_s20 + $0x238] sm:$0xff] %vm251_vm1, %v2743_v1  ;;  %324 = vst.msk [vmem:[%s2900_s20 + $0x240] sm:$0xff] %vm251_vm1, %v2743_v1 }
  0x39   : > { %325 = vst.msk [vmem:[%s2900_s20 + $0x248] sm:$0xff] %vm251_vm1, %v2743_v1  ;;  %326 = vst.msk [vmem:[%s2900_s20 + $0x250] sm:$0xff] %vm251_vm1, %v2743_v1 }
  0x3a   : > { %327 = vst.msk [vmem:[%s2900_s20 + $0x258] sm:$0xff] %vm251_vm1, %v2743_v1  ;;  %328 = vst.msk [vmem:[%s2900_s20 + $0x260] sm:$0xff] %vm251_vm1, %v2743_v1 }
  0x3b   : > { %329 = vst.msk [vmem:[%s2900_s20 + $0x268] sm:$0xff] %vm251_vm1, %v2743_v1  ;;  %330 = vst.msk [vmem:[%s2900_s20 + $0x270] sm:$0xff] %vm251_vm1, %v2743_v1 }
  0x3c   : > { %331 = vst.msk [vmem:[%s2900_s20 + $0x278] sm:$0xff] %vm251_vm1, %v2743_v1  ;;  %332 = vst.msk [vmem:[%s2900_s20 + $0x280] sm:$0xff] %vm251_vm1, %v2743_v1 }
  0x3d   : > { %333 = vst.msk [vmem:[%s2900_s20 + $0x288] sm:$0xff] %vm251_vm1, %v2743_v1  ;;  %334 = vst.msk [vmem:[%s2900_s20 + $0x290] sm:$0xff] %vm251_vm1, %v2743_v1 }
  0x3e   : > { %335 = vst.msk [vmem:[%s2900_s20 + $0x298] sm:$0xff] %vm251_vm1, %v2743_v1  ;;  %336 = vst.msk [vmem:[%s2900_s20 + $0x2a0] sm:$0xff] %vm251_vm1, %v2743_v1 }
  0x3f   : > { %2415 = vmatmul.mubr.bf16.gmra.mrb[12].mxu0 %v2670_v15  ;;  %2523 = vmatmul.mubr.bf16.gmra.mrb[12].mxu1 %v2671_v16  ;;  %337 = vst.msk [vmem:[%s2900_s20 + $0x2a8] sm:$0xff] %vm251_vm1, %v2743_v1  ;;  %338 = vst.msk [vmem:[%s2900_s20 + $0x2b0] sm:$0xff] %vm251_vm1, %v2743_v1  ;;  %v414_v15 = vld [vmem:[%s2900_s20 + $0x1c0] sm:$0xff] }
  0x40   : > { %2418 = vmatprep.mubr.msk.bf16.mxu0 %vm2744_vm0, %v2743_v1  ;;  %2526 = vmatprep.mubr.msk.bf16.mxu1 %vm2744_vm0, %v2743_v1  ;;  %339 = vst.msk [vmem:[%s2900_s20 + $0x2b8] sm:$0xff] %vm251_vm1, %v2743_v1  ;;  %340 = vst.msk [vmem:[%s2900_s20 + $0x2c0] sm:$0xff] %vm251_vm1, %v2743_v1  ;;  %v3342_v16 = vld [vmem:[%s4204_s2] ss:$0 sm:$0xff] }
  0x41   : > { %341 = vst.msk [vmem:[%s2900_s20 + $0x2c8] sm:$0xff] %vm251_vm1, %v2743_v1  ;;  %342 = vst.msk [vmem:[%s2900_s20 + $0x2d0] sm:$0xff] %vm251_vm1, %v2743_v1 }
  0x42   : > { %343 = vst.msk [vmem:[%s2900_s20 + $0x2d8] sm:$0xff] %vm251_vm1, %v2743_v1  ;;  %344 = vst.msk [vmem:[%s2900_s20 + $0x2e0] sm:$0xff] %vm251_vm1, %v2743_v1 }
  0x43   : > { %345 = vst.msk [vmem:[%s2900_s20 + $0x2e8] sm:$0xff] %vm251_vm1, %v2743_v1  ;;  %346 = vst.msk [vmem:[%s2900_s20 + $0x2f0] sm:$0xff] %vm251_vm1, %v2743_v1 }
  0x44   : > { %347 = vst.msk [vmem:[%s2900_s20 + $0x2f8] sm:$0xff] %vm251_vm1, %v2743_v1  ;;  %348 = vst.msk [vmem:[%s2900_s20 + $0x300] sm:$0xff] %vm251_vm1, %v2743_v1 }
  0x45   : > { %349 = vst.msk [vmem:[%s2900_s20 + $0x308] sm:$0xff] %vm251_vm1, %v2743_v1  ;;  %350 = vst.msk [vmem:[%s2900_s20 + $0x310] sm:$0xff] %vm251_vm1, %v2743_v1 }
  0x46   : > { %351 = vst.msk [vmem:[%s2900_s20 + $0x318] sm:$0xff] %vm251_vm1, %v2743_v1  ;;  %352 = vst.msk [vmem:[%s2900_s20 + $0x320] sm:$0xff] %vm251_vm1, %v2743_v1 }
  0x47   : > { %2419 = vmatmul.mubr.bf16.gmra.mrb[16].mxu0 %v2672_v17  ;;  %2527 = vmatmul.mubr.bf16.gmra.mrb[16].mxu1 %v2673_v18  ;;  %353 = vst.msk [vmem:[%s2900_s20 + $0x328] sm:$0xff] %vm251_vm1, %v2743_v1  ;;  %354 = vst.msk [vmem:[%s2900_s20 + $0x330] sm:$0xff] %vm251_vm1, %v2743_v1  ;;  %v361_v18 = vld [vmem:[%s2900_s20 + $0x18] sm:$0xff] }
  0x48   : > { %2422 = vmatprep.mubr.msk.bf16.mxu0 %vm2744_vm0, %v2743_v1  ;;  %2530 = vmatprep.mubr.msk.bf16.mxu1 %vm2744_vm0, %v2743_v1  ;;  %355 = vst.msk [vmem:[%s2900_s20 + $0x338] sm:$0xff] %vm251_vm1, %v2743_v1  ;;  %356 = vst.msk [vmem:[%s2900_s20 + $0x340] sm:$0xff] %vm251_vm1, %v2743_v1 }
  0x49   : > { %357 = vst.msk [vmem:[%s2900_s20 + $0x348] sm:$0xff] %vm251_vm1, %v2743_v1 }
  0x4f   : > { %2423 = vmatmul.mubr.bf16.gmra.mrb[20].mxu0 %v2674_v19  ;;  %2531 = vmatmul.mubr.bf16.gmra.mrb[20].mxu1 %v2675_v20  ;;  %v415_v20 = vld [vmem:[%s2900_s20 + $0x1c8] sm:$0xff] }
  0x50   : > { %2426 = vmatprep.mubr.msk.bf16.mxu0 %vm2744_vm0, %v2743_v1  ;;  %2534 = vmatprep.mubr.msk.bf16.mxu1 %vm2744_vm0, %v2743_v1 }
  0x57   : > { %2427 = vmatmul.mubr.bf16.gmra.mrb[24].mxu0 %v2676_v21  ;;  %2535 = vmatmul.mubr.bf16.gmra.mrb[24].mxu1 %v2677_v22 }
  0x58   : > { %2430 = vmatprep.mubr.msk.bf16.mxu0 %vm2744_vm0, %v2743_v1  ;;  %2538 = vmatprep.mubr.msk.bf16.mxu1 %vm2744_vm0, %v2743_v1 }
  0x5f   : > { %2431 = vmatmul.mubr.bf16.gmra.mrb[28].mxu0 %v2678_v23  ;;  %2539 = vmatmul.mubr.bf16.gmra.mrb[28].mxu1 %v2679_v24 }
  0x60   : > { %2434 = vmatprep.mubr.msk.bf16.mxu0 %vm2744_vm0, %v2743_v1  ;;  %2542 = vmatprep.mubr.msk.bf16.mxu1 %vm2744_vm0, %v2743_v1 }
  0x67   : > { %2435 = vmatmul.mubr.bf16.gmra.mrb[32].mxu0 %v2680_v25  ;;  %2543 = vmatmul.mubr.bf16.gmra.mrb[32].mxu1 %v2681_v26  ;;  %v3350_v26 = vld [vmem:[%s4205_s3] ss:$0 sm:$0xff] }
  0x68   : > { %2438 = vmatprep.mubr.msk.bf16.mxu0 %vm2744_vm0, %v2743_v1  ;;  %2546 = vmatprep.mubr.msk.bf16.mxu1 %vm2744_vm0, %v2743_v1 }
  0x6f   : > { %2439 = vmatmul.mubr.bf16.gmra.mrb[36].mxu0 %v2682_v27  ;;  %2547 = vmatmul.mubr.bf16.gmra.mrb[36].mxu1 %v2683_v28 }
  0x70   : > { %2442 = vmatprep.mubr.msk.bf16.mxu0 %vm2744_vm0, %v2743_v1  ;;  %2550 = vmatprep.mubr.msk.bf16.mxu1 %vm2744_vm0, %v2743_v1 }
  0x77   : > { %2443 = vmatmul.mubr.bf16.gmra.mrb[40].mxu0 %v2907_v29  ;;  %2551 = vmatmul.mubr.bf16.gmra.mrb[40].mxu1 %v2910_v30 }
  0x78   : > { %2446 = vmatprep.mubr.msk.bf16.mxu0 %vm2744_vm0, %v2743_v1  ;;  %2554 = vmatprep.mubr.msk.bf16.mxu1 %vm2744_vm0, %v2743_v1 }
  0x7f   : > { %2447 = vmatmul.mubr.bf16.gmra.mrb[44].mxu0 %v2686_v31  ;;  %2555 = vmatmul.mubr.bf16.gmra.mrb[44].mxu1 %v2687_v32 }
  0x80   : > { %2450 = vmatprep.mubr.msk.bf16.mxu0 %vm2744_vm0, %v2743_v1  ;;  %2558 = vmatprep.mubr.msk.bf16.mxu1 %vm2744_vm0, %v2743_v1 }
  0x87   : > { %2451 = vmatmul.mubr.bf16.gmra.mrb[48].mxu0 %v2688_v33  ;;  %2559 = vmatmul.mubr.bf16.gmra.mrb[48].mxu1 %v2689_v34 }
  0x88   : > { %2454 = vmatprep.mubr.msk.bf16.mxu0 %vm2744_vm0, %v2743_v1  ;;  %2562 = vmatprep.mubr.msk.bf16.mxu1 %vm2744_vm0, %v2743_v1 }
  0x8f   : > { %2455 = vmatmul.mubr.bf16.gmra.mrb[52].mxu0 %v2690_v35  ;;  %2563 = vmatmul.mubr.bf16.gmra.mrb[52].mxu1 %v2691_v36 }
  0x90   : > { %2458 = vmatprep.mubr.msk.bf16.mxu0 %vm2744_vm0, %v2743_v1  ;;  %2566 = vmatprep.mubr.msk.bf16.mxu1 %vm2744_vm0, %v2743_v1 }
  0x97   : > { %2459 = vmatmul.mubr.bf16.gmra.mrb[56].mxu0 %v2692_v37  ;;  %2567 = vmatmul.mubr.bf16.gmra.mrb[56].mxu1 %v2693_v38 }
  0x98   : > { %2462 = vmatprep.mubr.msk.bf16.mxu0 %vm2744_vm0, %v2743_v1  ;;  %2570 = vmatprep.mubr.msk.bf16.mxu1 %vm2744_vm0, %v2743_v1 }
  0x9f   : > { %2463 = vmatmul.mubr.bf16.gmra.mrb[60].mxu0 %v2694_v39  ;;  %2571 = vmatmul.mubr.bf16.gmra.mrb[60].mxu1 %v2695_v40 }
  0xa0   : > { %2466 = vmatprep.mubr.msk.bf16.mxu0 %vm2744_vm0, %v2743_v1  ;;  %2574 = vmatprep.mubr.msk.bf16.mxu1 %vm2744_vm0, %v2743_v1 }
  0xa7   : > { %2467 = vmatmul.mubr.bf16.gmra.mrb[64].mxu0 %v2696_v41  ;;  %2575 = vmatmul.mubr.bf16.gmra.mrb[64].mxu1 %v2697_v42  ;;  %v362_v42 = vld [vmem:[%s2900_s20 + $0x20] sm:$0xff] }
  0xa8   : > { %2470 = vmatprep.mubr.msk.bf16.mxu0 %vm2744_vm0, %v2743_v1  ;;  %2578 = vmatprep.mubr.msk.bf16.mxu1 %vm2744_vm0, %v2743_v1 }
  0xaf   : > { %2471 = vmatmul.mubr.bf16.gmra.mrb[68].mxu0 %v2698_v43  ;;  %2579 = vmatmul.mubr.bf16.gmra.mrb[68].mxu1 %v2699_v44  ;;  %v416_v43 = vld [vmem:[%s2900_s20 + $0x1d0] sm:$0xff] }
  0xb0   : > { %2474 = vmatprep.mubr.msk.bf16.mxu0 %vm2744_vm0, %v2743_v1  ;;  %2582 = vmatprep.mubr.msk.bf16.mxu1 %vm2744_vm0, %v2743_v1 }
  0xb7   : > { %2475 = vmatmul.mubr.bf16.gmra.mrb[72].mxu0 %v2700_v45  ;;  %2583 = vmatmul.mubr.bf16.gmra.mrb[72].mxu1 %v2701_v46 }
  0xb8   : > { %2478 = vmatprep.mubr.msk.bf16.mxu0 %vm2744_vm0, %v2743_v1  ;;  %2586 = vmatprep.mubr.msk.bf16.mxu1 %vm2744_vm0, %v2743_v1 }
  0xbf   : > { %2479 = vmatmul.mubr.bf16.gmra.mrb[76].mxu0 %v2702_v47  ;;  %2587 = vmatmul.mubr.bf16.gmra.mrb[76].mxu1 %v2703_v48 }
  0xc0   : > { %2482 = vmatprep.mubr.msk.bf16.mxu0 %vm2744_vm0, %v2743_v1  ;;  %2590 = vmatprep.mubr.msk.bf16.mxu1 %vm2744_vm0, %v2743_v1 }
  0xc7   : > { %2483 = vmatmul.mubr.bf16.gmra.mrb[80].mxu0 %v2704_v49  ;;  %2591 = vmatmul.mubr.bf16.gmra.mrb[80].mxu1 %v2705_v50  ;;  %v363_v49 = vld [vmem:[%s2900_s20 + $0x28] sm:$0xff] }
  0xc8   : > { %2486 = vmatprep.mubr.msk.bf16.mxu0 %vm2744_vm0, %v2743_v1  ;;  %2594 = vmatprep.mubr.msk.bf16.mxu1 %vm2744_vm0, %v2743_v1 }
  0xcf   : > { %2487 = vmatmul.mubr.bf16.gmra.mrb[84].mxu0 %v2706_v51  ;;  %2595 = vmatmul.mubr.bf16.gmra.mrb[84].mxu1 %v2707_v52  ;;  %v417_v51 = vld [vmem:[%s2900_s20 + $0x1d8] sm:$0xff] }
  0xd0   : > { %2490 = vmatprep.mubr.msk.bf16.mxu0 %vm2744_vm0, %v2743_v1  ;;  %2598 = vmatprep.mubr.msk.bf16.mxu1 %vm2744_vm0, %v2743_v1 }
  0xd7   : > { %2491 = vmatmul.mubr.bf16.gmra.mrb[88].mxu0 %v2708_v53  ;;  %2599 = vmatmul.mubr.bf16.gmra.mrb[88].mxu1 %v2709_v54 }
  0xd8   : > { %2494 = vmatprep.mubr.msk.bf16.mxu0 %vm2744_vm0, %v2743_v1  ;;  %2602 = vmatprep.mubr.msk.bf16.mxu1 %vm2744_vm0, %v2743_v1 }
  0xdf   : > { %2495 = vmatmul.mubr.bf16.gmra.mrb[92].mxu0 %v2710_v55  ;;  %2603 = vmatmul.mubr.bf16.gmra.mrb[92].mxu1 %v2711_v56 }
  0xe0   : > { %2498 = vmatprep.mubr.msk.bf16.mxu0 %vm2744_vm0, %v2743_v1  ;;  %2606 = vmatprep.mubr.msk.bf16.mxu1 %vm2744_vm0, %v2743_v1 }
  0xe7   : > { %2499 = vmatmul.mubr.bf16.gmra.mrb[96].mxu0 %v2712_v57  ;;  %2607 = vmatmul.mubr.bf16.gmra.mrb[96].mxu1 %v2713_v58 }
  0xe8   : > { %2502 = vmatprep.mubr.msk.bf16.mxu0 %vm2744_vm0, %v2743_v1  ;;  %2610 = vmatprep.mubr.msk.bf16.mxu1 %vm2744_vm0, %v2743_v1 }
  0xef   : > { %2503 = vmatmul.mubr.bf16.gmra.mrb[100].mxu0 %v2714_v59  ;;  %2611 = vmatmul.mubr.bf16.gmra.mrb[100].mxu1 %v2715_v60 }
  0xf0   : > { %2506 = vmatprep.mubr.msk.bf16.mxu0 %vm2744_vm0, %v2743_v1 }
  0xf7   : > { %2507 = vmatmul.mubr.bf16.gmra.mrb[104].mxu0 %v2716_v61 }
  0xfa   : > { %v986_v0 = vpop.f32.mrb[0].mxu0  ;;  %v1202_v3 = vpop.f32.mrb[0].mxu1 }
  0xfb   : > { %v1409_v5 = vadd.f32 %v986_v0, %v358_v62  ;;  %v2404_v6 = vpop.f32.mrb[1].mxu0  ;;  %v1463_v7 = vadd.f32 %v1202_v3, %v412_v63  ;;  %v2512_v8 = vpop.f32.mrb[1].mxu1 }
  0xfc   : > { %v989_v9 = vpop.f32.mrb[2].mxu0  ;;  %v1205_v1 = vpop.f32.mrb[2].mxu1 }
  0xfd   : > { %1516 = vst.msk [vmem:[%s2900_s20] sm:$0xff] %vm251_vm1, %v1409_v5  ;;  %v1410_v10 = vadd.f32 %v989_v9, %v359_v2  ;;  %v2405_v11 = vpop.f32.mrb[3].mxu0  ;;  %1570 = vst.msk [vmem:[%s2900_s20 + $0x1b0] sm:$0xff] %vm251_vm1, %v1463_v7  ;;  %v1464_v12 = vadd.f32 %v1205_v1, %v413_v4  ;;  %v2513_v13 = vpop.f32.mrb[3].mxu1 }
  0xfe   : > { %v418_v11 = vld [vmem:[%s2900_s20 + $0x1e0] sm:$0xff] }
  0xff   : > { %1517 = vst.msk [vmem:[%s2900_s20 + $0x8] sm:$0xff] %vm251_vm1, %v1410_v10  ;;  %1571 = vst.msk [vmem:[%s2900_s20 + $0x1b8] sm:$0xff] %vm251_vm1, %v1464_v12  ;;  %v364_v10 = vld [vmem:[%s2900_s20 + $0x30] sm:$0xff] }
 0x102   : > { %v994_v17 = vpop.f32.mrb[4].mxu0  ;;  %v1210_v19 = vpop.f32.mrb[4].mxu1 }
 0x103   : > { %v1411_v21 = vadd.f32 %v994_v17, %v360_v14  ;;  %v2408_v22 = vpop.f32.mrb[5].mxu0  ;;  %v1465_v23 = vadd.f32 %v1210_v19, %v414_v15  ;;  %v2516_v24 = vpop.f32.mrb[5].mxu1 }
 0x104   : > { %v1625_v25 = vld [vmem:[%s2900_s20] sm:$0xff]  ;;  %v1679_v27 = vld [vmem:[%s2900_s20 + $0x1b0] sm:$0xff]  ;;  %v997_v28 = vpop.f32.mrb[6].mxu0  ;;  %v1213_v29 = vpop.f32.mrb[6].mxu1 }
 0x105   : > { %v1738_v30 = vmul.f32 %v3342_v16, %v1625_v25  ;;  %v1792_v31 = vmul.f32 %v3342_v16, %v1679_v27  ;;  %1518 = vst.msk [vmem:[%s2900_s20 + $0x10] sm:$0xff] %vm251_vm1, %v1411_v21  ;;  %v1412_v32 = vadd.f32 %v997_v28, %v361_v18  ;;  %v2409_v33 = vpop.f32.mrb[7].mxu0  ;;  %1572 = vst.msk [vmem:[%s2900_s20 + $0x1c0] sm:$0xff] %vm251_vm1, %v1465_v23  ;;  %v2517_v35 = vpop.f32.mrb[7].mxu1  ;;  %v365_v18 = vld [vmem:[%s2900_s20 + $0x38] sm:$0xff] }
 0x106   : > { %v1466_v34 = vadd.f32 %v1213_v29, %v415_v20  ;;  %v1626_v36 = vld [vmem:[%s2900_s20 + $0x8] sm:$0xff]  ;;  %v1680_v37 = vld [vmem:[%s2900_s20 + $0x1b8] sm:$0xff] }
 0x107   : > { %v1851_v38 = vadd.f32 %v3350_v26, %v1738_v30  ;;  %v1739_v39 = vmul.f32 %v3342_v16, %v1626_v36  ;;  %v1905_v40 = vadd.f32 %v3350_v26, %v1792_v31  ;;  %v1793_v41 = vmul.f32 %v3342_v16, %v1680_v37  ;;  %1519 = vst.msk [vmem:[%s2900_s20 + $0x18] sm:$0xff] %vm251_vm1, %v1412_v32  ;;  %v419_v20 = vld [vmem:[%s2900_s20 + $0x1e8] sm:$0xff] }
 0x108   : > { %1573 = vst.msk [vmem:[%s2900_s20 + $0x1c8] sm:$0xff] %vm251_vm1, %v1466_v34 }
 0x109   : > { %v1957_v44 = vmax.f32 %v1851_v38, 0.0  ;;  %v1852_v45 = vadd.f32 %v3350_v26, %v1739_v39  ;;  %v2011_v46 = vmax.f32 %v1905_v40, 0.0  ;;  %v1906_v47 = vadd.f32 %v3350_v26, %v1793_v41 }
 0x10a   : > { %v1002_v48 = vpop.f32.mrb[8].mxu0  ;;  %v1218_v50 = vpop.f32.mrb[8].mxu1 }
 0x10b   : > { %2063 = vst.msk [vmem:[%s2900_s20] sm:$0xff] %vm251_vm1, %v1957_v44  ;;  %v1958_v52 = vmax.f32 %v1852_v45, 0.0  ;;  %2117 = vst.msk [vmem:[%s2900_s20 + $0x1b0] sm:$0xff] %vm251_vm1, %v2011_v46  ;;  %v2012_v53 = vmax.f32 %v1906_v47, 0.0  ;;  %v1413_v54 = vadd.f32 %v1002_v48, %v362_v42  ;;  %v2412_v55 = vpop.f32.mrb[9].mxu0  ;;  %v1467_v56 = vadd.f32 %v1218_v50, %v416_v43  ;;  %v2520_v57 = vpop.f32.mrb[9].mxu1 }
 0x10c   : > { %v1627_v58 = vld [vmem:[%s2900_s20 + $0x10] sm:$0xff]  ;;  %v1681_v59 = vld [vmem:[%s2900_s20 + $0x1c0] sm:$0xff]  ;;  %v1005_v60 = vpop.f32.mrb[10].mxu0  ;;  %v1221_v61 = vpop.f32.mrb[10].mxu1 }
 0x10d   : > { %2064 = vst.msk [vmem:[%s2900_s20 + $0x8] sm:$0xff] %vm251_vm1, %v1958_v52  ;;  %2118 = vst.msk [vmem:[%s2900_s20 + $0x1b8] sm:$0xff] %vm251_vm1, %v2012_v53  ;;  %v1740_v62 = vmul.f32 %v3342_v16, %v1627_v58  ;;  %v1794_v63 = vmul.f32 %v3342_v16, %v1681_v59  ;;  %v1414_v0 = vadd.f32 %v1005_v60, %v363_v49  ;;  %v2413_v2 = vpop.f32.mrb[11].mxu0  ;;  %v2521_v4 = vpop.f32.mrb[11].mxu1  ;;  %v366_v44 = vld [vmem:[%s2900_s20 + $0x40] sm:$0xff]  ;;  %v420_v45 = vld [vmem:[%s2900_s20 + $0x1f0] sm:$0xff] }
 0x10e   : > { %1520 = vst.msk [vmem:[%s2900_s20 + $0x20] sm:$0xff] %vm251_vm1, %v1413_v54  ;;  %1574 = vst.msk [vmem:[%s2900_s20 + $0x1d0] sm:$0xff] %vm251_vm1, %v1467_v56  ;;  %v1468_v3 = vadd.f32 %v1221_v61, %v417_v51  ;;  %v1628_v5 = vld [vmem:[%s2900_s20 + $0x18] sm:$0xff]  ;;  %v367_v51 = vld [vmem:[%s2900_s20 + $0x48] sm:$0xff] }
 0x10f   : > { %v1682_v6 = vld [vmem:[%s2900_s20 + $0x1c8] sm:$0xff]  ;;  %v1853_v7 = vadd.f32 %v3350_v26, %v1740_v62  ;;  %v1741_v8 = vmul.f32 %v3342_v16, %v1628_v5  ;;  %v1907_v9 = vadd.f32 %v3350_v26, %v1794_v63  ;;  %1521 = vst.msk [vmem:[%s2900_s20 + $0x28] sm:$0xff] %vm251_vm1, %v1414_v0  ;;  %v421_v53 = vld [vmem:[%s2900_s20 + $0x1f8] sm:$0xff] }
 0x110   : > { %v1795_v1 = vmul.f32 %v3342_v16, %v1682_v6  ;;  %1575 = vst.msk [vmem:[%s2900_s20 + $0x1d8] sm:$0xff] %vm251_vm1, %v1468_v3 }
 0x111   : > { %v1959_v12 = vmax.f32 %v1853_v7, 0.0  ;;  %v1854_v13 = vadd.f32 %v3350_v26, %v1741_v8  ;;  %v2013_v14 = vmax.f32 %v1907_v9, 0.0 }
 0x112   : > { %v1908_v15 = vadd.f32 %v3350_v26, %v1795_v1  ;;  %v1010_v17 = vpop.f32.mrb[12].mxu0  ;;  %v1226_v19 = vpop.f32.mrb[12].mxu1 }
 0x113   : > { %2065 = vst.msk [vmem:[%s2900_s20 + $0x10] sm:$0xff] %vm251_vm1, %v1959_v12  ;;  %v1960_v21 = vmax.f32 %v1854_v13, 0.0  ;;  %2119 = vst.msk [vmem:[%s2900_s20 + $0x1c0] sm:$0xff] %vm251_vm1, %v2013_v14  ;;  %v1415_v23 = vadd.f32 %v1010_v17, %v364_v10  ;;  %v2416_v24 = vpop.f32.mrb[13].mxu0  ;;  %v1469_v25 = vadd.f32 %v1226_v19, %v418_v11  ;;  %v2524_v27 = vpop.f32.mrb[13].mxu1  ;;  %v368_v12 = vld [vmem:[%s2900_s20 + $0x50] sm:$0xff] }
 0x114   : > { %v2014_v22 = vmax.f32 %v1908_v15, 0.0  ;;  %v1013_v30 = vpop.f32.mrb[14].mxu0  ;;  %v1229_v31 = vpop.f32.mrb[14].mxu1  ;;  %v422_v13 = vld [vmem:[%s2900_s20 + $0x200] sm:$0xff] }
 0x115   : > { %v1629_v28 = vld [vmem:[%s2900_s20 + $0x20] sm:$0xff]  ;;  %v1683_v29 = vld [vmem:[%s2900_s20 + $0x1d0] sm:$0xff]  ;;  %2066 = vst.msk [vmem:[%s2900_s20 + $0x18] sm:$0xff] %vm251_vm1, %v1960_v21  ;;  %1522 = vst.msk [vmem:[%s2900_s20 + $0x30] sm:$0xff] %vm251_vm1, %v1415_v23  ;;  %v1416_v34 = vadd.f32 %v1013_v30, %v365_v18  ;;  %v2417_v35 = vpop.f32.mrb[15].mxu0  ;;  %v1470_v36 = vadd.f32 %v1229_v31, %v419_v20  ;;  %v2525_v37 = vpop.f32.mrb[15].mxu1 }
 0x116   : > { %2120 = vst.msk [vmem:[%s2900_s20 + $0x1c8] sm:$0xff] %vm251_vm1, %v2014_v22  ;;  %v1742_v32 = vmul.f32 %v3342_v16, %v1629_v28  ;;  %v1796_v33 = vmul.f32 %v3342_v16, %v1683_v29  ;;  %1576 = vst.msk [vmem:[%s2900_s20 + $0x1e0] sm:$0xff] %vm251_vm1, %v1469_v25  ;;  %v1630_v38 = vld [vmem:[%s2900_s20 + $0x28] sm:$0xff]  ;;  %v369_v20 = vld [vmem:[%s2900_s20 + $0x58] sm:$0xff] }
 0x117   : > { %v1684_v39 = vld [vmem:[%s2900_s20 + $0x1d8] sm:$0xff]  ;;  %v1743_v41 = vmul.f32 %v3342_v16, %v1630_v38  ;;  %1523 = vst.msk [vmem:[%s2900_s20 + $0x38] sm:$0xff] %vm251_vm1, %v1416_v34  ;;  %1577 = vst.msk [vmem:[%s2900_s20 + $0x1e8] sm:$0xff] %vm251_vm1, %v1470_v36  ;;  %v423_v22 = vld [vmem:[%s2900_s20 + $0x208] sm:$0xff] }
 0x118   : > { %v1855_v40 = vadd.f32 %v3350_v26, %v1742_v32  ;;  %v1909_v42 = vadd.f32 %v3350_v26, %v1796_v33  ;;  %v1797_v43 = vmul.f32 %v3342_v16, %v1684_v39 }
 0x119   : > { %v1856_v47 = vadd.f32 %v3350_v26, %v1743_v41 }
 0x11a   : > { %v1961_v46 = vmax.f32 %v1855_v40, 0.0  ;;  %v2015_v48 = vmax.f32 %v1909_v42, 0.0  ;;  %v1910_v49 = vadd.f32 %v3350_v26, %v1797_v43  ;;  %v1018_v50 = vpop.f32.mrb[16].mxu0  ;;  %v1234_v52 = vpop.f32.mrb[16].mxu1 }
 0x11b   : > { %v1962_v54 = vmax.f32 %v1856_v47, 0.0  ;;  %v1417_v56 = vadd.f32 %v1018_v50, %v366_v44  ;;  %v2420_v57 = vpop.f32.mrb[17].mxu0  ;;  %v1471_v58 = vadd.f32 %v1234_v52, %v420_v45  ;;  %v2528_v59 = vpop.f32.mrb[17].mxu1  ;;  %v424_v47 = vld [vmem:[%s2900_s20 + $0x210] sm:$0xff] }
 0x11c   : > { %2067 = vst.msk [vmem:[%s2900_s20 + $0x20] sm:$0xff] %vm251_vm1, %v1961_v46  ;;  %2121 = vst.msk [vmem:[%s2900_s20 + $0x1d0] sm:$0xff] %vm251_vm1, %v2015_v48  ;;  %v2016_v55 = vmax.f32 %v1910_v49, 0.0  ;;  %v1631_v60 = vld [vmem:[%s2900_s20 + $0x30] sm:$0xff]  ;;  %v1021_v62 = vpop.f32.mrb[18].mxu0  ;;  %v1237_v63 = vpop.f32.mrb[18].mxu1 }
 0x11d   : > { %v1685_v61 = vld [vmem:[%s2900_s20 + $0x1e0] sm:$0xff]  ;;  %2068 = vst.msk [vmem:[%s2900_s20 + $0x28] sm:$0xff] %vm251_vm1, %v1962_v54  ;;  %v1744_v0 = vmul.f32 %v3342_v16, %v1631_v60  ;;  %1524 = vst.msk [vmem:[%s2900_s20 + $0x40] sm:$0xff] %vm251_vm1, %v1417_v56  ;;  %v1418_v3 = vadd.f32 %v1021_v62, %v367_v51  ;;  %v2421_v4 = vpop.f32.mrb[19].mxu0  ;;  %v1472_v5 = vadd.f32 %v1237_v63, %v421_v53  ;;  %v2529_v6 = vpop.f32.mrb[19].mxu1  ;;  %v371_v53 = vld [vmem:[%s2900_s20 + $0x68] sm:$0xff] }
 0x11e   : > { %2122 = vst.msk [vmem:[%s2900_s20 + $0x1d8] sm:$0xff] %vm251_vm1, %v2016_v55  ;;  %v1798_v2 = vmul.f32 %v3342_v16, %v1685_v61  ;;  %1578 = vst.msk [vmem:[%s2900_s20 + $0x1f0] sm:$0xff] %vm251_vm1, %v1471_v58  ;;  %v1632_v7 = vld [vmem:[%s2900_s20 + $0x38] sm:$0xff]  ;;  %v1686_v8 = vld [vmem:[%s2900_s20 + $0x1e8] sm:$0xff] }
 0x11f   : > { %v1857_v9 = vadd.f32 %v3350_v26, %v1744_v0  ;;  %v1745_v1 = vmul.f32 %v3342_v16, %v1632_v7  ;;  %v1799_v11 = vmul.f32 %v3342_v16, %v1686_v8  ;;  %1525 = vst.msk [vmem:[%s2900_s20 + $0x48] sm:$0xff] %vm251_vm1, %v1418_v3  ;;  %1579 = vst.msk [vmem:[%s2900_s20 + $0x1f8] sm:$0xff] %vm251_vm1, %v1472_v5  ;;  %v370_v46 = vld [vmem:[%s2900_s20 + $0x60] sm:$0xff]  ;;  %v425_v55 = vld [vmem:[%s2900_s20 + $0x218] sm:$0xff] }
 0x120   : > { %v1911_v10 = vadd.f32 %v3350_v26, %v1798_v2 }
 0x121   : > { %v1963_v14 = vmax.f32 %v1857_v9, 0.0  ;;  %v1858_v15 = vadd.f32 %v3350_v26, %v1745_v1  ;;  %v1912_v18 = vadd.f32 %v3350_v26, %v1799_v11 }
 0x122   : > { %v2017_v17 = vmax.f32 %v1911_v10, 0.0  ;;  %v1026_v19 = vpop.f32.mrb[20].mxu0  ;;  %v1242_v21 = vpop.f32.mrb[20].mxu1 }
 0x123   : > { %2069 = vst.msk [vmem:[%s2900_s20 + $0x30] sm:$0xff] %vm251_vm1, %v1963_v14  ;;  %v1964_v23 = vmax.f32 %v1858_v15, 0.0  ;;  %v2018_v24 = vmax.f32 %v1912_v18, 0.0  ;;  %v1419_v25 = vadd.f32 %v1026_v19, %v368_v12  ;;  %v2424_v27 = vpop.f32.mrb[21].mxu0  ;;  %v1473_v28 = vadd.f32 %v1242_v21, %v422_v13  ;;  %v2532_v29 = vpop.f32.mrb[21].mxu1  ;;  %v372_v14 = vld [vmem:[%s2900_s20 + $0x70] sm:$0xff] }
 0x124   : > { %2123 = vst.msk [vmem:[%s2900_s20 + $0x1e0] sm:$0xff] %vm251_vm1, %v2017_v17  ;;  %v1633_v30 = vld [vmem:[%s2900_s20 + $0x40] sm:$0xff]  ;;  %v1029_v32 = vpop.f32.mrb[22].mxu0  ;;  %v1245_v33 = vpop.f32.mrb[22].mxu1 }
 0x125   : > { %v1687_v31 = vld [vmem:[%s2900_s20 + $0x1f0] sm:$0xff]  ;;  %2070 = vst.msk [vmem:[%s2900_s20 + $0x38] sm:$0xff] %vm251_vm1, %v1964_v23  ;;  %2124 = vst.msk [vmem:[%s2900_s20 + $0x1e8] sm:$0xff] %vm251_vm1, %v2018_v24  ;;  %v1746_v34 = vmul.f32 %v3342_v16, %v1633_v30  ;;  %v1420_v36 = vadd.f32 %v1029_v32, %v369_v20  ;;  %v2425_v37 = vpop.f32.mrb[23].mxu0  ;;  %v1474_v38 = vadd.f32 %v1245_v33, %v423_v22  ;;  %v2533_v39 = vpop.f32.mrb[23].mxu1  ;;  %v426_v15 = vld [vmem:[%s2900_s20 + $0x220] sm:$0xff] }
 0x126   : > { %v1800_v35 = vmul.f32 %v3342_v16, %v1687_v31  ;;  %1526 = vst.msk [vmem:[%s2900_s20 + $0x50] sm:$0xff] %vm251_vm1, %v1419_v25  ;;  %1580 = vst.msk [vmem:[%s2900_s20 + $0x200] sm:$0xff] %vm251_vm1, %v1473_v28  ;;  %v1634_v40 = vld [vmem:[%s2900_s20 + $0x48] sm:$0xff]  ;;  %v1688_v41 = vld [vmem:[%s2900_s20 + $0x1f8] sm:$0xff] }
 0x127   : > { %v1859_v42 = vadd.f32 %v3350_v26, %v1746_v34  ;;  %v1747_v43 = vmul.f32 %v3342_v16, %v1634_v40  ;;  %v1801_v45 = vmul.f32 %v3342_v16, %v1688_v41  ;;  %1527 = vst.msk [vmem:[%s2900_s20 + $0x58] sm:$0xff] %vm251_vm1, %v1420_v36  ;;  %1581 = vst.msk [vmem:[%s2900_s20 + $0x208] sm:$0xff] %vm251_vm1, %v1474_v38  ;;  %v373_v22 = vld [vmem:[%s2900_s20 + $0x78] sm:$0xff]  ;;  %v427_v24 = vld [vmem:[%s2900_s20 + $0x228] sm:$0xff] }
 0x128   : > { %v1913_v44 = vadd.f32 %v3350_v26, %v1800_v35 }
 0x129   : > { %v1965_v48 = vmax.f32 %v1859_v42, 0.0  ;;  %v1860_v49 = vadd.f32 %v3350_v26, %v1747_v43  ;;  %v1914_v51 = vadd.f32 %v3350_v26, %v1801_v45 }
 0x12a   : > { %v2019_v50 = vmax.f32 %v1913_v44, 0.0  ;;  %v1034_v52 = vpop.f32.mrb[24].mxu0  ;;  %v1250_v54 = vpop.f32.mrb[24].mxu1 }
 0x12b   : > { %2071 = vst.msk [vmem:[%s2900_s20 + $0x40] sm:$0xff] %vm251_vm1, %v1965_v48  ;;  %v1966_v56 = vmax.f32 %v1860_v49, 0.0  ;;  %v2020_v57 = vmax.f32 %v1914_v51, 0.0  ;;  %v1421_v58 = vadd.f32 %v1034_v52, %v370_v46  ;;  %v2428_v59 = vpop.f32.mrb[25].mxu0  ;;  %v1475_v60 = vadd.f32 %v1250_v54, %v424_v47  ;;  %v2536_v61 = vpop.f32.mrb[25].mxu1  ;;  %v374_v48 = vld [vmem:[%s2900_s20 + $0x80] sm:$0xff] }
 0x12c   : > { %2125 = vst.msk [vmem:[%s2900_s20 + $0x1f0] sm:$0xff] %vm251_vm1, %v2019_v50  ;;  %v1037_v0 = vpop.f32.mrb[26].mxu0  ;;  %v1253_v2 = vpop.f32.mrb[26].mxu1  ;;  %v428_v49 = vld [vmem:[%s2900_s20 + $0x230] sm:$0xff] }
 0x12d   : > { %v1635_v62 = vld [vmem:[%s2900_s20 + $0x50] sm:$0xff]  ;;  %v1689_v63 = vld [vmem:[%s2900_s20 + $0x200] sm:$0xff]  ;;  %2072 = vst.msk [vmem:[%s2900_s20 + $0x48] sm:$0xff] %vm251_vm1, %v1966_v56  ;;  %2126 = vst.msk [vmem:[%s2900_s20 + $0x1f8] sm:$0xff] %vm251_vm1, %v2020_v57  ;;  %v1422_v5 = vadd.f32 %v1037_v0, %v371_v53  ;;  %v2429_v6 = vpop.f32.mrb[27].mxu0  ;;  %v1476_v7 = vadd.f32 %v1253_v2, %v425_v55  ;;  %v2537_v8 = vpop.f32.mrb[27].mxu1 }
 0x12e   : > { %v1748_v3 = vmul.f32 %v3342_v16, %v1635_v62  ;;  %v1802_v4 = vmul.f32 %v3342_v16, %v1689_v63  ;;  %1528 = vst.msk [vmem:[%s2900_s20 + $0x60] sm:$0xff] %vm251_vm1, %v1421_v58  ;;  %1582 = vst.msk [vmem:[%s2900_s20 + $0x210] sm:$0xff] %vm251_vm1, %v1475_v60  ;;  %v1636_v9 = vld [vmem:[%s2900_s20 + $0x58] sm:$0xff]  ;;  %v1690_v1 = vld [vmem:[%s2900_s20 + $0x208] sm:$0xff] }
 0x12f   : > { %v1749_v11 = vmul.f32 %v3342_v16, %v1636_v9  ;;  %v1803_v13 = vmul.f32 %v3342_v16, %v1690_v1  ;;  %1529 = vst.msk [vmem:[%s2900_s20 + $0x68] sm:$0xff] %vm251_vm1, %v1422_v5  ;;  %1583 = vst.msk [vmem:[%s2900_s20 + $0x218] sm:$0xff] %vm251_vm1, %v1476_v7  ;;  %v375_v55 = vld [vmem:[%s2900_s20 + $0x88] sm:$0xff]  ;;  %v429_v57 = vld [vmem:[%s2900_s20 + $0x238] sm:$0xff] }
 0x130   : > { %v1861_v10 = vadd.f32 %v3350_v26, %v1748_v3  ;;  %v1915_v12 = vadd.f32 %v3350_v26, %v1802_v4 }
 0x131   : > { %v1862_v18 = vadd.f32 %v3350_v26, %v1749_v11  ;;  %v1916_v20 = vadd.f32 %v3350_v26, %v1803_v13 }
 0x132   : > { %v1967_v17 = vmax.f32 %v1861_v10, 0.0  ;;  %v2021_v19 = vmax.f32 %v1915_v12, 0.0  ;;  %v1042_v21 = vpop.f32.mrb[28].mxu0  ;;  %v1258_v23 = vpop.f32.mrb[28].mxu1 }
 0x133   : > { %v1968_v25 = vmax.f32 %v1862_v18, 0.0  ;;  %v2022_v27 = vmax.f32 %v1916_v20, 0.0  ;;  %v1423_v28 = vadd.f32 %v1042_v21, %v372_v14  ;;  %v2432_v29 = vpop.f32.mrb[29].mxu0  ;;  %v1477_v30 = vadd.f32 %v1258_v23, %v426_v15  ;;  %v2540_v31 = vpop.f32.mrb[29].mxu1  ;;  %v430_v18 = vld [vmem:[%s2900_s20 + $0x240] sm:$0xff] }
 0x134   : > { %2073 = vst.msk [vmem:[%s2900_s20 + $0x50] sm:$0xff] %vm251_vm1, %v1967_v17  ;;  %2127 = vst.msk [vmem:[%s2900_s20 + $0x200] sm:$0xff] %vm251_vm1, %v2021_v19  ;;  %v1045_v34 = vpop.f32.mrb[30].mxu0  ;;  %v1261_v35 = vpop.f32.mrb[30].mxu1  ;;  %v376_v17 = vld [vmem:[%s2900_s20 + $0x90] sm:$0xff] }
 0x135   : > { %v1637_v32 = vld [vmem:[%s2900_s20 + $0x60] sm:$0xff]  ;;  %v1691_v33 = vld [vmem:[%s2900_s20 + $0x210] sm:$0xff]  ;;  %2074 = vst.msk [vmem:[%s2900_s20 + $0x58] sm:$0xff] %vm251_vm1, %v1968_v25  ;;  %2128 = vst.msk [vmem:[%s2900_s20 + $0x208] sm:$0xff] %vm251_vm1, %v2022_v27  ;;  %v1424_v38 = vadd.f32 %v1045_v34, %v373_v22  ;;  %v2433_v39 = vpop.f32.mrb[31].mxu0  ;;  %v1478_v40 = vadd.f32 %v1261_v35, %v427_v24  ;;  %v2541_v41 = vpop.f32.mrb[31].mxu1 }
 0x136   : > { %v1750_v36 = vmul.f32 %v3342_v16, %v1637_v32  ;;  %v1804_v37 = vmul.f32 %v3342_v16, %v1691_v33  ;;  %1530 = vst.msk [vmem:[%s2900_s20 + $0x70] sm:$0xff] %vm251_vm1, %v1423_v28  ;;  %1584 = vst.msk [vmem:[%s2900_s20 + $0x220] sm:$0xff] %vm251_vm1, %v1477_v30  ;;  %v1638_v42 = vld [vmem:[%s2900_s20 + $0x68] sm:$0xff]  ;;  %v1692_v43 = vld [vmem:[%s2900_s20 + $0x218] sm:$0xff] }
 0x137   : > { %v1751_v45 = vmul.f32 %v3342_v16, %v1638_v42  ;;  %v1805_v47 = vmul.f32 %v3342_v16, %v1692_v43  ;;  %1531 = vst.msk [vmem:[%s2900_s20 + $0x78] sm:$0xff] %vm251_vm1, %v1424_v38  ;;  %1585 = vst.msk [vmem:[%s2900_s20 + $0x228] sm:$0xff] %vm251_vm1, %v1478_v40  ;;  %v377_v24 = vld [vmem:[%s2900_s20 + $0x98] sm:$0xff]  ;;  %v431_v27 = vld [vmem:[%s2900_s20 + $0x248] sm:$0xff] }
 0x138   : > { %v1863_v44 = vadd.f32 %v3350_v26, %v1750_v36  ;;  %v1917_v46 = vadd.f32 %v3350_v26, %v1804_v37 }
 0x139   : > { %v1864_v51 = vadd.f32 %v3350_v26, %v1751_v45  ;;  %v1918_v53 = vadd.f32 %v3350_v26, %v1805_v47 }
 0x13a   : > { %v1969_v50 = vmax.f32 %v1863_v44, 0.0  ;;  %v2023_v52 = vmax.f32 %v1917_v46, 0.0  ;;  %v1050_v54 = vpop.f32.mrb[32].mxu0  ;;  %v1266_v56 = vpop.f32.mrb[32].mxu1 }
 0x13b   : > { %v1970_v58 = vmax.f32 %v1864_v51, 0.0  ;;  %v2024_v59 = vmax.f32 %v1918_v53, 0.0  ;;  %v1425_v60 = vadd.f32 %v1050_v54, %v374_v48  ;;  %v2436_v61 = vpop.f32.mrb[33].mxu0  ;;  %v1479_v62 = vadd.f32 %v1266_v56, %v428_v49  ;;  %v2544_v63 = vpop.f32.mrb[33].mxu1  ;;  %v432_v51 = vld [vmem:[%s2900_s20 + $0x250] sm:$0xff] }
 0x13c   : > { %2075 = vst.msk [vmem:[%s2900_s20 + $0x60] sm:$0xff] %vm251_vm1, %v1969_v50  ;;  %2129 = vst.msk [vmem:[%s2900_s20 + $0x210] sm:$0xff] %vm251_vm1, %v2023_v52  ;;  %v1053_v3 = vpop.f32.mrb[34].mxu0  ;;  %v1269_v4 = vpop.f32.mrb[34].mxu1  ;;  %v378_v50 = vld [vmem:[%s2900_s20 + $0xa0] sm:$0xff] }
 0x13d   : > { %v1639_v0 = vld [vmem:[%s2900_s20 + $0x70] sm:$0xff]  ;;  %v1693_v2 = vld [vmem:[%s2900_s20 + $0x220] sm:$0xff]  ;;  %2076 = vst.msk [vmem:[%s2900_s20 + $0x68] sm:$0xff] %vm251_vm1, %v1970_v58  ;;  %2130 = vst.msk [vmem:[%s2900_s20 + $0x218] sm:$0xff] %vm251_vm1, %v2024_v59  ;;  %v1426_v7 = vadd.f32 %v1053_v3, %v375_v55  ;;  %v2437_v8 = vpop.f32.mrb[35].mxu0  ;;  %v1480_v9 = vadd.f32 %v1269_v4, %v429_v57  ;;  %v2545_v1 = vpop.f32.mrb[35].mxu1 }
 0x13e   : > { %v1752_v5 = vmul.f32 %v3342_v16, %v1639_v0  ;;  %v1806_v6 = vmul.f32 %v3342_v16, %v1693_v2  ;;  %1532 = vst.msk [vmem:[%s2900_s20 + $0x80] sm:$0xff] %vm251_vm1, %v1425_v60  ;;  %1586 = vst.msk [vmem:[%s2900_s20 + $0x230] sm:$0xff] %vm251_vm1, %v1479_v62  ;;  %v1640_v10 = vld [vmem:[%s2900_s20 + $0x78] sm:$0xff]  ;;  %v1694_v11 = vld [vmem:[%s2900_s20 + $0x228] sm:$0xff] }
 0x13f   : > { %v1753_v13 = vmul.f32 %v3342_v16, %v1640_v10  ;;  %v1807_v15 = vmul.f32 %v3342_v16, %v1694_v11  ;;  %1533 = vst.msk [vmem:[%s2900_s20 + $0x88] sm:$0xff] %vm251_vm1, %v1426_v7  ;;  %1587 = vst.msk [vmem:[%s2900_s20 + $0x238] sm:$0xff] %vm251_vm1, %v1480_v9  ;;  %v379_v57 = vld [vmem:[%s2900_s20 + $0xa8] sm:$0xff]  ;;  %v433_v59 = vld [vmem:[%s2900_s20 + $0x258] sm:$0xff] }
 0x140   : > { %v1865_v12 = vadd.f32 %v3350_v26, %v1752_v5  ;;  %v1919_v14 = vadd.f32 %v3350_v26, %v1806_v6 }
 0x141   : > { %v1866_v20 = vadd.f32 %v3350_v26, %v1753_v13  ;;  %v1920_v22 = vadd.f32 %v3350_v26, %v1807_v15 }
 0x142   : > { %v1971_v19 = vmax.f32 %v1865_v12, 0.0  ;;  %v2025_v21 = vmax.f32 %v1919_v14, 0.0  ;;  %v1058_v23 = vpop.f32.mrb[36].mxu0  ;;  %v1274_v25 = vpop.f32.mrb[36].mxu1 }
 0x143   : > { %v1972_v28 = vmax.f32 %v1866_v20, 0.0  ;;  %v2026_v29 = vmax.f32 %v1920_v22, 0.0  ;;  %v1427_v30 = vadd.f32 %v1058_v23, %v376_v17  ;;  %v2440_v31 = vpop.f32.mrb[37].mxu0  ;;  %v1481_v32 = vadd.f32 %v1274_v25, %v430_v18  ;;  %v2548_v33 = vpop.f32.mrb[37].mxu1  ;;  %v434_v20 = vld [vmem:[%s2900_s20 + $0x260] sm:$0xff] }
 0x144   : > { %2077 = vst.msk [vmem:[%s2900_s20 + $0x70] sm:$0xff] %vm251_vm1, %v1971_v19  ;;  %2131 = vst.msk [vmem:[%s2900_s20 + $0x220] sm:$0xff] %vm251_vm1, %v2025_v21  ;;  %v1061_v36 = vpop.f32.mrb[38].mxu0  ;;  %v1277_v37 = vpop.f32.mrb[38].mxu1  ;;  %v380_v19 = vld [vmem:[%s2900_s20 + $0xb0] sm:$0xff] }
 0x145   : > { %v1641_v34 = vld [vmem:[%s2900_s20 + $0x80] sm:$0xff]  ;;  %v1695_v35 = vld [vmem:[%s2900_s20 + $0x230] sm:$0xff]  ;;  %2078 = vst.msk [vmem:[%s2900_s20 + $0x78] sm:$0xff] %vm251_vm1, %v1972_v28  ;;  %2132 = vst.msk [vmem:[%s2900_s20 + $0x228] sm:$0xff] %vm251_vm1, %v2026_v29  ;;  %v1428_v40 = vadd.f32 %v1061_v36, %v377_v24  ;;  %v2441_v41 = vpop.f32.mrb[39].mxu0  ;;  %v1482_v42 = vadd.f32 %v1277_v37, %v431_v27  ;;  %v2549_v43 = vpop.f32.mrb[39].mxu1 }
 0x146   : > { %v1754_v38 = vmul.f32 %v3342_v16, %v1641_v34  ;;  %v1808_v39 = vmul.f32 %v3342_v16, %v1695_v35  ;;  %1534 = vst.msk [vmem:[%s2900_s20 + $0x90] sm:$0xff] %vm251_vm1, %v1427_v30  ;;  %1588 = vst.msk [vmem:[%s2900_s20 + $0x240] sm:$0xff] %vm251_vm1, %v1481_v32  ;;  %v1642_v44 = vld [vmem:[%s2900_s20 + $0x88] sm:$0xff]  ;;  %v1696_v45 = vld [vmem:[%s2900_s20 + $0x238] sm:$0xff] }
 0x147   : > { %v1755_v47 = vmul.f32 %v3342_v16, %v1642_v44  ;;  %v1809_v49 = vmul.f32 %v3342_v16, %v1696_v45  ;;  %1535 = vst.msk [vmem:[%s2900_s20 + $0x98] sm:$0xff] %vm251_vm1, %v1428_v40  ;;  %1589 = vst.msk [vmem:[%s2900_s20 + $0x248] sm:$0xff] %vm251_vm1, %v1482_v42  ;;  %v381_v27 = vld [vmem:[%s2900_s20 + $0xb8] sm:$0xff]  ;;  %v435_v29 = vld [vmem:[%s2900_s20 + $0x268] sm:$0xff] }
 0x148   : > { %v1867_v46 = vadd.f32 %v3350_v26, %v1754_v38  ;;  %v1921_v48 = vadd.f32 %v3350_v26, %v1808_v39 }
 0x149   : > { %v1868_v53 = vadd.f32 %v3350_v26, %v1755_v47  ;;  %v1922_v55 = vadd.f32 %v3350_v26, %v1809_v49 }
 0x14a   : > { %v1973_v52 = vmax.f32 %v1867_v46, 0.0  ;;  %v2027_v54 = vmax.f32 %v1921_v48, 0.0  ;;  %v1066_v56 = vpop.f32.mrb[40].mxu0  ;;  %v1282_v58 = vpop.f32.mrb[40].mxu1 }
 0x14b   : > { %v1974_v60 = vmax.f32 %v1868_v53, 0.0  ;;  %v2028_v61 = vmax.f32 %v1922_v55, 0.0  ;;  %v1429_v62 = vadd.f32 %v1066_v56, %v378_v50  ;;  %v2444_v63 = vpop.f32.mrb[41].mxu0  ;;  %v1483_v0 = vadd.f32 %v1282_v58, %v432_v51  ;;  %v2552_v2 = vpop.f32.mrb[41].mxu1  ;;  %v436_v53 = vld [vmem:[%s2900_s20 + $0x270] sm:$0xff] }
 0x14c   : > { %2079 = vst.msk [vmem:[%s2900_s20 + $0x80] sm:$0xff] %vm251_vm1, %v1973_v52  ;;  %2133 = vst.msk [vmem:[%s2900_s20 + $0x230] sm:$0xff] %vm251_vm1, %v2027_v54  ;;  %v1069_v5 = vpop.f32.mrb[42].mxu0  ;;  %v1285_v6 = vpop.f32.mrb[42].mxu1  ;;  %v382_v52 = vld [vmem:[%s2900_s20 + $0xc0] sm:$0xff] }
 0x14d   : > { %v1643_v3 = vld [vmem:[%s2900_s20 + $0x90] sm:$0xff]  ;;  %v1697_v4 = vld [vmem:[%s2900_s20 + $0x240] sm:$0xff]  ;;  %2080 = vst.msk [vmem:[%s2900_s20 + $0x88] sm:$0xff] %vm251_vm1, %v1974_v60  ;;  %2134 = vst.msk [vmem:[%s2900_s20 + $0x238] sm:$0xff] %vm251_vm1, %v2028_v61  ;;  %v1430_v9 = vadd.f32 %v1069_v5, %v379_v57  ;;  %v2445_v1 = vpop.f32.mrb[43].mxu0  ;;  %v1484_v10 = vadd.f32 %v1285_v6, %v433_v59  ;;  %v2553_v11 = vpop.f32.mrb[43].mxu1 }
 0x14e   : > { %v1756_v7 = vmul.f32 %v3342_v16, %v1643_v3  ;;  %v1810_v8 = vmul.f32 %v3342_v16, %v1697_v4  ;;  %1536 = vst.msk [vmem:[%s2900_s20 + $0xa0] sm:$0xff] %vm251_vm1, %v1429_v62  ;;  %1590 = vst.msk [vmem:[%s2900_s20 + $0x250] sm:$0xff] %vm251_vm1, %v1483_v0  ;;  %v1644_v12 = vld [vmem:[%s2900_s20 + $0x98] sm:$0xff]  ;;  %v1698_v13 = vld [vmem:[%s2900_s20 + $0x248] sm:$0xff] }
 0x14f   : > { %v1757_v15 = vmul.f32 %v3342_v16, %v1644_v12  ;;  %v1811_v18 = vmul.f32 %v3342_v16, %v1698_v13  ;;  %1537 = vst.msk [vmem:[%s2900_s20 + $0xa8] sm:$0xff] %vm251_vm1, %v1430_v9  ;;  %1591 = vst.msk [vmem:[%s2900_s20 + $0x258] sm:$0xff] %vm251_vm1, %v1484_v10  ;;  %v383_v59 = vld [vmem:[%s2900_s20 + $0xc8] sm:$0xff]  ;;  %v437_v61 = vld [vmem:[%s2900_s20 + $0x278] sm:$0xff] }
 0x150   : > { %v1869_v14 = vadd.f32 %v3350_v26, %v1756_v7  ;;  %v1923_v17 = vadd.f32 %v3350_v26, %v1810_v8 }
 0x151   : > { %v1870_v22 = vadd.f32 %v3350_v26, %v1757_v15  ;;  %v1924_v24 = vadd.f32 %v3350_v26, %v1811_v18 }
 0x152   : > { %v1975_v21 = vmax.f32 %v1869_v14, 0.0  ;;  %v2029_v23 = vmax.f32 %v1923_v17, 0.0  ;;  %v1074_v25 = vpop.f32.mrb[44].mxu0  ;;  %v1290_v28 = vpop.f32.mrb[44].mxu1 }
 0x153   : > { %v1976_v30 = vmax.f32 %v1870_v22, 0.0  ;;  %v2030_v31 = vmax.f32 %v1924_v24, 0.0  ;;  %v1431_v32 = vadd.f32 %v1074_v25, %v380_v19  ;;  %v2448_v33 = vpop.f32.mrb[45].mxu0  ;;  %v1485_v34 = vadd.f32 %v1290_v28, %v434_v20  ;;  %v2556_v35 = vpop.f32.mrb[45].mxu1  ;;  %v438_v22 = vld [vmem:[%s2900_s20 + $0x280] sm:$0xff] }
 0x154   : > { %2081 = vst.msk [vmem:[%s2900_s20 + $0x90] sm:$0xff] %vm251_vm1, %v1975_v21  ;;  %2135 = vst.msk [vmem:[%s2900_s20 + $0x240] sm:$0xff] %vm251_vm1, %v2029_v23  ;;  %v1077_v38 = vpop.f32.mrb[46].mxu0  ;;  %v1293_v39 = vpop.f32.mrb[46].mxu1  ;;  %v384_v21 = vld [vmem:[%s2900_s20 + $0xd0] sm:$0xff] }
 0x155   : > { %v1645_v36 = vld [vmem:[%s2900_s20 + $0xa0] sm:$0xff]  ;;  %v1699_v37 = vld [vmem:[%s2900_s20 + $0x250] sm:$0xff]  ;;  %2082 = vst.msk [vmem:[%s2900_s20 + $0x98] sm:$0xff] %vm251_vm1, %v1976_v30  ;;  %2136 = vst.msk [vmem:[%s2900_s20 + $0x248] sm:$0xff] %vm251_vm1, %v2030_v31  ;;  %v1432_v42 = vadd.f32 %v1077_v38, %v381_v27  ;;  %v2449_v43 = vpop.f32.mrb[47].mxu0  ;;  %v1486_v44 = vadd.f32 %v1293_v39, %v435_v29  ;;  %v2557_v45 = vpop.f32.mrb[47].mxu1 }
 0x156   : > { %v1758_v40 = vmul.f32 %v3342_v16, %v1645_v36  ;;  %v1812_v41 = vmul.f32 %v3342_v16, %v1699_v37  ;;  %1538 = vst.msk [vmem:[%s2900_s20 + $0xb0] sm:$0xff] %vm251_vm1, %v1431_v32  ;;  %1592 = vst.msk [vmem:[%s2900_s20 + $0x260] sm:$0xff] %vm251_vm1, %v1485_v34  ;;  %v1646_v46 = vld [vmem:[%s2900_s20 + $0xa8] sm:$0xff]  ;;  %v1700_v47 = vld [vmem:[%s2900_s20 + $0x258] sm:$0xff] }
 0x157   : > { %v1759_v49 = vmul.f32 %v3342_v16, %v1646_v46  ;;  %v1813_v51 = vmul.f32 %v3342_v16, %v1700_v47  ;;  %1539 = vst.msk [vmem:[%s2900_s20 + $0xb8] sm:$0xff] %vm251_vm1, %v1432_v42  ;;  %1593 = vst.msk [vmem:[%s2900_s20 + $0x268] sm:$0xff] %vm251_vm1, %v1486_v44  ;;  %v385_v29 = vld [vmem:[%s2900_s20 + $0xd8] sm:$0xff]  ;;  %v439_v31 = vld [vmem:[%s2900_s20 + $0x288] sm:$0xff] }
 0x158   : > { %v1871_v48 = vadd.f32 %v3350_v26, %v1758_v40  ;;  %v1925_v50 = vadd.f32 %v3350_v26, %v1812_v41 }
 0x159   : > { %v1872_v55 = vadd.f32 %v3350_v26, %v1759_v49  ;;  %v1926_v57 = vadd.f32 %v3350_v26, %v1813_v51 }
 0x15a   : > { %v1977_v54 = vmax.f32 %v1871_v48, 0.0  ;;  %v2031_v56 = vmax.f32 %v1925_v50, 0.0  ;;  %v1082_v58 = vpop.f32.mrb[48].mxu0  ;;  %v1298_v60 = vpop.f32.mrb[48].mxu1 }
 0x15b   : > { %v1978_v62 = vmax.f32 %v1872_v55, 0.0  ;;  %v2032_v63 = vmax.f32 %v1926_v57, 0.0  ;;  %v1433_v0 = vadd.f32 %v1082_v58, %v382_v52  ;;  %v2452_v2 = vpop.f32.mrb[49].mxu0  ;;  %v1487_v3 = vadd.f32 %v1298_v60, %v436_v53  ;;  %v2560_v4 = vpop.f32.mrb[49].mxu1  ;;  %v440_v55 = vld [vmem:[%s2900_s20 + $0x290] sm:$0xff] }
 0x15c   : > { %2083 = vst.msk [vmem:[%s2900_s20 + $0xa0] sm:$0xff] %vm251_vm1, %v1977_v54  ;;  %2137 = vst.msk [vmem:[%s2900_s20 + $0x250] sm:$0xff] %vm251_vm1, %v2031_v56  ;;  %v1085_v7 = vpop.f32.mrb[50].mxu0  ;;  %v1301_v8 = vpop.f32.mrb[50].mxu1  ;;  %v386_v54 = vld [vmem:[%s2900_s20 + $0xe0] sm:$0xff] }
 0x15d   : > { %v1647_v5 = vld [vmem:[%s2900_s20 + $0xb0] sm:$0xff]  ;;  %v1701_v6 = vld [vmem:[%s2900_s20 + $0x260] sm:$0xff]  ;;  %2084 = vst.msk [vmem:[%s2900_s20 + $0xa8] sm:$0xff] %vm251_vm1, %v1978_v62  ;;  %2138 = vst.msk [vmem:[%s2900_s20 + $0x258] sm:$0xff] %vm251_vm1, %v2032_v63  ;;  %v1434_v10 = vadd.f32 %v1085_v7, %v383_v59  ;;  %v2453_v11 = vpop.f32.mrb[51].mxu0  ;;  %v1488_v12 = vadd.f32 %v1301_v8, %v437_v61  ;;  %v2561_v13 = vpop.f32.mrb[51].mxu1 }
 0x15e   : > { %v1760_v9 = vmul.f32 %v3342_v16, %v1647_v5  ;;  %v1814_v1 = vmul.f32 %v3342_v16, %v1701_v6  ;;  %1540 = vst.msk [vmem:[%s2900_s20 + $0xc0] sm:$0xff] %vm251_vm1, %v1433_v0  ;;  %1594 = vst.msk [vmem:[%s2900_s20 + $0x270] sm:$0xff] %vm251_vm1, %v1487_v3  ;;  %v1648_v14 = vld [vmem:[%s2900_s20 + $0xb8] sm:$0xff]  ;;  %v1702_v15 = vld [vmem:[%s2900_s20 + $0x268] sm:$0xff] }
 0x15f   : > { %v1761_v18 = vmul.f32 %v3342_v16, %v1648_v14  ;;  %v1815_v20 = vmul.f32 %v3342_v16, %v1702_v15  ;;  %1541 = vst.msk [vmem:[%s2900_s20 + $0xc8] sm:$0xff] %vm251_vm1, %v1434_v10  ;;  %1595 = vst.msk [vmem:[%s2900_s20 + $0x278] sm:$0xff] %vm251_vm1, %v1488_v12  ;;  %v387_v61 = vld [vmem:[%s2900_s20 + $0xe8] sm:$0xff] }
 0x160   : > { %v1873_v17 = vadd.f32 %v3350_v26, %v1760_v9  ;;  %v1927_v19 = vadd.f32 %v3350_v26, %v1814_v1  ;;  %v3772_v9 = vld [vmem:[%s4204_s2] ss:$0 sm:$0xff] }
 0x161   : > { %v1874_v24 = vadd.f32 %v3350_v26, %v1761_v18  ;;  %v1928_v27 = vadd.f32 %v3350_v26, %v1815_v20  ;;  %v3785_v18 = vld [vmem:[%s4205_s3] ss:$0 sm:$0xff] }
 0x162   : > { %v1979_v23 = vmax.f32 %v1873_v17, 0.0  ;;  %v2033_v25 = vmax.f32 %v1927_v19, 0.0  ;;  %v1090_v28 = vpop.f32.mrb[52].mxu0  ;;  %v1306_v30 = vpop.f32.mrb[52].mxu1 }
 0x163   : > { %v1980_v32 = vmax.f32 %v1874_v24, 0.0  ;;  %v2034_v33 = vmax.f32 %v1928_v27, 0.0  ;;  %v1435_v34 = vadd.f32 %v1090_v28, %v384_v21  ;;  %v2456_v35 = vpop.f32.mrb[53].mxu0  ;;  %v1489_v36 = vadd.f32 %v1306_v30, %v438_v22  ;;  %v2564_v37 = vpop.f32.mrb[53].mxu1  ;;  %v442_v24 = vld [vmem:[%s2900_s20 + $0x2a0] sm:$0xff] }
 0x164   : > { %2085 = vst.msk [vmem:[%s2900_s20 + $0xb0] sm:$0xff] %vm251_vm1, %v1979_v23  ;;  %2139 = vst.msk [vmem:[%s2900_s20 + $0x260] sm:$0xff] %vm251_vm1, %v2033_v25  ;;  %v1093_v40 = vpop.f32.mrb[54].mxu0  ;;  %v1309_v41 = vpop.f32.mrb[54].mxu1  ;;  %v388_v23 = vld [vmem:[%s2900_s20 + $0xf0] sm:$0xff] }
 0x165   : > { %v1649_v38 = vld [vmem:[%s2900_s20 + $0xc0] sm:$0xff]  ;;  %v1703_v39 = vld [vmem:[%s2900_s20 + $0x270] sm:$0xff]  ;;  %2086 = vst.msk [vmem:[%s2900_s20 + $0xb8] sm:$0xff] %vm251_vm1, %v1980_v32  ;;  %2140 = vst.msk [vmem:[%s2900_s20 + $0x268] sm:$0xff] %vm251_vm1, %v2034_v33  ;;  %v1436_v44 = vadd.f32 %v1093_v40, %v385_v29  ;;  %v2457_v45 = vpop.f32.mrb[55].mxu0  ;;  %v1490_v46 = vadd.f32 %v1309_v41, %v439_v31  ;;  %v2565_v47 = vpop.f32.mrb[55].mxu1 }
 0x166   : > { %v1762_v42 = vmul.f32 %v3342_v16, %v1649_v38  ;;  %v1816_v43 = vmul.f32 %v3342_v16, %v1703_v39  ;;  %1542 = vst.msk [vmem:[%s2900_s20 + $0xd0] sm:$0xff] %vm251_vm1, %v1435_v34  ;;  %1596 = vst.msk [vmem:[%s2900_s20 + $0x280] sm:$0xff] %vm251_vm1, %v1489_v36  ;;  %v1650_v48 = vld [vmem:[%s2900_s20 + $0xc8] sm:$0xff]  ;;  %v1704_v49 = vld [vmem:[%s2900_s20 + $0x278] sm:$0xff] }
 0x167   : > { %v1763_v51 = vmul.f32 %v3342_v16, %v1650_v48  ;;  %v1817_v53 = vmul.f32 %v3342_v16, %v1704_v49  ;;  %1543 = vst.msk [vmem:[%s2900_s20 + $0xd8] sm:$0xff] %vm251_vm1, %v1436_v44  ;;  %1597 = vst.msk [vmem:[%s2900_s20 + $0x288] sm:$0xff] %vm251_vm1, %v1490_v46  ;;  %v441_v16 = vld [vmem:[%s2900_s20 + $0x298] sm:$0xff]  ;;  %v443_v33 = vld [vmem:[%s2900_s20 + $0x2a8] sm:$0xff] }
 0x168   : > { %v1875_v50 = vadd.f32 %v3350_v26, %v1762_v42  ;;  %v1929_v52 = vadd.f32 %v3350_v26, %v1816_v43  ;;  %v389_v31 = vld [vmem:[%s2900_s20 + $0xf8] sm:$0xff] }
 0x169   : > { %v1876_v57 = vadd.f32 %v3350_v26, %v1763_v51  ;;  %v1930_v59 = vadd.f32 %v3350_v26, %v1817_v53 }
 0x16a   : > { %v1981_v56 = vmax.f32 %v1875_v50, 0.0  ;;  %v2035_v58 = vmax.f32 %v1929_v52, 0.0  ;;  %v1098_v60 = vpop.f32.mrb[56].mxu0  ;;  %v1314_v62 = vpop.f32.mrb[56].mxu1 }
 0x16b   : > { %v1982_v63 = vmax.f32 %v1876_v57, 0.0  ;;  %v2036_v0 = vmax.f32 %v1930_v59, 0.0  ;;  %v1437_v2 = vadd.f32 %v1098_v60, %v386_v54  ;;  %v2460_v3 = vpop.f32.mrb[57].mxu0  ;;  %v1491_v4 = vadd.f32 %v1314_v62, %v440_v55  ;;  %v2568_v5 = vpop.f32.mrb[57].mxu1  ;;  %v444_v57 = vld [vmem:[%s2900_s20 + $0x2b0] sm:$0xff] }
 0x16c   : > { %2087 = vst.msk [vmem:[%s2900_s20 + $0xc0] sm:$0xff] %vm251_vm1, %v1981_v56  ;;  %2141 = vst.msk [vmem:[%s2900_s20 + $0x270] sm:$0xff] %vm251_vm1, %v2035_v58  ;;  %v1101_v7 = vpop.f32.mrb[58].mxu0  ;;  %v1317_v8 = vpop.f32.mrb[58].mxu1  ;;  %v390_v56 = vld [vmem:[%s2900_s20 + $0x100] sm:$0xff] }
 0x16d   : > { %v1651_v26 = vld [vmem:[%s2900_s20 + $0xd0] sm:$0xff]  ;;  %v1705_v6 = vld [vmem:[%s2900_s20 + $0x280] sm:$0xff]  ;;  %2088 = vst.msk [vmem:[%s2900_s20 + $0xc8] sm:$0xff] %vm251_vm1, %v1982_v63  ;;  %2142 = vst.msk [vmem:[%s2900_s20 + $0x278] sm:$0xff] %vm251_vm1, %v2036_v0  ;;  %v1438_v11 = vadd.f32 %v1101_v7, %v387_v61  ;;  %v2461_v12 = vpop.f32.mrb[59].mxu0  ;;  %v1492_v13 = vadd.f32 %v1317_v8, %v441_v16  ;;  %v2569_v14 = vpop.f32.mrb[59].mxu1 }
 0x16e   : > { %v1764_v1 = vmul.f32 %v3772_v9, %v1651_v26  ;;  %v1818_v10 = vmul.f32 %v3772_v9, %v1705_v6  ;;  %1544 = vst.msk [vmem:[%s2900_s20 + $0xe0] sm:$0xff] %vm251_vm1, %v1437_v2  ;;  %1598 = vst.msk [vmem:[%s2900_s20 + $0x290] sm:$0xff] %vm251_vm1, %v1491_v4  ;;  %v1652_v15 = vld [vmem:[%s2900_s20 + $0xd8] sm:$0xff]  ;;  %v1706_v17 = vld [vmem:[%s2900_s20 + $0x288] sm:$0xff] }
 0x16f   : > { %v1765_v20 = vmul.f32 %v3772_v9, %v1652_v15  ;;  %v1819_v22 = vmul.f32 %v3772_v9, %v1706_v17  ;;  %1545 = vst.msk [vmem:[%s2900_s20 + $0xe8] sm:$0xff] %vm251_vm1, %v1438_v11  ;;  %1599 = vst.msk [vmem:[%s2900_s20 + $0x298] sm:$0xff] %vm251_vm1, %v1492_v13  ;;  %v391_v16 = vld [vmem:[%s2900_s20 + $0x108] sm:$0xff]  ;;  %v445_v0 = vld [vmem:[%s2900_s20 + $0x2b8] sm:$0xff] }
 0x170   : > { %v1877_v19 = vadd.f32 %v3785_v18, %v1764_v1  ;;  %v1931_v21 = vadd.f32 %v3785_v18, %v1818_v10 }
 0x171   : > { %v1878_v27 = vadd.f32 %v3785_v18, %v1765_v20  ;;  %v1932_v29 = vadd.f32 %v3785_v18, %v1819_v22 }
 0x172   : > { %v1983_v25 = vmax.f32 %v1877_v19, 0.0  ;;  %v2037_v28 = vmax.f32 %v1931_v21, 0.0  ;;  %v1106_v30 = vpop.f32.mrb[60].mxu0  ;;  %v1322_v32 = vpop.f32.mrb[60].mxu1 }
 0x173   : > { %v1984_v34 = vmax.f32 %v1878_v27, 0.0  ;;  %v2038_v35 = vmax.f32 %v1932_v29, 0.0  ;;  %v1439_v36 = vadd.f32 %v1106_v30, %v388_v23  ;;  %v2464_v37 = vpop.f32.mrb[61].mxu0  ;;  %v1493_v38 = vadd.f32 %v1322_v32, %v442_v24  ;;  %v2572_v39 = vpop.f32.mrb[61].mxu1  ;;  %v446_v27 = vld [vmem:[%s2900_s20 + $0x2c0] sm:$0xff] }
 0x174   : > { %2089 = vst.msk [vmem:[%s2900_s20 + $0xd0] sm:$0xff] %vm251_vm1, %v1983_v25  ;;  %2143 = vst.msk [vmem:[%s2900_s20 + $0x280] sm:$0xff] %vm251_vm1, %v2037_v28  ;;  %v1109_v42 = vpop.f32.mrb[62].mxu0  ;;  %v1325_v43 = vpop.f32.mrb[62].mxu1  ;;  %v392_v25 = vld [vmem:[%s2900_s20 + $0x110] sm:$0xff] }
 0x175   : > { %v1653_v40 = vld [vmem:[%s2900_s20 + $0xe0] sm:$0xff]  ;;  %v1707_v41 = vld [vmem:[%s2900_s20 + $0x290] sm:$0xff]  ;;  %2090 = vst.msk [vmem:[%s2900_s20 + $0xd8] sm:$0xff] %vm251_vm1, %v1984_v34  ;;  %2144 = vst.msk [vmem:[%s2900_s20 + $0x288] sm:$0xff] %vm251_vm1, %v2038_v35  ;;  %v1440_v46 = vadd.f32 %v1109_v42, %v389_v31  ;;  %v2465_v47 = vpop.f32.mrb[63].mxu0  ;;  %v1494_v48 = vadd.f32 %v1325_v43, %v443_v33  ;;  %v2573_v49 = vpop.f32.mrb[63].mxu1 }
 0x176   : > { %v1766_v44 = vmul.f32 %v3772_v9, %v1653_v40  ;;  %v1820_v45 = vmul.f32 %v3772_v9, %v1707_v41  ;;  %1546 = vst.msk [vmem:[%s2900_s20 + $0xf0] sm:$0xff] %vm251_vm1, %v1439_v36  ;;  %1600 = vst.msk [vmem:[%s2900_s20 + $0x2a0] sm:$0xff] %vm251_vm1, %v1493_v38  ;;  %v1654_v50 = vld [vmem:[%s2900_s20 + $0xe8] sm:$0xff]  ;;  %v1708_v51 = vld [vmem:[%s2900_s20 + $0x298] sm:$0xff] }
 0x177   : > { %v1767_v53 = vmul.f32 %v3772_v9, %v1654_v50  ;;  %v1821_v55 = vmul.f32 %v3772_v9, %v1708_v51  ;;  %1547 = vst.msk [vmem:[%s2900_s20 + $0xf8] sm:$0xff] %vm251_vm1, %v1440_v46  ;;  %1601 = vst.msk [vmem:[%s2900_s20 + $0x2a8] sm:$0xff] %vm251_vm1, %v1494_v48  ;;  %v393_v33 = vld [vmem:[%s2900_s20 + $0x118] sm:$0xff]  ;;  %v447_v35 = vld [vmem:[%s2900_s20 + $0x2c8] sm:$0xff] }
 0x178   : > { %v1879_v52 = vadd.f32 %v3785_v18, %v1766_v44  ;;  %v1933_v54 = vadd.f32 %v3785_v18, %v1820_v45 }
 0x179   : > { %v1880_v59 = vadd.f32 %v3785_v18, %v1767_v53  ;;  %v1934_v61 = vadd.f32 %v3785_v18, %v1821_v55 }
 0x17a   : > { %v1985_v58 = vmax.f32 %v1879_v52, 0.0  ;;  %v2039_v60 = vmax.f32 %v1933_v54, 0.0  ;;  %v1114_v62 = vpop.f32.mrb[64].mxu0  ;;  %v1330_v63 = vpop.f32.mrb[64].mxu1 }
 0x17b   : > { %v1986_v2 = vmax.f32 %v1880_v59, 0.0  ;;  %v2040_v3 = vmax.f32 %v1934_v61, 0.0  ;;  %v1441_v4 = vadd.f32 %v1114_v62, %v390_v56  ;;  %v2468_v5 = vpop.f32.mrb[65].mxu0  ;;  %v1495_v26 = vadd.f32 %v1330_v63, %v444_v57  ;;  %v2576_v6 = vpop.f32.mrb[65].mxu1  ;;  %v448_v59 = vld [vmem:[%s2900_s20 + $0x2d0] sm:$0xff] }
 0x17c   : > { %2091 = vst.msk [vmem:[%s2900_s20 + $0xe0] sm:$0xff] %vm251_vm1, %v1985_v58  ;;  %2145 = vst.msk [vmem:[%s2900_s20 + $0x290] sm:$0xff] %vm251_vm1, %v2039_v60  ;;  %v1117_v1 = vpop.f32.mrb[66].mxu0  ;;  %v1333_v10 = vpop.f32.mrb[66].mxu1  ;;  %v394_v58 = vld [vmem:[%s2900_s20 + $0x120] sm:$0xff] }
 0x17d   : > { %v1655_v7 = vld [vmem:[%s2900_s20 + $0xf0] sm:$0xff]  ;;  %v1709_v8 = vld [vmem:[%s2900_s20 + $0x2a0] sm:$0xff]  ;;  %2092 = vst.msk [vmem:[%s2900_s20 + $0xe8] sm:$0xff] %vm251_vm1, %v1986_v2  ;;  %2146 = vst.msk [vmem:[%s2900_s20 + $0x298] sm:$0xff] %vm251_vm1, %v2040_v3  ;;  %v1442_v13 = vadd.f32 %v1117_v1, %v391_v16  ;;  %v2469_v14 = vpop.f32.mrb[67].mxu0  ;;  %v1496_v15 = vadd.f32 %v1333_v10, %v445_v0  ;;  %v2577_v17 = vpop.f32.mrb[67].mxu1 }
 0x17e   : > { %v1768_v11 = vmul.f32 %v3772_v9, %v1655_v7  ;;  %v1822_v12 = vmul.f32 %v3772_v9, %v1709_v8  ;;  %1548 = vst.msk [vmem:[%s2900_s20 + $0x100] sm:$0xff] %vm251_vm1, %v1441_v4  ;;  %1602 = vst.msk [vmem:[%s2900_s20 + $0x2b0] sm:$0xff] %vm251_vm1, %v1495_v26  ;;  %v1656_v19 = vld [vmem:[%s2900_s20 + $0xf8] sm:$0xff]  ;;  %v1710_v20 = vld [vmem:[%s2900_s20 + $0x2a8] sm:$0xff] }
 0x17f   : > { %v1769_v22 = vmul.f32 %v3772_v9, %v1656_v19  ;;  %v1823_v24 = vmul.f32 %v3772_v9, %v1710_v20  ;;  %1549 = vst.msk [vmem:[%s2900_s20 + $0x108] sm:$0xff] %vm251_vm1, %v1442_v13  ;;  %1603 = vst.msk [vmem:[%s2900_s20 + $0x2b8] sm:$0xff] %vm251_vm1, %v1496_v15  ;;  %v395_v0 = vld [vmem:[%s2900_s20 + $0x128] sm:$0xff]  ;;  %v449_v3 = vld [vmem:[%s2900_s20 + $0x2d8] sm:$0xff] }
 0x180   : > { %v1881_v21 = vadd.f32 %v3785_v18, %v1768_v11  ;;  %v1935_v23 = vadd.f32 %v3785_v18, %v1822_v12 }
 0x181   : > { %v1882_v29 = vadd.f32 %v3785_v18, %v1769_v22  ;;  %v1936_v31 = vadd.f32 %v3785_v18, %v1823_v24 }
 0x182   : > { %v1987_v28 = vmax.f32 %v1881_v21, 0.0  ;;  %v2041_v30 = vmax.f32 %v1935_v23, 0.0  ;;  %v1122_v32 = vpop.f32.mrb[68].mxu0  ;;  %v1338_v34 = vpop.f32.mrb[68].mxu1 }
 0x183   : > { %v1988_v36 = vmax.f32 %v1882_v29, 0.0  ;;  %v2042_v37 = vmax.f32 %v1936_v31, 0.0  ;;  %v1443_v38 = vadd.f32 %v1122_v32, %v392_v25  ;;  %v2472_v39 = vpop.f32.mrb[69].mxu0  ;;  %v1497_v40 = vadd.f32 %v1338_v34, %v446_v27  ;;  %v2580_v41 = vpop.f32.mrb[69].mxu1  ;;  %v450_v29 = vld [vmem:[%s2900_s20 + $0x2e0] sm:$0xff] }
 0x184   : > { %2093 = vst.msk [vmem:[%s2900_s20 + $0xf0] sm:$0xff] %vm251_vm1, %v1987_v28  ;;  %2147 = vst.msk [vmem:[%s2900_s20 + $0x2a0] sm:$0xff] %vm251_vm1, %v2041_v30  ;;  %v1125_v44 = vpop.f32.mrb[70].mxu0  ;;  %v1341_v45 = vpop.f32.mrb[70].mxu1  ;;  %v396_v28 = vld [vmem:[%s2900_s20 + $0x130] sm:$0xff] }
 0x185   : > { %v1657_v42 = vld [vmem:[%s2900_s20 + $0x100] sm:$0xff]  ;;  %v1711_v43 = vld [vmem:[%s2900_s20 + $0x2b0] sm:$0xff]  ;;  %2094 = vst.msk [vmem:[%s2900_s20 + $0xf8] sm:$0xff] %vm251_vm1, %v1988_v36  ;;  %2148 = vst.msk [vmem:[%s2900_s20 + $0x2a8] sm:$0xff] %vm251_vm1, %v2042_v37  ;;  %v1444_v48 = vadd.f32 %v1125_v44, %v393_v33  ;;  %v2473_v49 = vpop.f32.mrb[71].mxu0  ;;  %v1498_v50 = vadd.f32 %v1341_v45, %v447_v35  ;;  %v2581_v51 = vpop.f32.mrb[71].mxu1 }
 0x186   : > { %v1770_v46 = vmul.f32 %v3772_v9, %v1657_v42  ;;  %v1824_v47 = vmul.f32 %v3772_v9, %v1711_v43  ;;  %1550 = vst.msk [vmem:[%s2900_s20 + $0x110] sm:$0xff] %vm251_vm1, %v1443_v38  ;;  %1604 = vst.msk [vmem:[%s2900_s20 + $0x2c0] sm:$0xff] %vm251_vm1, %v1497_v40  ;;  %v1658_v52 = vld [vmem:[%s2900_s20 + $0x108] sm:$0xff]  ;;  %v1712_v53 = vld [vmem:[%s2900_s20 + $0x2b8] sm:$0xff] }
 0x187   : > { %v1771_v55 = vmul.f32 %v3772_v9, %v1658_v52  ;;  %v1825_v57 = vmul.f32 %v3772_v9, %v1712_v53  ;;  %1551 = vst.msk [vmem:[%s2900_s20 + $0x118] sm:$0xff] %vm251_vm1, %v1444_v48  ;;  %1605 = vst.msk [vmem:[%s2900_s20 + $0x2c8] sm:$0xff] %vm251_vm1, %v1498_v50  ;;  %v397_v35 = vld [vmem:[%s2900_s20 + $0x138] sm:$0xff]  ;;  %v451_v37 = vld [vmem:[%s2900_s20 + $0x2e8] sm:$0xff] }
 0x188   : > { %v1883_v54 = vadd.f32 %v3785_v18, %v1770_v46  ;;  %v1937_v56 = vadd.f32 %v3785_v18, %v1824_v47 }
 0x189   : > { %v1884_v61 = vadd.f32 %v3785_v18, %v1771_v55  ;;  %v1938_v16 = vadd.f32 %v3785_v18, %v1825_v57 }
 0x18a   : > { %v1989_v60 = vmax.f32 %v1883_v54, 0.0  ;;  %v2043_v62 = vmax.f32 %v1937_v56, 0.0  ;;  %v1130_v63 = vpop.f32.mrb[72].mxu0  ;;  %v1346_v2 = vpop.f32.mrb[72].mxu1 }
 0x18b   : > { %v1990_v4 = vmax.f32 %v1884_v61, 0.0  ;;  %v2044_v5 = vmax.f32 %v1938_v16, 0.0  ;;  %v1445_v26 = vadd.f32 %v1130_v63, %v394_v58  ;;  %v2476_v6 = vpop.f32.mrb[73].mxu0  ;;  %v1499_v7 = vadd.f32 %v1346_v2, %v448_v59  ;;  %v2584_v8 = vpop.f32.mrb[73].mxu1  ;;  %v452_v61 = vld [vmem:[%s2900_s20 + $0x2f0] sm:$0xff] }
 0x18c   : > { %2095 = vst.msk [vmem:[%s2900_s20 + $0x100] sm:$0xff] %vm251_vm1, %v1989_v60  ;;  %2149 = vst.msk [vmem:[%s2900_s20 + $0x2b0] sm:$0xff] %vm251_vm1, %v2043_v62  ;;  %v1133_v11 = vpop.f32.mrb[74].mxu0  ;;  %v1349_v12 = vpop.f32.mrb[74].mxu1  ;;  %v398_v60 = vld [vmem:[%s2900_s20 + $0x140] sm:$0xff] }
 0x18d   : > { %v1659_v1 = vld [vmem:[%s2900_s20 + $0x110] sm:$0xff]  ;;  %v1713_v10 = vld [vmem:[%s2900_s20 + $0x2c0] sm:$0xff]  ;;  %2096 = vst.msk [vmem:[%s2900_s20 + $0x108] sm:$0xff] %vm251_vm1, %v1990_v4  ;;  %2150 = vst.msk [vmem:[%s2900_s20 + $0x2b8] sm:$0xff] %vm251_vm1, %v2044_v5  ;;  %v1446_v15 = vadd.f32 %v1133_v11, %v395_v0  ;;  %v2477_v17 = vpop.f32.mrb[75].mxu0  ;;  %v1500_v19 = vadd.f32 %v1349_v12, %v449_v3  ;;  %v2585_v20 = vpop.f32.mrb[75].mxu1 }
 0x18e   : > { %v1772_v13 = vmul.f32 %v3772_v9, %v1659_v1  ;;  %v1826_v14 = vmul.f32 %v3772_v9, %v1713_v10  ;;  %1552 = vst.msk [vmem:[%s2900_s20 + $0x120] sm:$0xff] %vm251_vm1, %v1445_v26  ;;  %1606 = vst.msk [vmem:[%s2900_s20 + $0x2d0] sm:$0xff] %vm251_vm1, %v1499_v7  ;;  %v1660_v21 = vld [vmem:[%s2900_s20 + $0x118] sm:$0xff]  ;;  %v1714_v22 = vld [vmem:[%s2900_s20 + $0x2c8] sm:$0xff] }
 0x18f   : > { %v1773_v24 = vmul.f32 %v3772_v9, %v1660_v21  ;;  %v1827_v27 = vmul.f32 %v3772_v9, %v1714_v22  ;;  %1553 = vst.msk [vmem:[%s2900_s20 + $0x128] sm:$0xff] %vm251_vm1, %v1446_v15  ;;  %1607 = vst.msk [vmem:[%s2900_s20 + $0x2d8] sm:$0xff] %vm251_vm1, %v1500_v19  ;;  %v399_v3 = vld [vmem:[%s2900_s20 + $0x148] sm:$0xff]  ;;  %v453_v5 = vld [vmem:[%s2900_s20 + $0x2f8] sm:$0xff] }
 0x190   : > { %v1885_v23 = vadd.f32 %v3785_v18, %v1772_v13  ;;  %v1939_v25 = vadd.f32 %v3785_v18, %v1826_v14 }
 0x191   : > { %v1886_v31 = vadd.f32 %v3785_v18, %v1773_v24  ;;  %v1940_v33 = vadd.f32 %v3785_v18, %v1827_v27 }
 0x192   : > { %v1991_v30 = vmax.f32 %v1885_v23, 0.0  ;;  %v2045_v32 = vmax.f32 %v1939_v25, 0.0  ;;  %v1138_v34 = vpop.f32.mrb[76].mxu0  ;;  %v1354_v36 = vpop.f32.mrb[76].mxu1 }
 0x193   : > { %v1992_v38 = vmax.f32 %v1886_v31, 0.0  ;;  %v2046_v39 = vmax.f32 %v1940_v33, 0.0  ;;  %v1447_v40 = vadd.f32 %v1138_v34, %v396_v28  ;;  %v2480_v41 = vpop.f32.mrb[77].mxu0  ;;  %v1501_v42 = vadd.f32 %v1354_v36, %v450_v29  ;;  %v2588_v43 = vpop.f32.mrb[77].mxu1  ;;  %v454_v31 = vld [vmem:[%s2900_s20 + $0x300] sm:$0xff] }
 0x194   : > { %2097 = vst.msk [vmem:[%s2900_s20 + $0x110] sm:$0xff] %vm251_vm1, %v1991_v30  ;;  %2151 = vst.msk [vmem:[%s2900_s20 + $0x2c0] sm:$0xff] %vm251_vm1, %v2045_v32  ;;  %v1141_v46 = vpop.f32.mrb[78].mxu0  ;;  %v1357_v47 = vpop.f32.mrb[78].mxu1  ;;  %v400_v30 = vld [vmem:[%s2900_s20 + $0x150] sm:$0xff] }
 0x195   : > { %v1661_v44 = vld [vmem:[%s2900_s20 + $0x120] sm:$0xff]  ;;  %v1715_v45 = vld [vmem:[%s2900_s20 + $0x2d0] sm:$0xff]  ;;  %2098 = vst.msk [vmem:[%s2900_s20 + $0x118] sm:$0xff] %vm251_vm1, %v1992_v38  ;;  %2152 = vst.msk [vmem:[%s2900_s20 + $0x2c8] sm:$0xff] %vm251_vm1, %v2046_v39  ;;  %v1448_v50 = vadd.f32 %v1141_v46, %v397_v35  ;;  %v2481_v51 = vpop.f32.mrb[79].mxu0  ;;  %v1502_v52 = vadd.f32 %v1357_v47, %v451_v37  ;;  %v2589_v53 = vpop.f32.mrb[79].mxu1 }
 0x196   : > { %v1774_v48 = vmul.f32 %v3772_v9, %v1661_v44  ;;  %v1828_v49 = vmul.f32 %v3772_v9, %v1715_v45  ;;  %1554 = vst.msk [vmem:[%s2900_s20 + $0x130] sm:$0xff] %vm251_vm1, %v1447_v40  ;;  %1608 = vst.msk [vmem:[%s2900_s20 + $0x2e0] sm:$0xff] %vm251_vm1, %v1501_v42  ;;  %v1662_v54 = vld [vmem:[%s2900_s20 + $0x128] sm:$0xff]  ;;  %v1716_v55 = vld [vmem:[%s2900_s20 + $0x2d8] sm:$0xff] }
 0x197   : > { %v1775_v57 = vmul.f32 %v3772_v9, %v1662_v54  ;;  %v1829_v59 = vmul.f32 %v3772_v9, %v1716_v55  ;;  %1555 = vst.msk [vmem:[%s2900_s20 + $0x138] sm:$0xff] %vm251_vm1, %v1448_v50  ;;  %1609 = vst.msk [vmem:[%s2900_s20 + $0x2e8] sm:$0xff] %vm251_vm1, %v1502_v52  ;;  %v401_v37 = vld [vmem:[%s2900_s20 + $0x158] sm:$0xff]  ;;  %v455_v39 = vld [vmem:[%s2900_s20 + $0x308] sm:$0xff] }
 0x198   : > { %v1887_v56 = vadd.f32 %v3785_v18, %v1774_v48  ;;  %v1941_v58 = vadd.f32 %v3785_v18, %v1828_v49 }
 0x199   : > { %v1888_v16 = vadd.f32 %v3785_v18, %v1775_v57  ;;  %v1942_v0 = vadd.f32 %v3785_v18, %v1829_v59 }
 0x19a   : > { %v1993_v62 = vmax.f32 %v1887_v56, 0.0  ;;  %v2047_v63 = vmax.f32 %v1941_v58, 0.0  ;;  %v1146_v2 = vpop.f32.mrb[80].mxu0  ;;  %v1362_v4 = vpop.f32.mrb[80].mxu1 }
 0x19b   : > { %v1994_v26 = vmax.f32 %v1888_v16, 0.0  ;;  %v2048_v6 = vmax.f32 %v1942_v0, 0.0  ;;  %v1449_v7 = vadd.f32 %v1146_v2, %v398_v60  ;;  %v2484_v8 = vpop.f32.mrb[81].mxu0  ;;  %v1503_v1 = vadd.f32 %v1362_v4, %v452_v61  ;;  %v2592_v10 = vpop.f32.mrb[81].mxu1  ;;  %v456_v16 = vld [vmem:[%s2900_s20 + $0x310] sm:$0xff] }
 0x19c   : > { %2099 = vst.msk [vmem:[%s2900_s20 + $0x120] sm:$0xff] %vm251_vm1, %v1993_v62  ;;  %2153 = vst.msk [vmem:[%s2900_s20 + $0x2d0] sm:$0xff] %vm251_vm1, %v2047_v63  ;;  %v1149_v13 = vpop.f32.mrb[82].mxu0  ;;  %v1365_v14 = vpop.f32.mrb[82].mxu1  ;;  %v402_v62 = vld [vmem:[%s2900_s20 + $0x160] sm:$0xff] }
 0x19d   : > { %v1663_v11 = vld [vmem:[%s2900_s20 + $0x130] sm:$0xff]  ;;  %v1717_v12 = vld [vmem:[%s2900_s20 + $0x2e0] sm:$0xff]  ;;  %2100 = vst.msk [vmem:[%s2900_s20 + $0x128] sm:$0xff] %vm251_vm1, %v1994_v26  ;;  %2154 = vst.msk [vmem:[%s2900_s20 + $0x2d8] sm:$0xff] %vm251_vm1, %v2048_v6  ;;  %v1450_v19 = vadd.f32 %v1149_v13, %v399_v3  ;;  %v2485_v20 = vpop.f32.mrb[83].mxu0  ;;  %v1504_v21 = vadd.f32 %v1365_v14, %v453_v5  ;;  %v2593_v22 = vpop.f32.mrb[83].mxu1 }
 0x19e   : > { %v1776_v15 = vmul.f32 %v3772_v9, %v1663_v11  ;;  %v1830_v17 = vmul.f32 %v3772_v9, %v1717_v12  ;;  %1556 = vst.msk [vmem:[%s2900_s20 + $0x140] sm:$0xff] %vm251_vm1, %v1449_v7  ;;  %1610 = vst.msk [vmem:[%s2900_s20 + $0x2f0] sm:$0xff] %vm251_vm1, %v1503_v1  ;;  %v1664_v23 = vld [vmem:[%s2900_s20 + $0x138] sm:$0xff]  ;;  %v1718_v24 = vld [vmem:[%s2900_s20 + $0x2e8] sm:$0xff] }
 0x19f   : > { %v1777_v27 = vmul.f32 %v3772_v9, %v1664_v23  ;;  %v1831_v29 = vmul.f32 %v3772_v9, %v1718_v24  ;;  %1557 = vst.msk [vmem:[%s2900_s20 + $0x148] sm:$0xff] %vm251_vm1, %v1450_v19  ;;  %1611 = vst.msk [vmem:[%s2900_s20 + $0x2f8] sm:$0xff] %vm251_vm1, %v1504_v21  ;;  %v403_v5 = vld [vmem:[%s2900_s20 + $0x168] sm:$0xff]  ;;  %v457_v6 = vld [vmem:[%s2900_s20 + $0x318] sm:$0xff] }
 0x1a0   : > { %v1889_v25 = vadd.f32 %v3785_v18, %v1776_v15  ;;  %v1943_v28 = vadd.f32 %v3785_v18, %v1830_v17 }
 0x1a1   : > { %v1890_v33 = vadd.f32 %v3785_v18, %v1777_v27  ;;  %v1944_v35 = vadd.f32 %v3785_v18, %v1831_v29 }
 0x1a2   : > { %v1995_v32 = vmax.f32 %v1889_v25, 0.0  ;;  %v2049_v34 = vmax.f32 %v1943_v28, 0.0  ;;  %v1154_v36 = vpop.f32.mrb[84].mxu0  ;;  %v1370_v38 = vpop.f32.mrb[84].mxu1 }
 0x1a3   : > { %v1996_v40 = vmax.f32 %v1890_v33, 0.0  ;;  %v2050_v41 = vmax.f32 %v1944_v35, 0.0  ;;  %v1451_v42 = vadd.f32 %v1154_v36, %v400_v30  ;;  %v2488_v43 = vpop.f32.mrb[85].mxu0  ;;  %v1505_v44 = vadd.f32 %v1370_v38, %v454_v31  ;;  %v2596_v45 = vpop.f32.mrb[85].mxu1  ;;  %v458_v33 = vld [vmem:[%s2900_s20 + $0x320] sm:$0xff] }
 0x1a4   : > { %2101 = vst.msk [vmem:[%s2900_s20 + $0x130] sm:$0xff] %vm251_vm1, %v1995_v32  ;;  %2155 = vst.msk [vmem:[%s2900_s20 + $0x2e0] sm:$0xff] %vm251_vm1, %v2049_v34  ;;  %v1157_v48 = vpop.f32.mrb[86].mxu0  ;;  %v1373_v49 = vpop.f32.mrb[86].mxu1  ;;  %v404_v32 = vld [vmem:[%s2900_s20 + $0x170] sm:$0xff] }
 0x1a5   : > { %v1665_v46 = vld [vmem:[%s2900_s20 + $0x140] sm:$0xff]  ;;  %v1719_v47 = vld [vmem:[%s2900_s20 + $0x2f0] sm:$0xff]  ;;  %2102 = vst.msk [vmem:[%s2900_s20 + $0x138] sm:$0xff] %vm251_vm1, %v1996_v40  ;;  %2156 = vst.msk [vmem:[%s2900_s20 + $0x2e8] sm:$0xff] %vm251_vm1, %v2050_v41  ;;  %v1452_v52 = vadd.f32 %v1157_v48, %v401_v37  ;;  %v2489_v53 = vpop.f32.mrb[87].mxu0  ;;  %v1506_v54 = vadd.f32 %v1373_v49, %v455_v39  ;;  %v2597_v55 = vpop.f32.mrb[87].mxu1 }
 0x1a6   : > { %v1778_v50 = vmul.f32 %v3772_v9, %v1665_v46  ;;  %v1832_v51 = vmul.f32 %v3772_v9, %v1719_v47  ;;  %1558 = vst.msk [vmem:[%s2900_s20 + $0x150] sm:$0xff] %vm251_vm1, %v1451_v42  ;;  %1612 = vst.msk [vmem:[%s2900_s20 + $0x300] sm:$0xff] %vm251_vm1, %v1505_v44  ;;  %v1666_v56 = vld [vmem:[%s2900_s20 + $0x148] sm:$0xff]  ;;  %v1720_v57 = vld [vmem:[%s2900_s20 + $0x2f8] sm:$0xff] }
 0x1a7   : > { %v1779_v59 = vmul.f32 %v3772_v9, %v1666_v56  ;;  %v1833_v61 = vmul.f32 %v3772_v9, %v1720_v57  ;;  %1559 = vst.msk [vmem:[%s2900_s20 + $0x158] sm:$0xff] %vm251_vm1, %v1452_v52  ;;  %1613 = vst.msk [vmem:[%s2900_s20 + $0x308] sm:$0xff] %vm251_vm1, %v1506_v54  ;;  %v405_v39 = vld [vmem:[%s2900_s20 + $0x178] sm:$0xff]  ;;  %v459_v41 = vld [vmem:[%s2900_s20 + $0x328] sm:$0xff] }
 0x1a8   : > { %v1891_v58 = vadd.f32 %v3785_v18, %v1778_v50  ;;  %v1945_v60 = vadd.f32 %v3785_v18, %v1832_v51 }
 0x1a9   : > { %v1892_v0 = vadd.f32 %v3785_v18, %v1779_v59  ;;  %v1946_v3 = vadd.f32 %v3785_v18, %v1833_v61 }
 0x1aa   : > { %v1997_v63 = vmax.f32 %v1891_v58, 0.0  ;;  %v2051_v2 = vmax.f32 %v1945_v60, 0.0  ;;  %v1162_v4 = vpop.f32.mrb[88].mxu0  ;;  %v1378_v26 = vpop.f32.mrb[88].mxu1 }
 0x1ab   : > { %v1998_v7 = vmax.f32 %v1892_v0, 0.0  ;;  %v2052_v8 = vmax.f32 %v1946_v3, 0.0  ;;  %v1453_v1 = vadd.f32 %v1162_v4, %v402_v62  ;;  %v2492_v10 = vpop.f32.mrb[89].mxu0  ;;  %v1507_v11 = vadd.f32 %v1378_v26, %v456_v16  ;;  %v2600_v12 = vpop.f32.mrb[89].mxu1  ;;  %v460_v0 = vld [vmem:[%s2900_s20 + $0x330] sm:$0xff] }
 0x1ac   : > { %2103 = vst.msk [vmem:[%s2900_s20 + $0x140] sm:$0xff] %vm251_vm1, %v1997_v63  ;;  %2157 = vst.msk [vmem:[%s2900_s20 + $0x2f0] sm:$0xff] %vm251_vm1, %v2051_v2  ;;  %v1165_v15 = vpop.f32.mrb[90].mxu0  ;;  %v1381_v17 = vpop.f32.mrb[90].mxu1  ;;  %v406_v63 = vld [vmem:[%s2900_s20 + $0x180] sm:$0xff] }
 0x1ad   : > { %v1667_v13 = vld [vmem:[%s2900_s20 + $0x150] sm:$0xff]  ;;  %v1721_v14 = vld [vmem:[%s2900_s20 + $0x300] sm:$0xff]  ;;  %2104 = vst.msk [vmem:[%s2900_s20 + $0x148] sm:$0xff] %vm251_vm1, %v1998_v7  ;;  %2158 = vst.msk [vmem:[%s2900_s20 + $0x2f8] sm:$0xff] %vm251_vm1, %v2052_v8  ;;  %v1454_v21 = vadd.f32 %v1165_v15, %v403_v5  ;;  %v2493_v22 = vpop.f32.mrb[91].mxu0  ;;  %v1508_v23 = vadd.f32 %v1381_v17, %v457_v6  ;;  %v2601_v24 = vpop.f32.mrb[91].mxu1 }
 0x1ae   : > { %v1780_v19 = vmul.f32 %v3772_v9, %v1667_v13  ;;  %v1834_v20 = vmul.f32 %v3772_v9, %v1721_v14  ;;  %1560 = vst.msk [vmem:[%s2900_s20 + $0x160] sm:$0xff] %vm251_vm1, %v1453_v1  ;;  %1614 = vst.msk [vmem:[%s2900_s20 + $0x310] sm:$0xff] %vm251_vm1, %v1507_v11  ;;  %v1668_v25 = vld [vmem:[%s2900_s20 + $0x158] sm:$0xff]  ;;  %v1722_v27 = vld [vmem:[%s2900_s20 + $0x308] sm:$0xff] }
 0x1af   : > { %v1781_v29 = vmul.f32 %v3772_v9, %v1668_v25  ;;  %v1835_v31 = vmul.f32 %v3772_v9, %v1722_v27  ;;  %1561 = vst.msk [vmem:[%s2900_s20 + $0x168] sm:$0xff] %vm251_vm1, %v1454_v21  ;;  %1615 = vst.msk [vmem:[%s2900_s20 + $0x318] sm:$0xff] %vm251_vm1, %v1508_v23  ;;  %v407_v6 = vld [vmem:[%s2900_s20 + $0x188] sm:$0xff]  ;;  %v461_v8 = vld [vmem:[%s2900_s20 + $0x338] sm:$0xff] }
 0x1b0   : > { %v1893_v28 = vadd.f32 %v3785_v18, %v1780_v19  ;;  %v1947_v30 = vadd.f32 %v3785_v18, %v1834_v20 }
 0x1b1   : > { %v1894_v35 = vadd.f32 %v3785_v18, %v1781_v29  ;;  %v1948_v37 = vadd.f32 %v3785_v18, %v1835_v31 }
 0x1b2   : > { %v1999_v34 = vmax.f32 %v1893_v28, 0.0  ;;  %v2053_v36 = vmax.f32 %v1947_v30, 0.0  ;;  %v1170_v38 = vpop.f32.mrb[92].mxu0  ;;  %v1386_v40 = vpop.f32.mrb[92].mxu1 }
 0x1b3   : > { %v2000_v42 = vmax.f32 %v1894_v35, 0.0  ;;  %v2054_v43 = vmax.f32 %v1948_v37, 0.0  ;;  %v1455_v44 = vadd.f32 %v1170_v38, %v404_v32  ;;  %v2496_v45 = vpop.f32.mrb[93].mxu0  ;;  %v1509_v46 = vadd.f32 %v1386_v40, %v458_v33  ;;  %v2604_v47 = vpop.f32.mrb[93].mxu1  ;;  %v462_v35 = vld [vmem:[%s2900_s20 + $0x340] sm:$0xff] }
 0x1b4   : > { %2105 = vst.msk [vmem:[%s2900_s20 + $0x150] sm:$0xff] %vm251_vm1, %v1999_v34  ;;  %2159 = vst.msk [vmem:[%s2900_s20 + $0x300] sm:$0xff] %vm251_vm1, %v2053_v36  ;;  %v1173_v50 = vpop.f32.mrb[94].mxu0  ;;  %v1389_v51 = vpop.f32.mrb[94].mxu1  ;;  %v408_v34 = vld [vmem:[%s2900_s20 + $0x190] sm:$0xff] }
 0x1b5   : > { %v1669_v48 = vld [vmem:[%s2900_s20 + $0x160] sm:$0xff]  ;;  %v1723_v49 = vld [vmem:[%s2900_s20 + $0x310] sm:$0xff]  ;;  %2106 = vst.msk [vmem:[%s2900_s20 + $0x158] sm:$0xff] %vm251_vm1, %v2000_v42  ;;  %2160 = vst.msk [vmem:[%s2900_s20 + $0x308] sm:$0xff] %vm251_vm1, %v2054_v43  ;;  %v1456_v54 = vadd.f32 %v1173_v50, %v405_v39  ;;  %v2497_v55 = vpop.f32.mrb[95].mxu0  ;;  %v1510_v56 = vadd.f32 %v1389_v51, %v459_v41  ;;  %v2605_v57 = vpop.f32.mrb[95].mxu1 }
 0x1b6   : > { %v1782_v52 = vmul.f32 %v3772_v9, %v1669_v48  ;;  %v1836_v53 = vmul.f32 %v3772_v9, %v1723_v49  ;;  %1562 = vst.msk [vmem:[%s2900_s20 + $0x170] sm:$0xff] %vm251_vm1, %v1455_v44  ;;  %1616 = vst.msk [vmem:[%s2900_s20 + $0x320] sm:$0xff] %vm251_vm1, %v1509_v46  ;;  %v1670_v58 = vld [vmem:[%s2900_s20 + $0x168] sm:$0xff]  ;;  %v1724_v59 = vld [vmem:[%s2900_s20 + $0x318] sm:$0xff] }
 0x1b7   : > { %v1783_v61 = vmul.f32 %v3772_v9, %v1670_v58  ;;  %v1837_v16 = vmul.f32 %v3772_v9, %v1724_v59  ;;  %1563 = vst.msk [vmem:[%s2900_s20 + $0x178] sm:$0xff] %vm251_vm1, %v1456_v54  ;;  %1617 = vst.msk [vmem:[%s2900_s20 + $0x328] sm:$0xff] %vm251_vm1, %v1510_v56  ;;  %v409_v41 = vld [vmem:[%s2900_s20 + $0x198] sm:$0xff]  ;;  %v463_v43 = vld [vmem:[%s2900_s20 + $0x348] sm:$0xff] }
 0x1b8   : > { %v1895_v60 = vadd.f32 %v3785_v18, %v1782_v52  ;;  %v1949_v62 = vadd.f32 %v3785_v18, %v1836_v53 }
 0x1b9   : > { %v1896_v3 = vadd.f32 %v3785_v18, %v1783_v61  ;;  %v1950_v5 = vadd.f32 %v3785_v18, %v1837_v16 }
 0x1ba   : > { %v2001_v2 = vmax.f32 %v1895_v60, 0.0  ;;  %v2055_v4 = vmax.f32 %v1949_v62, 0.0  ;;  %v1178_v26 = vpop.f32.mrb[96].mxu0  ;;  %v1394_v7 = vpop.f32.mrb[96].mxu1 }
 0x1bb   : > { %v2002_v1 = vmax.f32 %v1896_v3, 0.0  ;;  %v2056_v10 = vmax.f32 %v1950_v5, 0.0  ;;  %v1457_v11 = vadd.f32 %v1178_v26, %v406_v63  ;;  %v2500_v12 = vpop.f32.mrb[97].mxu0  ;;  %v1511_v13 = vadd.f32 %v1394_v7, %v460_v0  ;;  %v2608_v14 = vpop.f32.mrb[97].mxu1  ;;  %v411_v7 = vld [vmem:[%s2900_s20 + $0x1a8] sm:$0xff] }
 0x1bc   : > { %2107 = vst.msk [vmem:[%s2900_s20 + $0x160] sm:$0xff] %vm251_vm1, %v2001_v2  ;;  %2161 = vst.msk [vmem:[%s2900_s20 + $0x310] sm:$0xff] %vm251_vm1, %v2055_v4  ;;  %v1181_v19 = vpop.f32.mrb[98].mxu0  ;;  %v1397_v20 = vpop.f32.mrb[98].mxu1  ;;  %v410_v2 = vld [vmem:[%s2900_s20 + $0x1a0] sm:$0xff] }
 0x1bd   : > { %v1671_v15 = vld [vmem:[%s2900_s20 + $0x170] sm:$0xff]  ;;  %v1725_v17 = vld [vmem:[%s2900_s20 + $0x320] sm:$0xff]  ;;  %2108 = vst.msk [vmem:[%s2900_s20 + $0x168] sm:$0xff] %vm251_vm1, %v2002_v1  ;;  %2162 = vst.msk [vmem:[%s2900_s20 + $0x318] sm:$0xff] %vm251_vm1, %v2056_v10  ;;  %v1458_v23 = vadd.f32 %v1181_v19, %v407_v6  ;;  %v2501_v24 = vpop.f32.mrb[99].mxu0  ;;  %v1512_v25 = vadd.f32 %v1397_v20, %v461_v8  ;;  %v2609_v27 = vpop.f32.mrb[99].mxu1 }
 0x1be   : > { %v1784_v21 = vmul.f32 %v3772_v9, %v1671_v15  ;;  %v1838_v22 = vmul.f32 %v3772_v9, %v1725_v17  ;;  %1564 = vst.msk [vmem:[%s2900_s20 + $0x180] sm:$0xff] %vm251_vm1, %v1457_v11  ;;  %1618 = vst.msk [vmem:[%s2900_s20 + $0x330] sm:$0xff] %vm251_vm1, %v1511_v13  ;;  %v1672_v28 = vld [vmem:[%s2900_s20 + $0x178] sm:$0xff]  ;;  %v1726_v29 = vld [vmem:[%s2900_s20 + $0x328] sm:$0xff] }
 0x1bf   : > { %v1785_v31 = vmul.f32 %v3772_v9, %v1672_v28  ;;  %v1839_v33 = vmul.f32 %v3772_v9, %v1726_v29  ;;  %1565 = vst.msk [vmem:[%s2900_s20 + $0x188] sm:$0xff] %vm251_vm1, %v1458_v23  ;;  %1619 = vst.msk [vmem:[%s2900_s20 + $0x338] sm:$0xff] %vm251_vm1, %v1512_v25 }
 0x1c0   : > { %v1897_v30 = vadd.f32 %v3785_v18, %v1784_v21  ;;  %v1951_v32 = vadd.f32 %v3785_v18, %v1838_v22 }
 0x1c1   : > { %v1898_v37 = vadd.f32 %v3785_v18, %v1785_v31  ;;  %v1952_v39 = vadd.f32 %v3785_v18, %v1839_v33 }
 0x1c2   : > { %v2003_v36 = vmax.f32 %v1897_v30, 0.0  ;;  %v2057_v38 = vmax.f32 %v1951_v32, 0.0  ;;  %v1186_v40 = vpop.f32.mrb[100].mxu0  ;;  %v1402_v42 = vpop.f32.mrb[100].mxu1 }
 0x1c3   : > { %v2004_v44 = vmax.f32 %v1898_v37, 0.0  ;;  %v2058_v45 = vmax.f32 %v1952_v39, 0.0  ;;  %v1459_v46 = vadd.f32 %v1186_v40, %v408_v34  ;;  %v2504_v47 = vpop.f32.mrb[101].mxu0  ;;  %v1513_v48 = vadd.f32 %v1402_v42, %v462_v35  ;;  %v2612_v49 = vpop.f32.mrb[101].mxu1 }
 0x1c4   : > { %2109 = vst.msk [vmem:[%s2900_s20 + $0x170] sm:$0xff] %vm251_vm1, %v2003_v36  ;;  %2163 = vst.msk [vmem:[%s2900_s20 + $0x320] sm:$0xff] %vm251_vm1, %v2057_v38  ;;  %v1189_v52 = vpop.f32.mrb[102].mxu0  ;;  %v1405_v53 = vpop.f32.mrb[102].mxu1 }
 0x1c5   : > { %v1673_v50 = vld [vmem:[%s2900_s20 + $0x180] sm:$0xff]  ;;  %v1727_v51 = vld [vmem:[%s2900_s20 + $0x330] sm:$0xff]  ;;  %2110 = vst.msk [vmem:[%s2900_s20 + $0x178] sm:$0xff] %vm251_vm1, %v2004_v44  ;;  %2164 = vst.msk [vmem:[%s2900_s20 + $0x328] sm:$0xff] %vm251_vm1, %v2058_v45  ;;  %v1460_v56 = vadd.f32 %v1189_v52, %v409_v41  ;;  %v2505_v57 = vpop.f32.mrb[103].mxu0  ;;  %v1514_v58 = vadd.f32 %v1405_v53, %v463_v43  ;;  %v2613_v59 = vpop.f32.mrb[103].mxu1 }
 0x1c6   : > { %v1786_v54 = vmul.f32 %v3772_v9, %v1673_v50  ;;  %v1840_v55 = vmul.f32 %v3772_v9, %v1727_v51  ;;  %1566 = vst.msk [vmem:[%s2900_s20 + $0x190] sm:$0xff] %vm251_vm1, %v1459_v46  ;;  %1620 = vst.msk [vmem:[%s2900_s20 + $0x340] sm:$0xff] %vm251_vm1, %v1513_v48  ;;  %v1674_v60 = vld [vmem:[%s2900_s20 + $0x188] sm:$0xff]  ;;  %v1728_v61 = vld [vmem:[%s2900_s20 + $0x338] sm:$0xff] }
 0x1c7   : > { %v1787_v16 = vmul.f32 %v3772_v9, %v1674_v60  ;;  %v1841_v0 = vmul.f32 %v3772_v9, %v1728_v61  ;;  %1567 = vst.msk [vmem:[%s2900_s20 + $0x198] sm:$0xff] %vm251_vm1, %v1460_v56  ;;  %1621 = vst.msk [vmem:[%s2900_s20 + $0x348] sm:$0xff] %vm251_vm1, %v1514_v58 }
 0x1c8   : > { %v1899_v62 = vadd.f32 %v3785_v18, %v1786_v54  ;;  %v1953_v63 = vadd.f32 %v3785_v18, %v1840_v55 }
 0x1c9   : > { %v1900_v4 = vadd.f32 %v3785_v18, %v1787_v16  ;;  %v1954_v26 = vadd.f32 %v3785_v18, %v1841_v0 }
 0x1ca   : > { %v2005_v3 = vmax.f32 %v1899_v62, 0.0  ;;  %v2059_v5 = vmax.f32 %v1953_v63, 0.0  ;;  %v1194_v6 = vpop.f32.mrb[104].mxu0 }
 0x1cb   : > { %v2006_v8 = vmax.f32 %v1900_v4, 0.0  ;;  %v2060_v1 = vmax.f32 %v1954_v26, 0.0  ;;  %v1461_v10 = vadd.f32 %v1194_v6, %v410_v2  ;;  %v2508_v11 = vpop.f32.mrb[105].mxu0 }
 0x1cc   : > { %2111 = vst.msk [vmem:[%s2900_s20 + $0x180] sm:$0xff] %vm251_vm1, %v2005_v3  ;;  %2165 = vst.msk [vmem:[%s2900_s20 + $0x330] sm:$0xff] %vm251_vm1, %v2059_v5  ;;  %v1197_v14 = vpop.f32.mrb[106].mxu0 }
 0x1cd   : > { %v1675_v12 = vld [vmem:[%s2900_s20 + $0x190] sm:$0xff]  ;;  %v1729_v13 = vld [vmem:[%s2900_s20 + $0x340] sm:$0xff]  ;;  %2112 = vst.msk [vmem:[%s2900_s20 + $0x188] sm:$0xff] %vm251_vm1, %v2006_v8  ;;  %2166 = vst.msk [vmem:[%s2900_s20 + $0x338] sm:$0xff] %vm251_vm1, %v2060_v1  ;;  %v1462_v19 = vadd.f32 %v1197_v14, %v411_v7  ;;  %v2509_v20 = vpop.f32.mrb[107].mxu0 }
 0x1ce   : > { %v1788_v15 = vmul.f32 %v3772_v9, %v1675_v12  ;;  %v1842_v17 = vmul.f32 %v3772_v9, %v1729_v13  ;;  %1568 = vst.msk [vmem:[%s2900_s20 + $0x1a0] sm:$0xff] %vm251_vm1, %v1461_v10  ;;  %v1676_v21 = vld [vmem:[%s2900_s20 + $0x198] sm:$0xff]  ;;  %v1730_v22 = vld [vmem:[%s2900_s20 + $0x348] sm:$0xff] }
 0x1cf   : > { %v1789_v24 = vmul.f32 %v3772_v9, %v1676_v21  ;;  %v1843_v27 = vmul.f32 %v3772_v9, %v1730_v22  ;;  %1569 = vst.msk [vmem:[%s2900_s20 + $0x1a8] sm:$0xff] %vm251_vm1, %v1462_v19 }
 0x1d0   : > { %v1901_v23 = vadd.f32 %v3785_v18, %v1788_v15  ;;  %v1955_v25 = vadd.f32 %v3785_v18, %v1842_v17 }
 0x1d1   : > { %v1902_v29 = vadd.f32 %v3785_v18, %v1789_v24  ;;  %v1956_v31 = vadd.f32 %v3785_v18, %v1843_v27 }
 0x1d2   : > { %v2007_v28 = vmax.f32 %v1901_v23, 0.0  ;;  %v2061_v30 = vmax.f32 %v1955_v25, 0.0 }
 0x1d3   : > { %v2008_v32 = vmax.f32 %v1902_v29, 0.0  ;;  %v2062_v33 = vmax.f32 %v1956_v31, 0.0 }
 0x1d4   : > { %2113 = vst.msk [vmem:[%s2900_s20 + $0x190] sm:$0xff] %vm251_vm1, %v2007_v28  ;;  %2167 = vst.msk [vmem:[%s2900_s20 + $0x340] sm:$0xff] %vm251_vm1, %v2061_v30 }
 0x1d5   : > { %v1677_v34 = vld [vmem:[%s2900_s20 + $0x1a0] sm:$0xff]  ;;  %2114 = vst.msk [vmem:[%s2900_s20 + $0x198] sm:$0xff] %vm251_vm1, %v2008_v32  ;;  %2168 = vst.msk [vmem:[%s2900_s20 + $0x348] sm:$0xff] %vm251_vm1, %v2062_v33 }
 0x1d6   : > { %v1790_v35 = vmul.f32 %v3772_v9, %v1677_v34  ;;  %v1678_v36 = vld [vmem:[%s2900_s20 + $0x1a8] sm:$0xff] }
 0x1d7   : > { %v1791_v38 = vmul.f32 %v3772_v9, %v1678_v36 }
 0x1d8   : > { %v1903_v37 = vadd.f32 %v3785_v18, %v1790_v35 }
 0x1d9   : > { %v1904_v40 = vadd.f32 %v3785_v18, %v1791_v38 }
 0x1da   : > { %v2009_v39 = vmax.f32 %v1903_v37, 0.0 }
 0x1db   : > { %v2010_v41 = vmax.f32 %v1904_v40, 0.0 }
 0x1dc   : > { %2115 = vst.msk [vmem:[%s2900_s20 + $0x1a0] sm:$0xff] %vm251_vm1, %v2009_v39 }
 0x1dd   : > { %2116 = vst.msk [vmem:[%s2900_s20 + $0x1a8] sm:$0xff] %vm251_vm1, %v2010_v41 }
 0x1de PF: > { %s14_s17 = sadd.s32 1, %s2741_s17   ;;  %s4207_s15 = smov %s2737_s16 }
 0x1df   : > { %p11_p5 = scmp.ge.s32.totalorder %s14_s17, 10   ;;  %s4208_s16 = smov %s4210_s18 }
 0x1e1   :  { %13 = sbr.rel (!%p11_p5) target bundleno = 2 (0x2), region = 77 }

// kernel: alexnet3d_forward.6
= control target key start
LH: loop header
LB: loop body
LE: loop exit
PB: predicated region body
PF: predicated region fallthrough
CT: control target
= control target key end

     0   :  { %s339_s6 = smov 0   ;;  %s872_s0 = inlined_call_operand.vmem [shape: f32[27,250,64], index: 0, kind: input, shape index: {}]   ;;  %s873_s1 = inlined_call_operand.vmem [shape: f32[250,64], index: 1, kind: output, shape index: {}]  }
   0x1 LB: > { %s345_s7 = sadd.s32 4294967295, %s327_s6   ;;  %p305_p0 = scmp.ge.s32.totalorder %s327_s6, 1  ;;  %s327_s6 = sphi %s339_s6, %s11_s6  }
   0x2   : > { %p82_p1 = scmp.lt.s32.totalorder %s327_s6, 28 }
   0x4   : > { %p83_p2 = pnand %p305_p0, %p82_p1 }
   0x5   : > { %p97_p3 = scmp.lt.s32.totalorder (!%p83_p2), %s345_s7, 26  ;;  %p308_p4 = scmp.ne.s32.totalorder (!%p83_p2), %s345_s7, 0 }
   0x6   : > { %86 = sbr.rel (%p83_p2) target bundleno = 60 (0x3c), region = 24 }
   0xd   : > { %s98_s8 = scalar_select %p97_p3, %s345_s7, 26 }
   0xe   : > { %vm138_vm0 = vcmask (!%p308_p4), 523264   ;;  %vm170_vm1 = vcmask (!%p308_p4), 517120  }
   0xf   : > { %s312_s9 = sshll.u32 %s98_s8, 8 }
  0x10   : > { %s354_s12 = scalar_lea.vmem %s872_s0, %s312_s9 }
  0x11   : > { %v357_v0 = vld [vmem:[%s354_s12] sm:$0xff]  ;;  %v360_v1 = vld [vmem:[%s354_s12 + $0x8] sm:$0xff]  ;;  %v363_v2 = vld [vmem:[%s354_s12 + $0x10] sm:$0xff] }
  0x12   : > { %v366_v3 = vld [vmem:[%s354_s12 + $0x18] sm:$0xff]  ;;  %v369_v4 = vld [vmem:[%s354_s12 + $0x20] sm:$0xff]  ;;  %v372_v5 = vld [vmem:[%s354_s12 + $0x28] sm:$0xff]  ;;  %139 = vst.msk [vmem:[%s873_s1] sm:$0xff] (!%p308_p4), %vm138_vm0, %v357_v0 }
  0x13   : > { %v375_v6 = vld [vmem:[%s354_s12 + $0x30] sm:$0xff]  ;;  %v378_v7 = vld [vmem:[%s354_s12 + $0x38] sm:$0xff]  ;;  %v381_v8 = vld [vmem:[%s354_s12 + $0x40] sm:$0xff]  ;;  %140 = vst.msk [vmem:[%s873_s1 + $0x8] sm:$0xff] (!%p308_p4), %vm138_vm0, %v360_v1 }
  0x14   : > { %v384_v9 = vld [vmem:[%s354_s12 + $0x48] sm:$0xff]  ;;  %v387_v10 = vld [vmem:[%s354_s12 + $0x50] sm:$0xff]  ;;  %v390_v11 = vld [vmem:[%s354_s12 + $0x58] sm:$0xff]  ;;  %141 = vst.msk [vmem:[%s873_s1 + $0x10] sm:$0xff] (!%p308_p4), %vm138_vm0, %v363_v2 }
  0x15   : > { %v393_v12 = vld [vmem:[%s354_s12 + $0x60] sm:$0xff]  ;;  %v396_v13 = vld [vmem:[%s354_s12 + $0x68] sm:$0xff]  ;;  %v399_v14 = vld [vmem:[%s354_s12 + $0x70] sm:$0xff]  ;;  %137 = sbr.rel (%p308_p4) target bundleno = 39 (0x27), region = 28  ;;  %142 = vst.msk [vmem:[%s873_s1 + $0x18] sm:$0xff] (!%p308_p4), %vm138_vm0, %v366_v3 }
  0x16   : > { %v402_v15 = vld [vmem:[%s354_s12 + $0x78] sm:$0xff]  ;;  %v405_v16 = vld [vmem:[%s354_s12 + $0x80] sm:$0xff]  ;;  %v408_v17 = vld [vmem:[%s354_s12 + $0x88] sm:$0xff]  ;;  %143 = vst.msk [vmem:[%s873_s1 + $0x20] sm:$0xff] (!%p308_p4), %vm138_vm0, %v369_v4 }
  0x17   : > { %v411_v18 = vld [vmem:[%s354_s12 + $0x90] sm:$0xff]  ;;  %v414_v19 = vld [vmem:[%s354_s12 + $0x98] sm:$0xff]  ;;  %v417_v20 = vld [vmem:[%s354_s12 + $0xa0] sm:$0xff]  ;;  %144 = vst.msk [vmem:[%s873_s1 + $0x28] sm:$0xff] (!%p308_p4), %vm138_vm0, %v372_v5 }
  0x18   : > { %v420_v21 = vld [vmem:[%s354_s12 + $0xa8] sm:$0xff]  ;;  %v423_v22 = vld [vmem:[%s354_s12 + $0xb0] sm:$0xff]  ;;  %v426_v23 = vld [vmem:[%s354_s12 + $0xb8] sm:$0xff]  ;;  %145 = vst.msk [vmem:[%s873_s1 + $0x30] sm:$0xff] (!%p308_p4), %vm138_vm0, %v375_v6 }
  0x19   : > { %v429_v24 = vld [vmem:[%s354_s12 + $0xc0] sm:$0xff]  ;;  %v432_v25 = vld [vmem:[%s354_s12 + $0xc8] sm:$0xff]  ;;  %v435_v26 = vld [vmem:[%s354_s12 + $0xd0] sm:$0xff]  ;;  %146 = vst.msk [vmem:[%s873_s1 + $0x38] sm:$0xff] (!%p308_p4), %vm138_vm0, %v378_v7 }
  0x1a   : > { %v438_v27 = vld [vmem:[%s354_s12 + $0xd8] sm:$0xff]  ;;  %v441_v28 = vld [vmem:[%s354_s12 + $0xe0] sm:$0xff]  ;;  %v444_v29 = vld [vmem:[%s354_s12 + $0xe8] sm:$0xff]  ;;  %147 = vst.msk [vmem:[%s873_s1 + $0x40] sm:$0xff] (!%p308_p4), %vm138_vm0, %v381_v8 }
  0x1b   : > { %v447_v30 = vld [vmem:[%s354_s12 + $0xf0] sm:$0xff]  ;;  %v450_v31 = vld [vmem:[%s354_s12 + $0xf8] sm:$0x3]  ;;  %148 = vst.msk [vmem:[%s873_s1 + $0x48] sm:$0xff] (!%p308_p4), %vm138_vm0, %v384_v9  ;;  %149 = vst.msk [vmem:[%s873_s1 + $0x50] sm:$0xff] (!%p308_p4), %vm138_vm0, %v387_v10 }
  0x1c   : > { %150 = vst.msk [vmem:[%s873_s1 + $0x58] sm:$0xff] %vm138_vm0, %v390_v11  ;;  %151 = vst.msk [vmem:[%s873_s1 + $0x60] sm:$0xff] %vm138_vm0, %v393_v12 }
  0x1d   : > { %152 = vst.msk [vmem:[%s873_s1 + $0x68] sm:$0xff] %vm138_vm0, %v396_v13  ;;  %153 = vst.msk [vmem:[%s873_s1 + $0x70] sm:$0xff] %vm138_vm0, %v399_v14 }
  0x1e   : > { %154 = vst.msk [vmem:[%s873_s1 + $0x78] sm:$0xff] %vm138_vm0, %v402_v15  ;;  %155 = vst.msk [vmem:[%s873_s1 + $0x80] sm:$0xff] %vm138_vm0, %v405_v16 }
  0x1f   : > { %156 = vst.msk [vmem:[%s873_s1 + $0x88] sm:$0xff] %vm138_vm0, %v408_v17  ;;  %157 = vst.msk [vmem:[%s873_s1 + $0x90] sm:$0xff] %vm138_vm0, %v411_v18 }
  0x20   : > { %158 = vst.msk [vmem:[%s873_s1 + $0x98] sm:$0xff] %vm138_vm0, %v414_v19  ;;  %159 = vst.msk [vmem:[%s873_s1 + $0xa0] sm:$0xff] %vm138_vm0, %v417_v20 }
  0x21   : > { %160 = vst.msk [vmem:[%s873_s1 + $0xa8] sm:$0xff] %vm138_vm0, %v420_v21  ;;  %161 = vst.msk [vmem:[%s873_s1 + $0xb0] sm:$0xff] %vm138_vm0, %v423_v22 }
  0x22   : > { %162 = vst.msk [vmem:[%s873_s1 + $0xb8] sm:$0xff] %vm138_vm0, %v426_v23  ;;  %163 = vst.msk [vmem:[%s873_s1 + $0xc0] sm:$0xff] %vm138_vm0, %v429_v24 }
  0x23   : > { %164 = vst.msk [vmem:[%s873_s1 + $0xc8] sm:$0xff] %vm138_vm0, %v432_v25  ;;  %165 = vst.msk [vmem:[%s873_s1 + $0xd0] sm:$0xff] %vm138_vm0, %v435_v26 }
  0x24   : > { %166 = vst.msk [vmem:[%s873_s1 + $0xd8] sm:$0xff] %vm138_vm0, %v438_v27  ;;  %167 = vst.msk [vmem:[%s873_s1 + $0xe0] sm:$0xff] %vm138_vm0, %v441_v28 }
  0x25   : > { %168 = vst.msk [vmem:[%s873_s1 + $0xe8] sm:$0xff] %vm138_vm0, %v444_v29  ;;  %169 = vst.msk [vmem:[%s873_s1 + $0xf0] sm:$0xff] %vm138_vm0, %v447_v30 }
  0x26   : > { %171 = vst.msk [vmem:[%s873_s1 + $0xf8] sm:$0x3] %vm170_vm1, %v450_v31 }
  0x27 PF: > { %p309_p5 = scmp.le.s32.totalorder %s345_s7, 0 }
  0x28   : > { %v176_v32 = vld [vmem:[%s873_s1] sm:$0xff] (!%p309_p5)  ;;  %vm240_vm2 = vcmask (!%p309_p5), 523264   ;;  %v177_v33 = vld [vmem:[%s873_s1 + $0x8] sm:$0xff] (!%p309_p5)  ;;  %v178_v34 = vld [vmem:[%s873_s1 + $0x10] sm:$0xff] (!%p309_p5)  ;;  %vm272_vm3 = vcmask (!%p309_p5), 517120  }
  0x29   : > { %175 = sbr.rel (%p309_p5) target bundleno = 60 (0x3c), region = 32  ;;  %v208_v35 = vmax.f32 (!%p309_p5), %v176_v32, %v357_v0  ;;  %v209_v36 = vmax.f32 (!%p309_p5), %v177_v33, %v360_v1  ;;  %v210_v37 = vmax.f32 (!%p309_p5), %v178_v34, %v363_v2  ;;  %v179_v38 = vld [vmem:[%s873_s1 + $0x18] sm:$0xff] (!%p309_p5)  ;;  %v180_v39 = vld [vmem:[%s873_s1 + $0x20] sm:$0xff] (!%p309_p5)  ;;  %v181_v40 = vld [vmem:[%s873_s1 + $0x28] sm:$0xff] (!%p309_p5) }
  0x2a   : > { %v211_v41 = vmax.f32 (!%p309_p5), %v179_v38, %v366_v3  ;;  %v212_v42 = vmax.f32 (!%p309_p5), %v180_v39, %v369_v4  ;;  %v213_v43 = vmax.f32 (!%p309_p5), %v181_v40, %v372_v5  ;;  %v182_v44 = vld [vmem:[%s873_s1 + $0x30] sm:$0xff] (!%p309_p5)  ;;  %v189_v57 = vld [vmem:[%s873_s1 + $0x68] sm:$0xff] (!%p309_p5)  ;;  %v191_v62 = vld [vmem:[%s873_s1 + $0x78] sm:$0xff] (!%p309_p5) }
  0x2b   : > { %v183_v45 = vld [vmem:[%s873_s1 + $0x38] sm:$0xff] (!%p309_p5)  ;;  %241 = vst.msk [vmem:[%s873_s1] sm:$0xff] (!%p309_p5), %vm240_vm2, %v208_v35  ;;  %242 = vst.msk [vmem:[%s873_s1 + $0x8] sm:$0xff] (!%p309_p5), %vm240_vm2, %v209_v36  ;;  %v214_v47 = vmax.f32 (!%p309_p5), %v182_v44, %v375_v6  ;;  %v190_v58 = vld [vmem:[%s873_s1 + $0x70] sm:$0xff] (!%p309_p5)  ;;  %v221_v60 = vmax.f32 (!%p309_p5), %v189_v57, %v396_v13  ;;  %v223_v1 = vmax.f32 (!%p309_p5), %v191_v62, %v402_v15 }
  0x2c   : > { %v184_v46 = vld [vmem:[%s873_s1 + $0x40] sm:$0xff] (!%p309_p5)  ;;  %243 = vst.msk [vmem:[%s873_s1 + $0x10] sm:$0xff] (!%p309_p5), %vm240_vm2, %v210_v37  ;;  %v215_v48 = vmax.f32 (!%p309_p5), %v183_v45, %v378_v7  ;;  %244 = vst.msk [vmem:[%s873_s1 + $0x18] sm:$0xff] (!%p309_p5), %vm240_vm2, %v211_v41  ;;  %v222_v61 = vmax.f32 (!%p309_p5), %v190_v58, %v399_v14  ;;  %v193_v0 = vld [vmem:[%s873_s1 + $0x88] sm:$0xff] (!%p309_p5) }
  0x2d   : > { %v216_v49 = vmax.f32 (!%p309_p5), %v184_v46, %v381_v8  ;;  %v185_v50 = vld [vmem:[%s873_s1 + $0x48] sm:$0xff] (!%p309_p5)  ;;  %v186_v51 = vld [vmem:[%s873_s1 + $0x50] sm:$0xff] (!%p309_p5)  ;;  %245 = vst.msk [vmem:[%s873_s1 + $0x20] sm:$0xff] (!%p309_p5), %vm240_vm2, %v212_v42  ;;  %246 = vst.msk [vmem:[%s873_s1 + $0x28] sm:$0xff] (!%p309_p5), %vm240_vm2, %v213_v43  ;;  %v225_v3 = vmax.f32 (!%p309_p5), %v193_v0, %v408_v17 }
  0x2e   : > { %v187_v52 = vld [vmem:[%s873_s1 + $0x58] sm:$0xff] (!%p309_p5)  ;;  %v217_v53 = vmax.f32 (!%p309_p5), %v185_v50, %v384_v9  ;;  %v218_v54 = vmax.f32 (!%p309_p5), %v186_v51, %v387_v10  ;;  %v188_v56 = vld [vmem:[%s873_s1 + $0x60] sm:$0xff] (!%p309_p5)  ;;  %247 = vst.msk [vmem:[%s873_s1 + $0x30] sm:$0xff] (!%p309_p5), %vm240_vm2, %v214_v47  ;;  %248 = vst.msk [vmem:[%s873_s1 + $0x38] sm:$0xff] (!%p309_p5), %vm240_vm2, %v215_v48 }
  0x2f   : > { %v219_v55 = vmax.f32 (!%p309_p5), %v187_v52, %v390_v11  ;;  %249 = vst.msk [vmem:[%s873_s1 + $0x40] sm:$0xff] (!%p309_p5), %vm240_vm2, %v216_v49  ;;  %v220_v59 = vmax.f32 (!%p309_p5), %v188_v56, %v393_v12  ;;  %v192_v63 = vld [vmem:[%s873_s1 + $0x80] sm:$0xff] (!%p309_p5)  ;;  %v194_v4 = vld [vmem:[%s873_s1 + $0x90] sm:$0xff] (!%p309_p5)  ;;  %v195_v5 = vld [vmem:[%s873_s1 + $0x98] sm:$0xff] (!%p309_p5) }
  0x30   : > { %250 = vst.msk [vmem:[%s873_s1 + $0x48] sm:$0xff] %vm240_vm2, %v217_v53  ;;  %251 = vst.msk [vmem:[%s873_s1 + $0x50] sm:$0xff] %vm240_vm2, %v218_v54  ;;  %v224_v2 = vmax.f32 %v192_v63, %v405_v16  ;;  %v196_v6 = vld [vmem:[%s873_s1 + $0xa0] sm:$0xff]  ;;  %v226_v7 = vmax.f32 %v194_v4, %v411_v18  ;;  %v227_v8 = vmax.f32 %v195_v5, %v414_v19  ;;  %v197_v10 = vld [vmem:[%s873_s1 + $0xa8] sm:$0xff] }
  0x31   : > { %252 = vst.msk [vmem:[%s873_s1 + $0x58] sm:$0xff] %vm240_vm2, %v219_v55  ;;  %253 = vst.msk [vmem:[%s873_s1 + $0x60] sm:$0xff] %vm240_vm2, %v220_v59  ;;  %v228_v9 = vmax.f32 %v196_v6, %v417_v20  ;;  %v198_v11 = vld [vmem:[%s873_s1 + $0xb0] sm:$0xff]  ;;  %v199_v12 = vld [vmem:[%s873_s1 + $0xb8] sm:$0xff]  ;;  %v229_v13 = vmax.f32 %v197_v10, %v420_v21 }
  0x32   : > { %254 = vst.msk [vmem:[%s873_s1 + $0x68] sm:$0xff] %vm240_vm2, %v221_v60  ;;  %255 = vst.msk [vmem:[%s873_s1 + $0x70] sm:$0xff] %vm240_vm2, %v222_v61  ;;  %v230_v14 = vmax.f32 %v198_v11, %v423_v22  ;;  %v231_v15 = vmax.f32 %v199_v12, %v426_v23  ;;  %v200_v16 = vld [vmem:[%s873_s1 + $0xc0] sm:$0xff]  ;;  %v201_v17 = vld [vmem:[%s873_s1 + $0xc8] sm:$0xff] }
  0x33   : > { %256 = vst.msk [vmem:[%s873_s1 + $0x78] sm:$0xff] %vm240_vm2, %v223_v1  ;;  %257 = vst.msk [vmem:[%s873_s1 + $0x80] sm:$0xff] %vm240_vm2, %v224_v2  ;;  %v202_v18 = vld [vmem:[%s873_s1 + $0xd0] sm:$0xff]  ;;  %v232_v19 = vmax.f32 %v200_v16, %v429_v24  ;;  %v233_v20 = vmax.f32 %v201_v17, %v432_v25  ;;  %v203_v22 = vld [vmem:[%s873_s1 + $0xd8] sm:$0xff] }
  0x34   : > { %258 = vst.msk [vmem:[%s873_s1 + $0x88] sm:$0xff] %vm240_vm2, %v225_v3  ;;  %259 = vst.msk [vmem:[%s873_s1 + $0x90] sm:$0xff] %vm240_vm2, %v226_v7  ;;  %v234_v21 = vmax.f32 %v202_v18, %v435_v26  ;;  %v204_v23 = vld [vmem:[%s873_s1 + $0xe0] sm:$0xff]  ;;  %v205_v32 = vld [vmem:[%s873_s1 + $0xe8] sm:$0xff]  ;;  %v235_v24 = vmax.f32 %v203_v22, %v438_v27 }
  0x35   : > { %260 = vst.msk [vmem:[%s873_s1 + $0x98] sm:$0xff] %vm240_vm2, %v227_v8  ;;  %261 = vst.msk [vmem:[%s873_s1 + $0xa0] sm:$0xff] %vm240_vm2, %v228_v9  ;;  %v236_v25 = vmax.f32 %v204_v23, %v441_v28  ;;  %v237_v26 = vmax.f32 %v205_v32, %v444_v29  ;;  %v206_v33 = vld [vmem:[%s873_s1 + $0xf0] sm:$0xff]  ;;  %v207_v34 = vld [vmem:[%s873_s1 + $0xf8] sm:$0x3] }
  0x36   : > { %262 = vst.msk [vmem:[%s873_s1 + $0xa8] sm:$0xff] %vm240_vm2, %v229_v13  ;;  %263 = vst.msk [vmem:[%s873_s1 + $0xb0] sm:$0xff] %vm240_vm2, %v230_v14  ;;  %v238_v27 = vmax.f32 %v206_v33, %v447_v30  ;;  %v239_v28 = vmax.f32 %v207_v34, %v450_v31 }
  0x37   : > { %264 = vst.msk [vmem:[%s873_s1 + $0xb8] sm:$0xff] %vm240_vm2, %v231_v15  ;;  %265 = vst.msk [vmem:[%s873_s1 + $0xc0] sm:$0xff] %vm240_vm2, %v232_v19 }
  0x38   : > { %266 = vst.msk [vmem:[%s873_s1 + $0xc8] sm:$0xff] %vm240_vm2, %v233_v20  ;;  %267 = vst.msk [vmem:[%s873_s1 + $0xd0] sm:$0xff] %vm240_vm2, %v234_v21 }
  0x39   : > { %268 = vst.msk [vmem:[%s873_s1 + $0xd8] sm:$0xff] %vm240_vm2, %v235_v24  ;;  %269 = vst.msk [vmem:[%s873_s1 + $0xe0] sm:$0xff] %vm240_vm2, %v236_v25 }
  0x3a   : > { %270 = vst.msk [vmem:[%s873_s1 + $0xe8] sm:$0xff] %vm240_vm2, %v237_v26  ;;  %271 = vst.msk [vmem:[%s873_s1 + $0xf0] sm:$0xff] %vm240_vm2, %v238_v27 }
  0x3b   : > { %273 = vst.msk [vmem:[%s873_s1 + $0xf8] sm:$0x3] %vm272_vm3, %v239_v28 }
  0x3c PF: > { %s11_s6 = sadd.s32 1, %s327_s6  }
  0x3d   : > { %p8_p6 = scmp.ge.s32.totalorder %s11_s6, 29  }
  0x3f   :  { %10 = sbr.rel (!%p8_p6) target bundleno = 1 (0x1), region = 58 }

// kernel: alexnet3d_forward.7
= control target key start
LH: loop header
LB: loop body
LE: loop exit
PB: predicated region body
PF: predicated region fallthrough
CT: control target
= control target key end

     0   :  { %s2968_s1 = inlined_call_operand.vmem [shape: bf16[1792,128], index: 1, kind: input, shape index: {}]   ;;  %s2969_s0 = inlined_call_operand.vmem [shape: bf16[54,1792], index: 0, kind: input, shape index: {}]   ;;  %s2970_s4 = inlined_call_operand.vmem [shape: f32[54,128], index: 4, kind: output, shape index: {}]   ;;  %s2971_s2 = inlined_call_operand.vmem [shape: f32[1,128], index: 2, kind: input, shape index: {}]   ;;  %s2972_s3 = inlined_call_operand.vmem [shape: f32[1,128], index: 3, kind: input, shape index: {}]  }
   0x1   :  { %v2225_v0 = vld [vmem:[%s2968_s1 + $0x40] sm:$0xff]   ;;  %v2229_v4 = vld [vmem:[%s2968_s1 + $0x48] sm:$0xff]   ;;  %v2233_v8 = vld [vmem:[%s2968_s1 + $0x50] sm:$0xff]  }
   0x2   :  { %v2226_v1 = vld [vmem:[%s2968_s1 + $0xc0] sm:$0xff]   ;;  %1928 = vmatprep.subr.bf16.mxu0 %v2225_v0  ;;  %v2230_v5 = vld [vmem:[%s2968_s1 + $0xc8] sm:$0xff]   ;;  %v2234_v9 = vld [vmem:[%s2968_s1 + $0xd0] sm:$0xff]  }
   0x3   :  { %v2227_v2 = vld [vmem:[%s2968_s1] sm:$0xff]   ;;  %1968 = vmatprep.subr.bf16.mxu1 %v2226_v1  ;;  %v2231_v6 = vld [vmem:[%s2968_s1 + $0x8] sm:$0xff]   ;;  %v2235_v10 = vld [vmem:[%s2968_s1 + $0x10] sm:$0xff]  }
   0x4   :  { %v2228_v3 = vld [vmem:[%s2968_s1 + $0x80] sm:$0xff]   ;;  %1929 = vmatpush3.bf16.msra.mxu0 %v2227_v2  ;;  %v2232_v7 = vld [vmem:[%s2968_s1 + $0x88] sm:$0xff]   ;;  %v2236_v11 = vld [vmem:[%s2968_s1 + $0x90] sm:$0xff]  }
   0x5   :  { %1969 = vmatpush3.bf16.msra.mxu1 %v2228_v3  ;;  %1930 = vmatprep.subr.bf16.mxu0 %v2229_v4  ;;  %v2237_v12 = vld [vmem:[%s2968_s1 + $0x58] sm:$0xff]   ;;  %v2241_v16 = vld [vmem:[%s2968_s1 + $0x60] sm:$0xff]   ;;  %v2245_v20 = vld [vmem:[%s2968_s1 + $0x68] sm:$0xff]  }
   0x6   :  { %1970 = vmatprep.subr.bf16.mxu1 %v2230_v5  ;;  %v2238_v13 = vld [vmem:[%s2968_s1 + $0xd8] sm:$0xff]   ;;  %v2242_v17 = vld [vmem:[%s2968_s1 + $0xe0] sm:$0xff]   ;;  %v2246_v21 = vld [vmem:[%s2968_s1 + $0xe8] sm:$0xff]  }
   0x7   :  { %v2239_v14 = vld [vmem:[%s2968_s1 + $0x18] sm:$0xff]   ;;  %v2243_v18 = vld [vmem:[%s2968_s1 + $0x20] sm:$0xff]   ;;  %v2247_v22 = vld [vmem:[%s2968_s1 + $0x28] sm:$0xff]  }
   0x8   :  { %1931 = vmatpush3.bf16.msra.mxu0 %v2231_v6  ;;  %v2240_v15 = vld [vmem:[%s2968_s1 + $0x98] sm:$0xff]   ;;  %v2244_v19 = vld [vmem:[%s2968_s1 + $0xa0] sm:$0xff]   ;;  %v2248_v23 = vld [vmem:[%s2968_s1 + $0xa8] sm:$0xff]  }
   0x9   :  { %1971 = vmatpush3.bf16.msra.mxu1 %v2232_v7  ;;  %1932 = vmatprep.subr.bf16.mxu0 %v2233_v8  ;;  %v2249_v24 = vld [vmem:[%s2968_s1 + $0x70] sm:$0xff]   ;;  %v2253_v28 = vld [vmem:[%s2968_s1 + $0x78] sm:$0xff]   ;;  %v2260_v34 = vld [vmem:[%s2969_s0 + $0x8] ss:$56 sps:$4 sm:$0xff]  }
   0xa   :  { %1972 = vmatprep.subr.bf16.mxu1 %v2234_v9  ;;  %v2250_v25 = vld [vmem:[%s2968_s1 + $0xf0] sm:$0xff]   ;;  %v2254_v29 = vld [vmem:[%s2968_s1 + $0xf8] sm:$0xff]   ;;  %v2262_v35 = vld [vmem:[%s2969_s0 + $0xc] ss:$56 sps:$4 sm:$0xff]  }
   0xb   :  { %v2251_v26 = vld [vmem:[%s2968_s1 + $0x30] sm:$0xff]   ;;  %v2255_v30 = vld [vmem:[%s2968_s1 + $0x38] sm:$0xff]   ;;  %v2263_v36 = vld [vmem:[%s2968_s1 + $0x140] sm:$0xff]   ;;  %1336 = vmatprep.mubr.bf16.mxu1 %v2262_v35 }
   0xc   :  { %1933 = vmatpush3.bf16.msra.mxu0 %v2235_v10  ;;  %v2252_v27 = vld [vmem:[%s2968_s1 + $0xb0] sm:$0xff]   ;;  %v2256_v31 = vld [vmem:[%s2968_s1 + $0xb8] sm:$0xff]   ;;  %v2264_v37 = vld [vmem:[%s2968_s1 + $0x1c0] sm:$0xff]  }
   0xd   :  { %1973 = vmatpush3.bf16.msra.mxu1 %v2236_v11  ;;  %1934 = vmatprep.subr.bf16.mxu0 %v2237_v12  ;;  %v2257_v32 = vld [vmem:[%s2969_s0] ss:$56 sps:$4 sm:$0xff]   ;;  %v2259_v33 = vld [vmem:[%s2969_s0 + $0x4] ss:$56 sps:$4 sm:$0xff]   ;;  %v2267_v40 = vld [vmem:[%s2968_s1 + $0x148] sm:$0xff]  }
   0xe   :  { %1974 = vmatprep.subr.bf16.mxu1 %v2238_v13  ;;  %1272 = vmatprep.mubr.bf16.mxu0 %v2259_v33  ;;  %v2265_v38 = vld [vmem:[%s2968_s1 + $0x100] sm:$0xff]   ;;  %v2268_v41 = vld [vmem:[%s2968_s1 + $0x1c8] sm:$0xff]   ;;  %v2273_v45 = vld [vmem:[%s2969_s0 + $0x7c] ss:$56 sps:$4 sm:$0xff]  }
   0xf   :  { %v2266_v39 = vld [vmem:[%s2968_s1 + $0x180] sm:$0xff]   ;;  %v2269_v42 = vld [vmem:[%s2968_s1 + $0x108] sm:$0xff]   ;;  %v2276_v47 = vld [vmem:[%s2969_s0 + $0x78] ss:$56 sps:$4 sm:$0xff]  }
  0x10   :  { %1935 = vmatpush3.bf16.msra.mxu0 %v2239_v14  ;;  %v2270_v43 = vld [vmem:[%s2968_s1 + $0x188] sm:$0xff]   ;;  %v2277_v48 = vld [vmem:[%s2968_s1 + $0x150] sm:$0xff]   ;;  %v2281_v52 = vld [vmem:[%s2968_s1 + $0x158] sm:$0xff]  }
  0x11   :  { %1975 = vmatpush3.bf16.msra.mxu1 %v2240_v15  ;;  %1936 = vmatprep.subr.bf16.mxu0 %v2241_v16  ;;  %v2271_v44 = vld [vmem:[%s2969_s0 + $0x74] ss:$56 sps:$4 sm:$0xff]   ;;  %v2275_v46 = vld [vmem:[%s2969_s0 + $0x70] ss:$56 sps:$4 sm:$0xff]   ;;  %v2282_v53 = vld [vmem:[%s2968_s1 + $0x1d8] sm:$0xff]  }
  0x12   :  { %1976 = vmatprep.subr.bf16.mxu1 %v2242_v17  ;;  %v2278_v49 = vld [vmem:[%s2968_s1 + $0x1d0] sm:$0xff]   ;;  %v2283_v54 = vld [vmem:[%s2968_s1 + $0x118] sm:$0xff]   ;;  %v2287_v57 = vld [vmem:[%s2969_s0 + $0xec] ss:$56 sps:$4 sm:$0xff]  }
  0x13   :  { %v2279_v50 = vld [vmem:[%s2968_s1 + $0x110] sm:$0xff]   ;;  %v2284_v55 = vld [vmem:[%s2968_s1 + $0x198] sm:$0xff]   ;;  %v2290_v59 = vld [vmem:[%s2969_s0 + $0xe8] ss:$56 sps:$4 sm:$0xff]  }
  0x14   :  { %1937 = vmatpush3.bf16.msra.mxu0 %v2243_v18  ;;  %v2280_v51 = vld [vmem:[%s2968_s1 + $0x190] sm:$0xff]   ;;  %v2285_v56 = vld [vmem:[%s2969_s0 + $0xe4] ss:$56 sps:$4 sm:$0xff]   ;;  %v2289_v58 = vld [vmem:[%s2969_s0 + $0xe0] ss:$56 sps:$4 sm:$0xff]  }
  0x15   :  { %1977 = vmatpush3.bf16.msra.mxu1 %v2244_v19  ;;  %1938 = vmatprep.subr.bf16.mxu0 %v2245_v20  ;;  %v2291_v60 = vld [vmem:[%s2968_s1 + $0x160] sm:$0xff]   ;;  %v2295_v0 = vld [vmem:[%s2968_s1 + $0x168] sm:$0xff]   ;;  %v78_v4 = vld [vmem:[%s2969_s0 + $0x150] sm:$0x77] }
  0x16   :  { %1978 = vmatprep.subr.bf16.mxu1 %v2246_v21  ;;  %v2292_v61 = vld [vmem:[%s2968_s1 + $0x1e0] sm:$0xff]   ;;  %v2296_v1 = vld [vmem:[%s2968_s1 + $0x1e8] sm:$0xff]   ;;  %v79_v5 = vld [vmem:[%s2969_s0 + $0x158] sm:$0x77]  ;;  %v1801_v6 = vcombine.high %v78_v4, %v78_v4  ;;  %v1800_v8 = vcombine.low %v78_v4, %v78_v4 }
  0x17   :  { %v2293_v62 = vld [vmem:[%s2968_s1 + $0x120] sm:$0xff]   ;;  %v2297_v2 = vld [vmem:[%s2968_s1 + $0x128] sm:$0xff]   ;;  %v1803_v7 = vcombine.high %v79_v5, %v79_v5  ;;  %v1802_v9 = vcombine.low %v79_v5, %v79_v5  ;;  %v2303_v10 = vld [vmem:[%s2968_s1 + $0x170] sm:$0xff]  }
  0x18   :  { %1939 = vmatpush3.bf16.msra.mxu0 %v2247_v22  ;;  %v2294_v63 = vld [vmem:[%s2968_s1 + $0x1a0] sm:$0xff]   ;;  %v2298_v3 = vld [vmem:[%s2968_s1 + $0x1a8] sm:$0xff]   ;;  %v2304_v11 = vld [vmem:[%s2968_s1 + $0x1f0] sm:$0xff]  }
  0x19   :  { %1979 = vmatpush3.bf16.msra.mxu1 %v2248_v23  ;;  %1940 = vmatprep.subr.bf16.mxu0 %v2249_v24  ;;  %v2305_v12 = vld [vmem:[%s2968_s1 + $0x130] sm:$0xff]   ;;  %v2307_v14 = vld [vmem:[%s2968_s1 + $0x178] sm:$0xff]   ;;  %v2317_v22 = vld [vmem:[%s2968_s1 + $0x240] sm:$0xff]  }
  0x1a   :  { %1980 = vmatprep.subr.bf16.mxu1 %v2250_v25  ;;  %v2306_v13 = vld [vmem:[%s2968_s1 + $0x1b0] sm:$0xff]   ;;  %v2308_v15 = vld [vmem:[%s2968_s1 + $0x1f8] sm:$0xff]   ;;  %v2318_v23 = vld [vmem:[%s2968_s1 + $0x2c0] sm:$0xff]  }
  0x1b   :  { %v2309_v16 = vld [vmem:[%s2968_s1 + $0x138] sm:$0xff]   ;;  %v2311_v18 = vld [vmem:[%s2969_s0 + $0x10] ss:$56 sps:$4 sm:$0xff]   ;;  %v2313_v19 = vld [vmem:[%s2969_s0 + $0x14] ss:$56 sps:$4 sm:$0xff]  }
  0x1c   :  { %1941 = vmatpush3.bf16.msra.mxu0 %v2251_v26  ;;  %v2310_v17 = vld [vmem:[%s2968_s1 + $0x1b8] sm:$0xff]   ;;  %v2319_v24 = vld [vmem:[%s2968_s1 + $0x200] sm:$0xff]   ;;  %v2321_v26 = vld [vmem:[%s2968_s1 + $0x248] sm:$0xff]  }
  0x1d   :  { %1981 = vmatpush3.bf16.msra.mxu1 %v2252_v27  ;;  %1942 = vmatprep.subr.bf16.mxu0 %v2253_v28  ;;  %v2314_v20 = vld [vmem:[%s2969_s0 + $0x18] ss:$56 sps:$4 sm:$0xff]   ;;  %v2316_v21 = vld [vmem:[%s2969_s0 + $0x1c] ss:$56 sps:$4 sm:$0xff]   ;;  %v2320_v25 = vld [vmem:[%s2968_s1 + $0x280] sm:$0xff]  }
  0x1e   :  { %1982 = vmatprep.subr.bf16.mxu1 %v2254_v29  ;;  %v2322_v27 = vld [vmem:[%s2968_s1 + $0x2c8] sm:$0xff]   ;;  %v2332_v35 = vld [vmem:[%s2968_s1 + $0x2d0] sm:$0xff]   ;;  %v2365_v4 = vld [vmem:[%s2969_s0 + $0x20] ss:$56 sps:$4 sm:$0xff]  }
  0x1f   :  { %v2323_v28 = vld [vmem:[%s2968_s1 + $0x208] sm:$0xff]   ;;  %v2367_v5 = vld [vmem:[%s2969_s0 + $0x24] ss:$56 sps:$4 sm:$0xff]  }
  0x20   :  { %1943 = vmatpush3.bf16.msra.mxu0 %v2255_v30  ;;  %v2324_v29 = vld [vmem:[%s2968_s1 + $0x288] sm:$0xff]   ;;  %v2325_v30 = vld [vmem:[%s2969_s0 + $0x84] ss:$56 sps:$4 sm:$0xff]  }
  0x21   :  { %1983 = vmatpush3.bf16.msra.mxu1 %v2256_v31  ;;  %2008 = vmatprep.subr.bf16.mxu0 %v2263_v36  ;;  %v2327_v31 = vld [vmem:[%s2969_s0 + $0x8c] ss:$56 sps:$4 sm:$0xff]   ;;  %v2330_v33 = vld [vmem:[%s2969_s0 + $0x88] ss:$56 sps:$4 sm:$0xff]   ;;  %v2333_v36 = vld [vmem:[%s2968_s1 + $0x210] sm:$0xff]  }
  0x22   :  { %2048 = vmatprep.subr.bf16.mxu1 %v2264_v37  ;;  %v2334_v37 = vld [vmem:[%s2968_s1 + $0x290] sm:$0xff]  }
  0x23   :  { %1273 = vmatmul.mubr.bf16.vlgmr.msra.gmra.mrb[0].mxu0 %v2257_v32  ;;  %v2329_v32 = vld [vmem:[%s2969_s0 + $0x80] ss:$56 sps:$4 sm:$0xff]  }
  0x24   :  { %1337 = vmatmul.mubr.bf16.vlgmr.msra.gmra.mrb[0].mxu1 %v2260_v34  ;;  %2009 = vmatpush3.bf16.msra.mxu0 %v2265_v38  ;;  %v2331_v34 = vld [vmem:[%s2968_s1 + $0x250] sm:$0xff]   ;;  %v2335_v38 = vld [vmem:[%s2968_s1 + $0x258] sm:$0xff]  }
  0x25   :  { %2049 = vmatpush3.bf16.msra.mxu1 %v2266_v39  ;;  %2010 = vmatprep.subr.bf16.mxu0 %v2267_v40  ;;  %v2336_v39 = vld [vmem:[%s2968_s1 + $0x2d8] sm:$0xff]  }
  0x26   :  { %2050 = vmatprep.subr.bf16.mxu1 %v2268_v41  ;;  %1280 = vmatprep.mubr.bf16.mxu0 %v2271_v44  ;;  %v2337_v40 = vld [vmem:[%s2968_s1 + $0x218] sm:$0xff]   ;;  %v2343_v44 = vld [vmem:[%s2969_s0 + $0xf0] ss:$56 sps:$4 sm:$0xff]  }
  0x27   :  { %1344 = vmatprep.mubr.bf16.mxu1 %v2273_v45  ;;  %v2338_v41 = vld [vmem:[%s2968_s1 + $0x298] sm:$0xff]  }
  0x28   :  { %2011 = vmatpush3.bf16.msra.mxu0 %v2269_v42  ;;  %v2339_v42 = vld [vmem:[%s2969_s0 + $0xf4] ss:$56 sps:$4 sm:$0xff]   ;;  %v2344_v45 = vld [vmem:[%s2969_s0 + $0xf8] ss:$56 sps:$4 sm:$0xff]  }
  0x29   :  { %2051 = vmatpush3.bf16.msra.mxu1 %v2270_v43  ;;  %2012 = vmatprep.subr.bf16.mxu0 %v2277_v48  ;;  %v2341_v43 = vld [vmem:[%s2969_s0 + $0xfc] ss:$56 sps:$4 sm:$0xff]   ;;  %v2347_v48 = vld [vmem:[%s2968_s1 + $0x220] sm:$0xff]  }
  0x2a   :  { %2052 = vmatprep.subr.bf16.mxu1 %v2278_v49  ;;  %v2348_v49 = vld [vmem:[%s2968_s1 + $0x2a0] sm:$0xff]  }
  0x2b   :  { %1281 = vmatmul.mubr.bf16.gmra.mrb[4].mxu0 %v2275_v46  ;;  %v2345_v46 = vld [vmem:[%s2968_s1 + $0x260] sm:$0xff]  }
  0x2c   :  { %1345 = vmatmul.mubr.bf16.gmra.mrb[4].mxu1 %v2276_v47  ;;  %2013 = vmatpush3.bf16.msra.mxu0 %v2279_v50  ;;  %v2346_v47 = vld [vmem:[%s2968_s1 + $0x2e0] sm:$0xff]   ;;  %v2349_v50 = vld [vmem:[%s2968_s1 + $0x268] sm:$0xff]  }
  0x2d   :  { %2053 = vmatpush3.bf16.msra.mxu1 %v2280_v51  ;;  %2014 = vmatprep.subr.bf16.mxu0 %v2281_v52  ;;  %v2350_v51 = vld [vmem:[%s2968_s1 + $0x2e8] sm:$0xff]  }
  0x2e   :  { %2054 = vmatprep.subr.bf16.mxu1 %v2282_v53  ;;  %1288 = vmatprep.mubr.bf16.mxu0 %v2285_v56  ;;  %v2351_v52 = vld [vmem:[%s2968_s1 + $0x228] sm:$0xff]  }
  0x2f   :  { %1352 = vmatprep.mubr.bf16.mxu1 %v2287_v57  ;;  %v2352_v53 = vld [vmem:[%s2968_s1 + $0x2a8] sm:$0xff]  }
  0x30   :  { %2015 = vmatpush3.bf16.msra.mxu0 %v2283_v54  ;;  %v80_v54 = vld [vmem:[%s2969_s0 + $0x160] sm:$0x77]  ;;  %v81_v56 = vld [vmem:[%s2969_s0 + $0x168] sm:$0x77] }
  0x31   :  { %2055 = vmatpush3.bf16.msra.mxu1 %v2284_v55  ;;  %2016 = vmatprep.subr.bf16.mxu0 %v2291_v60  ;;  %v1805_v55 = vcombine.high %v80_v54, %v80_v54  ;;  %v1804_v57 = vcombine.low %v80_v54, %v80_v54  ;;  %v2357_v60 = vld [vmem:[%s2968_s1 + $0x270] sm:$0xff]  }
  0x32   :  { %2056 = vmatprep.subr.bf16.mxu1 %v2292_v61  ;;  %v2358_v61 = vld [vmem:[%s2968_s1 + $0x2f0] sm:$0xff]  }
  0x33   :  { %1289 = vmatmul.mubr.bf16.gmra.mrb[8].mxu0 %v2289_v58  ;;  %v1807_v58 = vcombine.high %v81_v56, %v81_v56 }
  0x34   :  { %1353 = vmatmul.mubr.bf16.gmra.mrb[8].mxu1 %v2290_v59  ;;  %2017 = vmatpush3.bf16.msra.mxu0 %v2293_v62  ;;  %v1806_v59 = vcombine.low %v81_v56, %v81_v56  ;;  %v2359_v62 = vld [vmem:[%s2968_s1 + $0x230] sm:$0xff]  }
  0x35   :  { %2057 = vmatpush3.bf16.msra.mxu1 %v2294_v63  ;;  %2018 = vmatprep.subr.bf16.mxu0 %v2295_v0  ;;  %v2360_v63 = vld [vmem:[%s2968_s1 + $0x2b0] sm:$0xff]   ;;  %v2361_v0 = vld [vmem:[%s2968_s1 + $0x278] sm:$0xff]  }
  0x36   :  { %2058 = vmatprep.subr.bf16.mxu1 %v2296_v1  ;;  %1296 = vmatprep.mubr.bf16.mxu0 %v1801_v6  ;;  %v2362_v1 = vld [vmem:[%s2968_s1 + $0x2f8] sm:$0xff]   ;;  %v2368_v6 = vld [vmem:[%s2969_s0 + $0x28] ss:$56 sps:$4 sm:$0xff]  }
  0x37   :  { %1360 = vmatprep.mubr.bf16.mxu1 %v1803_v7  ;;  %v2370_v7 = vld [vmem:[%s2969_s0 + $0x2c] ss:$56 sps:$4 sm:$0xff]  }
  0x38   :  { %2019 = vmatpush3.bf16.msra.mxu0 %v2297_v2  ;;  %v2363_v2 = vld [vmem:[%s2968_s1 + $0x238] sm:$0xff]  }
  0x39   :  { %2059 = vmatpush3.bf16.msra.mxu1 %v2298_v3  ;;  %2020 = vmatprep.subr.bf16.mxu0 %v2303_v10  ;;  %v2364_v3 = vld [vmem:[%s2968_s1 + $0x2b8] sm:$0xff]   ;;  %v2373_v10 = vld [vmem:[%s2968_s1 + $0x348] sm:$0xff]  }
  0x3a   :  { %2060 = vmatprep.subr.bf16.mxu1 %v2304_v11  ;;  %v2374_v11 = vld [vmem:[%s2968_s1 + $0x308] sm:$0xff]  }
  0x3b   :  { %1297 = vmatmul.mubr.bf16.gmra.mrb[12].mxu0 %v1800_v8  ;;  %v2371_v8 = vld [vmem:[%s2968_s1 + $0x340] sm:$0xff]  }
  0x3c   :  { %1361 = vmatmul.mubr.bf16.gmra.mrb[12].mxu1 %v1802_v9  ;;  %2021 = vmatpush3.bf16.msra.mxu0 %v2305_v12  ;;  %v2372_v9 = vld [vmem:[%s2968_s1 + $0x300] sm:$0xff]   ;;  %v2375_v12 = vld [vmem:[%s2969_s0 + $0x94] ss:$56 sps:$4 sm:$0xff]  }
  0x3d   :  { %2061 = vmatpush3.bf16.msra.mxu1 %v2306_v13  ;;  %2022 = vmatprep.subr.bf16.mxu0 %v2307_v14  ;;  %v2377_v13 = vld [vmem:[%s2969_s0 + $0x9c] ss:$56 sps:$4 sm:$0xff]   ;;  %v2379_v14 = vld [vmem:[%s2969_s0 + $0x90] ss:$56 sps:$4 sm:$0xff]  }
  0x3e   :  { %2062 = vmatprep.subr.bf16.mxu1 %v2308_v15  ;;  %1400 = vmatprep.mubr.bf16.mxu0 %v2313_v19  ;;  %v2380_v15 = vld [vmem:[%s2969_s0 + $0x98] ss:$56 sps:$4 sm:$0xff]  }
  0x3f   :  { %1464 = vmatprep.mubr.bf16.mxu1 %v2316_v21  ;;  %v2384_v19 = vld [vmem:[%s2968_s1 + $0x318] sm:$0xff]   ;;  %v2387_v21 = vld [vmem:[%s2969_s0 + $0x10c] ss:$56 sps:$4 sm:$0xff]  }
  0x40   :  { %2023 = vmatpush3.bf16.msra.mxu0 %v2309_v16  ;;  %v2381_v16 = vld [vmem:[%s2968_s1 + $0x350] sm:$0xff]  }
  0x41   :  { %2063 = vmatpush3.bf16.msra.mxu1 %v2310_v17  ;;  %2088 = vmatprep.subr.bf16.mxu0 %v2317_v22  ;;  %v2382_v17 = vld [vmem:[%s2968_s1 + $0x310] sm:$0xff]   ;;  %v2389_v22 = vld [vmem:[%s2969_s0 + $0x100] ss:$56 sps:$4 sm:$0xff]  }
  0x42   :  { %2128 = vmatprep.subr.bf16.mxu1 %v2318_v23  ;;  %v2390_v23 = vld [vmem:[%s2969_s0 + $0x108] ss:$56 sps:$4 sm:$0xff]  }
  0x43   :  { %1401 = vmatmul.mubr.bf16.vlgmr.msra.gmra.mrb[16].mxu0 %v2311_v18  ;;  %v2383_v18 = vld [vmem:[%s2968_s1 + $0x358] sm:$0xff]  }
  0x44   :  { %1465 = vmatmul.mubr.bf16.vlgmr.msra.gmra.mrb[16].mxu1 %v2314_v20  ;;  %2089 = vmatpush3.bf16.msra.mxu0 %v2319_v24  ;;  %v2385_v20 = vld [vmem:[%s2969_s0 + $0x104] ss:$56 sps:$4 sm:$0xff]  }
  0x45   :  { %2129 = vmatpush3.bf16.msra.mxu1 %v2320_v25  ;;  %2090 = vmatprep.subr.bf16.mxu0 %v2321_v26  ;;  %v2391_v24 = vld [vmem:[%s2968_s1 + $0x360] sm:$0xff]   ;;  %v2393_v26 = vld [vmem:[%s2968_s1 + $0x368] sm:$0xff]  }
  0x46   :  { %2130 = vmatprep.subr.bf16.mxu1 %v2322_v27  ;;  %1408 = vmatprep.mubr.bf16.mxu0 %v2325_v30  ;;  %v2392_v25 = vld [vmem:[%s2968_s1 + $0x320] sm:$0xff]   ;;  %v82_v27 = vld [vmem:[%s2969_s0 + $0x170] sm:$0x77] }
  0x47   :  { %1472 = vmatprep.mubr.bf16.mxu1 %v2327_v31  ;;  %v2394_v31 = vld [vmem:[%s2968_s1 + $0x328] sm:$0xff]  }
  0x48   :  { %2091 = vmatpush3.bf16.msra.mxu0 %v2323_v28  ;;  %v83_v28 = vld [vmem:[%s2969_s0 + $0x178] sm:$0x77] }
  0x49   :  { %2131 = vmatpush3.bf16.msra.mxu1 %v2324_v29  ;;  %2092 = vmatprep.subr.bf16.mxu0 %v2331_v34  ;;  %v1809_v29 = vcombine.high %v82_v27, %v82_v27  ;;  %v1811_v30 = vcombine.high %v83_v28, %v83_v28  ;;  %v1810_v34 = vcombine.low %v83_v28, %v83_v28 }
  0x4a   :  { %2132 = vmatprep.subr.bf16.mxu1 %v2332_v35  ;;  %v2400_v35 = vld [vmem:[%s2968_s1 + $0x330] sm:$0xff]  }
  0x4b   :  { %1409 = vmatmul.mubr.bf16.gmra.mrb[20].mxu0 %v2329_v32  ;;  %v2399_v32 = vld [vmem:[%s2968_s1 + $0x370] sm:$0xff]  }
  0x4c   :  { %1473 = vmatmul.mubr.bf16.gmra.mrb[20].mxu1 %v2330_v33  ;;  %2093 = vmatpush3.bf16.msra.mxu0 %v2333_v36  ;;  %v1808_v33 = vcombine.low %v82_v27, %v82_v27  ;;  %v2405_v36 = vld [vmem:[%s2969_s0 + $0x34] ss:$56 sps:$4 sm:$0xff]  }
  0x4d   :  { %2133 = vmatpush3.bf16.msra.mxu1 %v2334_v37  ;;  %2094 = vmatprep.subr.bf16.mxu0 %v2335_v38  ;;  %v2401_v37 = vld [vmem:[%s2968_s1 + $0x378] sm:$0xff]   ;;  %v2408_v38 = vld [vmem:[%s2969_s0 + $0x114] ss:$56 sps:$4 sm:$0xff]  }
  0x4e   :  { %2134 = vmatprep.subr.bf16.mxu1 %v2336_v39  ;;  %1416 = vmatprep.mubr.bf16.mxu0 %v2339_v42  ;;  %v2402_v39 = vld [vmem:[%s2968_s1 + $0x338] sm:$0xff]   ;;  %v2406_v42 = vld [vmem:[%s2969_s0 + $0x110] ss:$56 sps:$4 sm:$0xff]  }
  0x4f   :  { %1480 = vmatprep.mubr.bf16.mxu1 %v2341_v43  ;;  %v2409_v43 = vld [vmem:[%s2969_s0 + $0xa4] ss:$56 sps:$4 sm:$0xff]  }
  0x50   :  { %2095 = vmatpush3.bf16.msra.mxu0 %v2337_v40  ;;  %v84_v40 = vld [vmem:[%s2969_s0 + $0x180] sm:$0x77] }
  0x51   :  { %2135 = vmatpush3.bf16.msra.mxu1 %v2338_v41  ;;  %2096 = vmatprep.subr.bf16.mxu0 %v2345_v46  ;;  %v2403_v41 = vld [vmem:[%s2969_s0 + $0x30] ss:$56 sps:$4 sm:$0xff]   ;;  %v1812_v46 = vcombine.low %v84_v40, %v84_v40 }
  0x52   :  { %2136 = vmatprep.subr.bf16.mxu1 %v2346_v47  ;;  %v2414_v47 = vmov 0.0  }
  0x53   :  { %1417 = vmatmul.mubr.bf16.gmra.mrb[24].mxu0 %v2343_v44  ;;  %v1813_v44 = vcombine.high %v84_v40, %v84_v40  ;;  %28 = vst [vmem:[%s2970_s4 + $0x30] sm:$0x3f] %v2414_v47 }
  0x54   :  { %1481 = vmatmul.mubr.bf16.gmra.mrb[24].mxu1 %v2344_v45  ;;  %2097 = vmatpush3.bf16.msra.mxu0 %v2347_v48  ;;  %v2412_v45 = vld [vmem:[%s2969_s0 + $0xa0] ss:$56 sps:$4 sm:$0xff]  }
  0x55   :  { %2137 = vmatpush3.bf16.msra.mxu1 %v2348_v49  ;;  %2098 = vmatprep.subr.bf16.mxu0 %v2349_v50 }
  0x56   :  { %2138 = vmatprep.subr.bf16.mxu1 %v2350_v51  ;;  %1424 = vmatprep.mubr.bf16.mxu0 %v1805_v55 }
  0x57   :  { %1488 = vmatprep.mubr.bf16.mxu1 %v1807_v58 }
  0x58   :  { %2099 = vmatpush3.bf16.msra.mxu0 %v2351_v52 }
  0x59   :  { %2139 = vmatpush3.bf16.msra.mxu1 %v2352_v53  ;;  %2100 = vmatprep.subr.bf16.mxu0 %v2357_v60 }
  0x5a   :  { %2140 = vmatprep.subr.bf16.mxu1 %v2358_v61 }
  0x5b   :  { %1425 = vmatmul.mubr.bf16.gmra.mrb[28].mxu0 %v1804_v57 }
  0x5c   :  { %1489 = vmatmul.mubr.bf16.gmra.mrb[28].mxu1 %v1806_v59  ;;  %2101 = vmatpush3.bf16.msra.mxu0 %v2359_v62 }
  0x5d   :  { %2141 = vmatpush3.bf16.msra.mxu1 %v2360_v63  ;;  %2102 = vmatprep.subr.bf16.mxu0 %v2361_v0 }
  0x5e   :  { %2142 = vmatprep.subr.bf16.mxu1 %v2362_v1  ;;  %1528 = vmatprep.mubr.bf16.mxu0 %v2367_v5 }
  0x5f   :  { %1592 = vmatprep.mubr.bf16.mxu1 %v2370_v7 }
  0x60   :  { %2103 = vmatpush3.bf16.msra.mxu0 %v2363_v2 }
  0x61   :  { %2143 = vmatpush3.bf16.msra.mxu1 %v2364_v3  ;;  %2168 = vmatprep.subr.bf16.mxu0 %v2371_v8 }
  0x62   :  { %2208 = vmatprep.subr.bf16.mxu1 %v2371_v8 }
  0x63   :  { %1529 = vmatmul.mubr.bf16.vlgmr.msra.gmra.mrb[32].mxu0 %v2365_v4 }
  0x64   :  { %1593 = vmatmul.mubr.bf16.vlgmr.msra.gmra.mrb[32].mxu1 %v2368_v6  ;;  %2169 = vmatpush3.bf16.msra.mxu0 %v2372_v9 }
  0x65   :  { %2216 = vmatpush3.bf16.msra.mxu1 %v2372_v9  ;;  %2170 = vmatprep.subr.bf16.mxu0 %v2373_v10 }
  0x66   :  { %2209 = vmatprep.subr.bf16.mxu1 %v2373_v10  ;;  %1536 = vmatprep.mubr.bf16.mxu0 %v2375_v12 }
  0x67   :  { %1600 = vmatprep.mubr.bf16.mxu1 %v2377_v13 }
  0x68   :  { %2171 = vmatpush3.bf16.msra.mxu0 %v2374_v11 }
  0x69   :  { %2217 = vmatpush3.bf16.msra.mxu1 %v2374_v11  ;;  %2172 = vmatprep.subr.bf16.mxu0 %v2381_v16 }
  0x6a   :  { %2210 = vmatprep.subr.bf16.mxu1 %v2381_v16 }
  0x6b   :  { %1537 = vmatmul.mubr.bf16.gmra.mrb[36].mxu0 %v2379_v14 }
  0x6c   :  { %1601 = vmatmul.mubr.bf16.gmra.mrb[36].mxu1 %v2380_v15  ;;  %2173 = vmatpush3.bf16.msra.mxu0 %v2382_v17 }
  0x6d   :  { %2218 = vmatpush3.bf16.msra.mxu1 %v2382_v17  ;;  %2174 = vmatprep.subr.bf16.mxu0 %v2383_v18 }
  0x6e   :  { %2211 = vmatprep.subr.bf16.mxu1 %v2383_v18  ;;  %1544 = vmatprep.mubr.bf16.mxu0 %v2385_v20 }
  0x6f   :  { %1608 = vmatprep.mubr.bf16.mxu1 %v2387_v21 }
  0x70   :  { %2175 = vmatpush3.bf16.msra.mxu0 %v2384_v19 }
  0x71   :  { %2219 = vmatpush3.bf16.msra.mxu1 %v2384_v19  ;;  %2176 = vmatprep.subr.bf16.mxu0 %v2391_v24 }
  0x72   :  { %2212 = vmatprep.subr.bf16.mxu1 %v2391_v24 }
  0x73   :  { %1545 = vmatmul.mubr.bf16.gmra.mrb[40].mxu0 %v2389_v22 }
  0x74   :  { %1609 = vmatmul.mubr.bf16.gmra.mrb[40].mxu1 %v2390_v23  ;;  %2177 = vmatpush3.bf16.msra.mxu0 %v2392_v25 }
  0x75   :  { %2220 = vmatpush3.bf16.msra.mxu1 %v2392_v25  ;;  %2178 = vmatprep.subr.bf16.mxu0 %v2393_v26 }
  0x76   :  { %2213 = vmatprep.subr.bf16.mxu1 %v2393_v26  ;;  %1552 = vmatprep.mubr.bf16.mxu0 %v1809_v29 }
  0x77   :  { %1616 = vmatprep.mubr.bf16.mxu1 %v1811_v30 }
  0x78   :  { %2179 = vmatpush3.bf16.msra.mxu0 %v2394_v31 }
  0x79   :  { %2221 = vmatpush3.bf16.msra.mxu1 %v2394_v31  ;;  %2180 = vmatprep.subr.bf16.mxu0 %v2399_v32 }
  0x7a   :  { %2214 = vmatprep.subr.bf16.mxu1 %v2399_v32 }
  0x7b   :  { %1553 = vmatmul.mubr.bf16.gmra.mrb[44].mxu0 %v1808_v33 }
  0x7c   :  { %1617 = vmatmul.mubr.bf16.gmra.mrb[44].mxu1 %v1810_v34  ;;  %1656 = vmatprep.mubr.bf16.mxu0 %v2405_v36 }
  0x7d   :  { %2181 = vmatpush3.bf16.msra.mxu0 %v2400_v35  ;;  %1672 = vmatprep.mubr.bf16.mxu1 %v2408_v38 }
  0x7e   :  { %2222 = vmatpush3.bf16.msra.mxu1 %v2400_v35  ;;  %2182 = vmatprep.subr.bf16.mxu0 %v2401_v37 }
  0x7f   :  { %2215 = vmatprep.subr.bf16.mxu1 %v2401_v37 }
  0x81   :  { %2183 = vmatpush3.bf16.msra.mxu0 %v2402_v39 }
  0x82   :  { %2223 = vmatpush3.bf16.msra.mxu1 %v2402_v39 }
  0x84   :  { %1657 = vmatmul.mubr.bf16.vlgmr.msra.gmra.mrb[48].mxu0 %v2403_v41 }
  0x85   :  { %1673 = vmatmul.mubr.bf16.vlgmr.msra.gmra.mrb[48].mxu1 %v2406_v42  ;;  %1664 = vmatprep.mubr.bf16.mxu0 %v2409_v43 }
  0x86   :  { %1680 = vmatprep.mubr.bf16.mxu1 %v1813_v44 }
  0x8c   :  { %1665 = vmatmul.mubr.bf16.gmra.mrb[52].mxu0 %v2412_v45 }
  0x8d   :  { %1681 = vmatmul.mubr.bf16.gmra.mrb[52].mxu1 %v1812_v46 }
  0xf6   :  { %v1944_v48 = vpop.f32.mrb[0].mxu0 }
  0xf7   :  { %v1984_v49 = vpop.f32.mrb[0].mxu1  ;;  %v1945_v50 = vpop.f32.mrb[1].mxu0 }
  0xf8   :  { %v1946_v51 = vadd.f32 %v1945_v50, %v1944_v48  ;;  %v1985_v52 = vpop.f32.mrb[1].mxu1  ;;  %v1947_v53 = vpop.f32.mrb[2].mxu0 }
  0xf9   :  { %v1986_v54 = vadd.f32 %v1985_v52, %v1984_v49  ;;  %v1987_v55 = vpop.f32.mrb[2].mxu1  ;;  %v1948_v56 = vpop.f32.mrb[3].mxu0 }
  0xfa   :  { %v1949_v57 = vadd.f32 %v1948_v56, %v1947_v53  ;;  %v1988_v58 = vpop.f32.mrb[3].mxu1 }
  0xfb   :  { %v1339_v59 = vadd.f32 %v1986_v54, %v1946_v51  ;;  %v1989_v60 = vadd.f32 %v1988_v58, %v1987_v55 }
  0xfd   :  { %v1342_v61 = vadd.f32 %v1989_v60, %v1949_v57 }
  0xfe   :  { %v1950_v62 = vpop.f32.mrb[4].mxu0 }
  0xff   :  { %v1990_v63 = vpop.f32.mrb[4].mxu1  ;;  %v1951_v0 = vpop.f32.mrb[5].mxu0 }
 0x100   :  { %v1952_v1 = vadd.f32 %v1951_v0, %v1950_v62  ;;  %v1991_v2 = vpop.f32.mrb[5].mxu1  ;;  %v1953_v3 = vpop.f32.mrb[6].mxu0 }
 0x101   :  { %v1992_v4 = vadd.f32 %v1991_v2, %v1990_v63  ;;  %v1993_v5 = vpop.f32.mrb[6].mxu1  ;;  %v1954_v6 = vpop.f32.mrb[7].mxu0 }
 0x102   :  { %v1955_v7 = vadd.f32 %v1954_v6, %v1953_v3  ;;  %v1994_v8 = vpop.f32.mrb[7].mxu1 }
 0x103   :  { %v1347_v9 = vadd.f32 %v1992_v4, %v1952_v1  ;;  %v1995_v10 = vadd.f32 %v1994_v8, %v1993_v5 }
 0x105   :  { %v1350_v11 = vadd.f32 %v1995_v10, %v1955_v7 }
 0x106   :  { %v1956_v12 = vpop.f32.mrb[8].mxu0 }
 0x107   :  { %v1996_v13 = vpop.f32.mrb[8].mxu1  ;;  %v1957_v14 = vpop.f32.mrb[9].mxu0 }
 0x108   :  { %v1958_v15 = vadd.f32 %v1957_v14, %v1956_v12  ;;  %v1997_v16 = vpop.f32.mrb[9].mxu1  ;;  %v1959_v17 = vpop.f32.mrb[10].mxu0 }
 0x109   :  { %v1998_v18 = vadd.f32 %v1997_v16, %v1996_v13  ;;  %v1999_v19 = vpop.f32.mrb[10].mxu1  ;;  %v1960_v20 = vpop.f32.mrb[11].mxu0 }
 0x10a   :  { %v1961_v21 = vadd.f32 %v1960_v20, %v1959_v17  ;;  %v2000_v22 = vpop.f32.mrb[11].mxu1 }
 0x10b   :  { %v1355_v23 = vadd.f32 %v1998_v18, %v1958_v15  ;;  %v2001_v24 = vadd.f32 %v2000_v22, %v1999_v19 }
 0x10d   :  { %v1358_v25 = vadd.f32 %v2001_v24, %v1961_v21 }
 0x10e   :  { %v1962_v26 = vpop.f32.mrb[12].mxu0 }
 0x10f   :  { %v2002_v27 = vpop.f32.mrb[12].mxu1  ;;  %v1963_v28 = vpop.f32.mrb[13].mxu0 }
 0x110   :  { %v2003_v29 = vpop.f32.mrb[13].mxu1  ;;  %v1964_v30 = vadd.f32 %v1963_v28, %v1962_v26  ;;  %v1965_v32 = vpop.f32.mrb[14].mxu0 }
 0x111   :  { %v2004_v31 = vadd.f32 %v2003_v29, %v2002_v27  ;;  %v2005_v33 = vpop.f32.mrb[14].mxu1  ;;  %v1966_v34 = vpop.f32.mrb[15].mxu0 }
 0x112   :  { %v2006_v35 = vpop.f32.mrb[15].mxu1 }
 0x113   :  { %v1363_v36 = vadd.f32 %v2004_v31, %v1964_v30 }
 0x116   :  { %v2024_v37 = vpop.f32.mrb[16].mxu0 }
 0x117   :  { %v2064_v38 = vpop.f32.mrb[16].mxu1  ;;  %v2025_v39 = vpop.f32.mrb[17].mxu0 }
 0x118   :  { %v2026_v40 = vadd.f32 %v2025_v39, %v2024_v37  ;;  %v2065_v41 = vpop.f32.mrb[17].mxu1  ;;  %v2027_v42 = vpop.f32.mrb[18].mxu0 }
 0x119   :  { %v2066_v43 = vadd.f32 %v2065_v41, %v2064_v38  ;;  %v2067_v44 = vpop.f32.mrb[18].mxu1  ;;  %v2028_v45 = vpop.f32.mrb[19].mxu0 }
 0x11a   :  { %v1403_v46 = vadd.f32 %v2026_v40, %v1339_v59  ;;  %v2029_v47 = vadd.f32 %v2028_v45, %v2027_v42  ;;  %v2068_v48 = vpop.f32.mrb[19].mxu1 }
 0x11b   :  { %v2069_v49 = vadd.f32 %v2068_v48, %v2067_v44 }
 0x11c   :  { %v1467_v50 = vadd.f32 %v2066_v43, %v1403_v46  ;;  %v1406_v51 = vadd.f32 %v2029_v47, %v1342_v61 }
 0x11e   :  { %v1470_v52 = vadd.f32 %v2069_v49, %v1406_v51  ;;  %v2030_v53 = vpop.f32.mrb[20].mxu0 }
 0x11f   :  { %v2070_v54 = vpop.f32.mrb[20].mxu1  ;;  %v2031_v55 = vpop.f32.mrb[21].mxu0 }
 0x120   :  { %v2032_v56 = vadd.f32 %v2031_v55, %v2030_v53  ;;  %v2071_v57 = vpop.f32.mrb[21].mxu1  ;;  %v2033_v58 = vpop.f32.mrb[22].mxu0 }
 0x121   :  { %v2072_v60 = vadd.f32 %v2071_v57, %v2070_v54  ;;  %v2073_v62 = vpop.f32.mrb[22].mxu1  ;;  %v2034_v63 = vpop.f32.mrb[23].mxu0 }
 0x122   :  { %v1411_v0 = vadd.f32 %v2032_v56, %v1347_v9  ;;  %v2035_v1 = vadd.f32 %v2034_v63, %v2033_v58  ;;  %v2074_v2 = vpop.f32.mrb[23].mxu1 }
 0x123   :  { %v2075_v3 = vadd.f32 %v2074_v2, %v2073_v62 }
 0x124   :  { %v1475_v59 = vadd.f32 %v2072_v60, %v1411_v0  ;;  %v1414_v4 = vadd.f32 %v2035_v1, %v1350_v11 }
 0x126   :  { %v1478_v5 = vadd.f32 %v2075_v3, %v1414_v4  ;;  %v2036_v6 = vpop.f32.mrb[24].mxu0 }
 0x127   :  { %v2076_v7 = vpop.f32.mrb[24].mxu1  ;;  %v2037_v61 = vpop.f32.mrb[25].mxu0 }
 0x128   :  { %v2077_v8 = vpop.f32.mrb[25].mxu1  ;;  %v2038_v10 = vadd.f32 %v2037_v61, %v2036_v6  ;;  %v2039_v13 = vpop.f32.mrb[26].mxu0 }
 0x129   :  { %v2078_v12 = vadd.f32 %v2077_v8, %v2076_v7  ;;  %v2079_v14 = vpop.f32.mrb[26].mxu1  ;;  %v2040_v15 = vpop.f32.mrb[27].mxu0 }
 0x12a   :  { %v2080_v16 = vpop.f32.mrb[27].mxu1  ;;  %v1419_v17 = vadd.f32 %v2038_v10, %v1355_v23  ;;  %v2041_v18 = vadd.f32 %v2040_v15, %v2039_v13 }
 0x12b   :  { %v2081_v19 = vadd.f32 %v2080_v16, %v2079_v14 }
 0x12c   :  { %v1483_v9 = vadd.f32 %v2078_v12, %v1419_v17  ;;  %v1422_v20 = vadd.f32 %v2041_v18, %v1358_v25 }
 0x12e   :  { %v1486_v21 = vadd.f32 %v2081_v19, %v1422_v20  ;;  %v2042_v22 = vpop.f32.mrb[28].mxu0 }
 0x12f   :  { %v2082_v24 = vpop.f32.mrb[28].mxu1  ;;  %v2043_v11 = vpop.f32.mrb[29].mxu0 }
 0x130   :  { %v2044_v26 = vadd.f32 %v2043_v11, %v2042_v22  ;;  %v2083_v27 = vpop.f32.mrb[29].mxu1  ;;  %v2045_v28 = vpop.f32.mrb[30].mxu0 }
 0x131   :  { %v2084_v29 = vadd.f32 %v2083_v27, %v2082_v24  ;;  %v2085_v30 = vpop.f32.mrb[30].mxu1  ;;  %v2046_v31 = vpop.f32.mrb[31].mxu0 }
 0x132   :  { %v1427_v32 = vadd.f32 %v2044_v26, %v1363_v36  ;;  %v2086_v33 = vpop.f32.mrb[31].mxu1 }
 0x134   :  { %v1491_v34 = vadd.f32 %v2084_v29, %v1427_v32 }
 0x136   :  { %v2104_v35 = vpop.f32.mrb[32].mxu0 }
 0x137   :  { %v2144_v37 = vpop.f32.mrb[32].mxu1  ;;  %v2105_v23 = vpop.f32.mrb[33].mxu0 }
 0x138   :  { %v2106_v38 = vadd.f32 %v2105_v23, %v2104_v35  ;;  %v2145_v39 = vpop.f32.mrb[33].mxu1  ;;  %v2107_v40 = vpop.f32.mrb[34].mxu0 }
 0x139   :  { %v2146_v25 = vadd.f32 %v2145_v39, %v2144_v37  ;;  %v2147_v41 = vpop.f32.mrb[34].mxu1  ;;  %v2108_v42 = vpop.f32.mrb[35].mxu0 }
 0x13a   :  { %v1531_v43 = vadd.f32 %v2106_v38, %v1467_v50  ;;  %v2109_v44 = vadd.f32 %v2108_v42, %v2107_v40  ;;  %v2148_v45 = vpop.f32.mrb[35].mxu1 }
 0x13b   :  { %v2149_v46 = vadd.f32 %v2148_v45, %v2147_v41 }
 0x13c   :  { %v1595_v47 = vadd.f32 %v2146_v25, %v1531_v43  ;;  %v1534_v48 = vadd.f32 %v2109_v44, %v1470_v52  ;;  %v1926_v43 = vld [vmem:[%s2971_s2] ss:$0 sm:$0xff] }
 0x13e   :  { %v1598_v49 = vadd.f32 %v2149_v46, %v1534_v48  ;;  %v2110_v51 = vpop.f32.mrb[36].mxu0  ;;  %v1927_v46 = vld [vmem:[%s2972_s3] ss:$0 sm:$0xff] }
 0x13f   :  { %v2150_v36 = vpop.f32.mrb[36].mxu1  ;;  %v2111_v53 = vpop.f32.mrb[37].mxu0 }
 0x140   :  { %v2112_v54 = vadd.f32 %v2111_v53, %v2110_v51  ;;  %v2151_v55 = vpop.f32.mrb[37].mxu1  ;;  %v2113_v56 = vpop.f32.mrb[38].mxu0 }
 0x141   :  { %v2152_v57 = vadd.f32 %v2151_v55, %v2150_v36  ;;  %v2153_v58 = vpop.f32.mrb[38].mxu1  ;;  %v2114_v60 = vpop.f32.mrb[39].mxu0 }
 0x142   :  { %v1539_v62 = vadd.f32 %v2112_v54, %v1475_v59  ;;  %v2115_v63 = vadd.f32 %v2114_v60, %v2113_v56  ;;  %v2154_v0 = vpop.f32.mrb[39].mxu1 }
 0x143   :  { %v2155_v1 = vadd.f32 %v2154_v0, %v2153_v58 }
 0x144   :  { %v2926_v50 = vadd.f32 %v2152_v57, %v1539_v62  ;;  %v1542_v2 = vadd.f32 %v2115_v63, %v1478_v5 }
 0x146   :  { %v2928_v3 = vadd.f32 %v2155_v1, %v1542_v2  ;;  %v2116_v52 = vpop.f32.mrb[40].mxu0 }
 0x147   :  { %v2156_v4 = vpop.f32.mrb[40].mxu1  ;;  %v2117_v6 = vpop.f32.mrb[41].mxu0 }
 0x148   :  { %v2118_v7 = vadd.f32 %v2117_v6, %v2116_v52  ;;  %v2157_v61 = vpop.f32.mrb[41].mxu1  ;;  %v2119_v8 = vpop.f32.mrb[42].mxu0  ;;  %v35_v6 = vld [vmem:[%s2970_s4 + $0x30] sm:$0x3f] }
 0x149   :  { %v2158_v10 = vadd.f32 %v2157_v61, %v2156_v4  ;;  %v2159_v12 = vpop.f32.mrb[42].mxu1  ;;  %v2120_v13 = vpop.f32.mrb[43].mxu0 }
 0x14a   :  { %v1547_v14 = vadd.f32 %v2118_v7, %v1483_v9  ;;  %v2121_v15 = vadd.f32 %v2120_v13, %v2119_v8  ;;  %v2160_v59 = vpop.f32.mrb[43].mxu1 }
 0x14b   :  { %v2161_v16 = vadd.f32 %v2160_v59, %v2159_v12 }
 0x14c   :  { %v1611_v17 = vadd.f32 %v2158_v10, %v1547_v14  ;;  %v1550_v18 = vadd.f32 %v2121_v15, %v1486_v21 }
 0x14e   :  { %v1614_v19 = vadd.f32 %v2161_v16, %v1550_v18  ;;  %v2122_v20 = vpop.f32.mrb[44].mxu0 }
 0x14f   :  { %v2162_v5 = vpop.f32.mrb[44].mxu1  ;;  %v2123_v22 = vpop.f32.mrb[45].mxu0 }
 0x150   :  { %v2124_v24 = vadd.f32 %v2123_v22, %v2122_v20  ;;  %v2163_v11 = vpop.f32.mrb[45].mxu1  ;;  %v2125_v26 = vpop.f32.mrb[46].mxu0 }
 0x151   :  { %v2164_v27 = vadd.f32 %v2163_v11, %v2162_v5  ;;  %v2165_v28 = vpop.f32.mrb[46].mxu1  ;;  %v2126_v29 = vpop.f32.mrb[47].mxu0 }
 0x152   :  { %v1555_v30 = vadd.f32 %v2124_v24, %v1491_v34  ;;  %v2166_v31 = vpop.f32.mrb[47].mxu1 }
 0x154   :  { %v1619_v32 = vadd.f32 %v2164_v27, %v1555_v30 }
 0x157   :  { %v2184_v33 = vpop.f32.mrb[48].mxu0 }
 0x158   :  { %v2196_v9 = vpop.f32.mrb[48].mxu1  ;;  %v2185_v35 = vpop.f32.mrb[49].mxu0 }
 0x159   :  { %v2186_v37 = vadd.f32 %v2185_v35, %v2184_v33  ;;  %v2197_v23 = vpop.f32.mrb[49].mxu1  ;;  %v2187_v38 = vpop.f32.mrb[50].mxu0 }
 0x15a   :  { %v2198_v21 = vadd.f32 %v2197_v23, %v2196_v9  ;;  %v2199_v39 = vpop.f32.mrb[50].mxu1  ;;  %v2188_v40 = vpop.f32.mrb[51].mxu0 }
 0x15b   :  { %v1659_v25 = vadd.f32 %v2186_v37, %v1595_v47  ;;  %v2189_v41 = vadd.f32 %v2188_v40, %v2187_v38  ;;  %v2200_v42 = vpop.f32.mrb[51].mxu1 }
 0x15c   :  { %v1675_v44 = vadd.f32 %v2198_v21, %v1611_v17  ;;  %v2201_v34 = vadd.f32 %v2200_v42, %v2199_v39 }
 0x15d   :  { %v1662_v45 = vadd.f32 %v2189_v41, %v1598_v49  ;;  %v1719_v51 = vmul.f32 %v1926_v43, %v1659_v25 }
 0x15e   :  { %v1678_v48 = vadd.f32 %v2201_v34, %v1614_v19  ;;  %v1723_v53 = vmul.f32 %v1926_v43, %v1675_v44 }
 0x15f   :  { %v2190_v36 = vpop.f32.mrb[52].mxu0  ;;  %v1733_v47 = vadd.f32 %v1927_v46, %v1719_v51  ;;  %v1720_v56 = vmul.f32 %v1926_v43, %v1662_v45 }
 0x160   :  { %v2202_v54 = vpop.f32.mrb[52].mxu1  ;;  %v2191_v55 = vpop.f32.mrb[53].mxu0  ;;  %v1737_v62 = vadd.f32 %v1927_v46, %v1723_v53  ;;  %v1724_v63 = vmul.f32 %v1926_v43, %v1678_v48 }
 0x161   :  { %v2192_v57 = vadd.f32 %v2191_v55, %v2190_v36  ;;  %v2203_v58 = vpop.f32.mrb[53].mxu1  ;;  %v2193_v60 = vpop.f32.mrb[54].mxu0  ;;  %v1740_v2 = vmax.f32 %v1733_v47, 0.0  ;;  %v1734_v52 = vadd.f32 %v1927_v46, %v1720_v56 }
 0x162   :  { %v2204_v0 = vadd.f32 %v2203_v58, %v2202_v54  ;;  %v2205_v1 = vpop.f32.mrb[54].mxu1  ;;  %v2194_v49 = vpop.f32.mrb[55].mxu0  ;;  %v1744_v8 = vmax.f32 %v1737_v62, 0.0  ;;  %v1738_v10 = vadd.f32 %v1927_v46, %v1724_v63 }
 0x163   :  { %v1667_v4 = vadd.f32 %v2192_v57, %v2926_v50  ;;  %v2195_v7 = vadd.f32 %v2194_v49, %v2193_v60  ;;  %v2206_v61 = vpop.f32.mrb[55].mxu1  ;;  %1747 = vst [vmem:[%s2970_s4] sm:$0xff] %v1740_v2  ;;  %v1741_v13 = vmax.f32 %v1734_v52, 0.0 }
 0x164   :  { %v1683_v12 = vadd.f32 %v2204_v0, %v1619_v32  ;;  %1751 = vst [vmem:[%s2970_s4 + $0x20] sm:$0xff] %v1744_v8  ;;  %v1745_v50 = vmax.f32 %v1738_v10, 0.0 }
 0x165   :  { %v1670_v14 = vadd.f32 %v2195_v7, %v2928_v3  ;;  %1748 = vst [vmem:[%s2970_s4 + $0x8] sm:$0xff] %v1741_v13  ;;  %v1721_v59 = vmul.f32 %v1926_v43, %v1667_v4 }
 0x166   :  { %v1694_v15 = vadd.f32 %v1683_v12, %v35_v6  ;;  %1752 = vst [vmem:[%s2970_s4 + $0x28] sm:$0xff] %v1745_v50 }
 0x167   :  { %v1735_v3 = vadd.f32 %v1927_v46, %v1721_v59  ;;  %v1722_v16 = vmul.f32 %v1926_v43, %v1670_v14 }
 0x168   :  { %1701 = vst [vmem:[%s2970_s4 + $0x30] sm:$0x3f] %v1694_v15 }
 0x169   :  { %v1742_v17 = vmax.f32 %v1735_v3, 0.0  ;;  %v1736_v18 = vadd.f32 %v1927_v46, %v1722_v16 }
 0x16b   :  { %1749 = vst [vmem:[%s2970_s4 + $0x10] sm:$0xff] %v1742_v17  ;;  %v1743_v19 = vmax.f32 %v1736_v18, 0.0 }
 0x16d   :  { %1750 = vst [vmem:[%s2970_s4 + $0x18] sm:$0xff] %v1743_v19 }
 0x16f   :  { %v1711_v20 = vld [vmem:[%s2970_s4 + $0x30] sm:$0x3f] }
 0x170   :  { %v1725_v5 = vmul.f32 %v1926_v43, %v1711_v20 }
 0x172   :  { %v1739_v22 = vadd.f32 %v1927_v46, %v1725_v5 }
 0x174   :  { %v1746_v24 = vmax.f32 %v1739_v22, 0.0 }
 0x176   :  { %1753 = vst [vmem:[%s2970_s4 + $0x30] sm:$0x3f] %v1746_v24 }

// kernel: alexnet3d_forward.8
= control target key start
LH: loop header
LB: loop body
LE: loop exit
PB: predicated region body
PF: predicated region fallthrough
CT: control target
= control target key end

     0   :  { %s161_s6 = smov 0   ;;  %s187_s0 = inlined_call_operand.vmem [shape: f32[27,2,128], index: 0, kind: input, shape index: {}]   ;;  %s188_s1 = inlined_call_operand.vmem [shape: f32[2,128], index: 1, kind: output, shape index: {}]  }
   0x1 LB: > { %s140_s7 = sadd.s32 4294967295, %s163_s6   ;;  %p143_p0 = scmp.ge.s32.totalorder %s163_s6, 1  ;;  %s163_s6 = sphi %s161_s6, %s11_s6  }
   0x2   : > { %p81_p1 = scmp.lt.s32.totalorder %s163_s6, 28 }
   0x4   : > { %p82_p2 = pnand %p143_p0, %p81_p1 }
   0x5   : > { %p95_p3 = scmp.lt.s32.totalorder (!%p82_p2), %s140_s7, 26  ;;  %p145_p4 = scmp.ne.s32.totalorder (!%p82_p2), %s140_s7, 0 }
   0x6   : > { %85 = sbr.rel (%p82_p2) target bundleno = 30 (0x1e), region = 24 }
   0xd   : > { %s96_s8 = scalar_select %p95_p3, %s140_s7, 26 }
   0xe   : > { %103 = sbr.rel (%p145_p4) target bundleno = 21 (0x15), region = 28 }
   0xf   : > { %s144_s9 = sshll.u32 %s96_s8, 1 }
  0x10   : > { %s98_s12 = scalar_lea.vmem %s187_s0, %s144_s9 }
  0x11   : > { %v99_v0 = vld [vmem:[%s98_s12] sm:$0x3] }
  0x12   : > { %104 = vst [vmem:[%s188_s1] sm:$0x3] (!%p145_p4), %v99_v0 }
  0x15 PF: > { %p146_p5 = scmp.le.s32.totalorder %s140_s7, 0 }
  0x17   : > { %108 = sbr.rel (%p146_p5) target bundleno = 30 (0x1e), region = 32 }
  0x19   : > { %v109_v1 = vld [vmem:[%s188_s1] sm:$0x3] (!%p146_p5) }
  0x1a   : > { %v110_v2 = vmax.f32 (!%p146_p5), %v109_v1, %v99_v0 }
  0x1c   : > { %111 = vst [vmem:[%s188_s1] sm:$0x3] (!%p146_p5), %v110_v2 }
  0x1e PF: > { %s11_s6 = sadd.s32 1, %s163_s6  }
  0x1f   : > { %p8_p6 = scmp.ge.s32.totalorder %s11_s6, 29  }
  0x21   :  { %10 = sbr.rel (!%p8_p6) target bundleno = 1 (0x1), region = 58 }

// kernel: alexnet3d_forward.9
= control target key start
LH: loop header
LB: loop body
LE: loop exit
PB: predicated region body
PF: predicated region fallthrough
CT: control target
= control target key end

     0   :  { %s2645_s0 = inlined_call_operand.vmem [shape: bf16[2,128], index: 0, kind: input, shape index: {}]   ;;  %s2646_s1 = inlined_call_operand.vmem [shape: bf16[128,192], index: 1, kind: input, shape index: {}]   ;;  %s2647_s2 = inlined_call_operand.vmem [shape: f32[1,192], index: 2, kind: input, shape index: {}]   ;;  %s2648_s3 = inlined_call_operand.vmem [shape: f32[1,192], index: 3, kind: input, shape index: {}]   ;;  %s2649_s4 = inlined_call_operand.vmem [shape: bf16[192,384], index: 4, kind: input, shape index: {}]   ;;  %s2650_s5 = inlined_call_operand.vmem [shape: f32[1,384], index: 5, kind: input, shape index: {}]   ;;  %s2651_s6 = inlined_call_operand.vmem [shape: f32[1,384], index: 6, kind: input, shape index: {}]   ;;  %s2652_s7 = inlined_call_operand.vmem [shape: bf16[384,256], index: 7, kind: input, shape index: {}]   ;;  %s2653_s8 = inlined_call_operand.vmem [shape: f32[1,256], index: 8, kind: input, shape index: {}]   ;;  %s2654_s9 = inlined_call_operand.vmem [shape: f32[1,256], index: 9, kind: input, shape index: {}]   ;;  %s2655_s10 = inlined_call_operand.vmem [shape: bf16[256,256], index: 10, kind: input, shape index: {}]   ;;  %s2656_s11 = inlined_call_operand.vmem [shape: f32[1,256], index: 11, kind: input, shape index: {}]   ;;  %s2657_s12 = inlined_call_operand.vmem [shape: f32[1,256], index: 12, kind: input, shape index: {}]   ;;  %s2658_s13 = inlined_call_operand.vmem [shape: bf16[256,64], index: 13, kind: input, shape index: {}]   ;;  %s2659_s14 = inlined_call_operand.vmem [shape: f32[1,64], index: 14, kind: input, shape index: {}]   ;;  %s2660_s15 = inlined_call_operand.vmem [shape: bf16[64,3], index: 15, kind: input, shape index: {}]   ;;  %s2661_s16 = inlined_call_operand.vmem [shape: f32[1,3], index: 16, kind: input, shape index: {}]   ;;  %s2662_s17 = inlined_call_operand.vmem [shape: f32[2,256], index: 17, kind: output, shape index: {0}]   ;;  %s2663_s18 = inlined_call_operand.hbm [shape: f32[2,3], index: 18, kind: output, shape index: {1}]  }
   0x1   :  { %2665 = sst [smem:[#allocation5_spill]] %s2645_s0 }
   0x2   :  { %2666 = sst [smem:[#allocation6_spill]] %s2646_s1 }
   0x3   :  { %2667 = sst [smem:[#allocation7_spill]] %s2647_s2 }
   0x4   :  { %s2668_s29 = sld [smem:[#allocation6_spill]]  ;;  %v2000_v2 = vmov 0   ;;  %v1788_v10 = vld [vmem:[%s2649_s4 + $0x4] ss:$12 sps:$4 sm:$0xff]   ;;  %v1790_v11 = vld [vmem:[%s2649_s4] ss:$12 sps:$4 sm:$0xff]  }
   0x5   :  { %189 = vmatprep.mubr.bf16.mxu0 %v2000_v2  ;;  %474 = vmatprep.subr.bf16.mxu1 %v1788_v10  ;;  %v1792_v12 = vld [vmem:[%s2649_s4 + $0x1c] ss:$12 sps:$4 sm:$0xff]   ;;  %v1794_v13 = vld [vmem:[%s2649_s4 + $0x18] ss:$12 sps:$4 sm:$0xff]   ;;  %v1796_v16 = vld [vmem:[%s2649_s4 + $0x34] ss:$12 sps:$4 sm:$0xff]  }
   0x6   :  { %475 = vmatpush1.bf16.msra.mxu1 %v1790_v11  ;;  %v1798_v18 = vld [vmem:[%s2649_s4 + $0x30] ss:$12 sps:$4 sm:$0xff]   ;;  %v1800_v19 = vld [vmem:[%s2649_s4 + $0x4c] ss:$12 sps:$4 sm:$0xff]   ;;  %v1802_v21 = vld [vmem:[%s2649_s4 + $0x48] ss:$12 sps:$4 sm:$0xff]  }
   0x7   :  { %476 = vmatprep.subr.bf16.mxu1 %v1792_v12  ;;  %v1804_v23 = vld [vmem:[%s2649_s4 + $0x64] ss:$12 sps:$4 sm:$0xff]   ;;  %v1806_v26 = vld [vmem:[%s2649_s4 + $0x60] ss:$12 sps:$4 sm:$0xff]   ;;  %v1808_v27 = vld [vmem:[%s2649_s4 + $0x7c] ss:$12 sps:$4 sm:$0xff]  }
   0x8   :  { %s2669_s27 = sld [smem:[#allocation5_spill]]  ;;  %v1791_v29 = vld [vmem:[%s2649_s4 + $0x8] ss:$12 sps:$4 sm:$0xff]   ;;  %v1810_v30 = vld [vmem:[%s2649_s4 + $0x78] ss:$12 sps:$4 sm:$0xff]  }
   0x9   :  { %v1812_v31 = vld [vmem:[%s2649_s4 + $0x94] ss:$12 sps:$4 sm:$0xff]   ;;  %v1814_v32 = vld [vmem:[%s2649_s4 + $0x90] ss:$12 sps:$4 sm:$0xff]   ;;  %v1816_v34 = vld [vmem:[%s2649_s4 + $0xac] ss:$12 sps:$4 sm:$0xff]  }
   0xa   :  { %v1764_v0 = vld [vmem:[%s2668_s29 + $0x4] ss:$8 sps:$4 sm:$0xff]   ;;  %v1766_v1 = vld [vmem:[%s2668_s29] ss:$8 sps:$4 sm:$0xff]   ;;  %v1767_v3 = vld [vmem:[%s2668_s29 + $0x14] ss:$8 sps:$4 sm:$0xff]   ;;  %477 = vmatpush1.bf16.msra.mxu1 %v1794_v13 }
   0xb   :  { %157 = vmatprep.subr.bf16.mxu0 %v1764_v0  ;;  %v1769_v4 = vld [vmem:[%s2668_s29 + $0x10] ss:$8 sps:$4 sm:$0xff]   ;;  %v1770_v5 = vld [vmem:[%s2668_s29 + $0x24] ss:$8 sps:$4 sm:$0xff]   ;;  %v1772_v6 = vld [vmem:[%s2668_s29 + $0x20] ss:$8 sps:$4 sm:$0xff]   ;;  %478 = vmatprep.subr.bf16.mxu1 %v1796_v16 }
   0xc   :  { %158 = vmatpush1.bf16.msra.mxu0 %v1766_v1  ;;  %v1773_v7 = vld [vmem:[%s2668_s29 + $0x34] ss:$8 sps:$4 sm:$0xff]   ;;  %v1775_v8 = vld [vmem:[%s2668_s29 + $0x30] ss:$8 sps:$4 sm:$0xff]   ;;  %v1776_v9 = vld [vmem:[%s2668_s29 + $0x44] ss:$8 sps:$4 sm:$0xff]  }
   0xd   :  { %159 = vmatprep.subr.bf16.mxu0 %v1767_v3  ;;  %v1778_v14 = vld [vmem:[%s2668_s29 + $0x40] ss:$8 sps:$4 sm:$0xff]   ;;  %v1779_v15 = vld [vmem:[%s2668_s29 + $0x54] ss:$8 sps:$4 sm:$0xff]   ;;  %v1781_v17 = vld [vmem:[%s2668_s29 + $0x50] ss:$8 sps:$4 sm:$0xff]  }
   0xe   :  { %v1782_v20 = vld [vmem:[%s2668_s29 + $0x64] ss:$8 sps:$4 sm:$0xff]   ;;  %479 = vmatpush1.bf16.msra.mxu1 %v1798_v18  ;;  %v1784_v22 = vld [vmem:[%s2668_s29 + $0x60] ss:$8 sps:$4 sm:$0xff]   ;;  %v1785_v24 = vld [vmem:[%s2668_s29 + $0x74] ss:$8 sps:$4 sm:$0xff]  }
   0xf   :  { %480 = vmatprep.subr.bf16.mxu1 %v1800_v19  ;;  %v1787_v25 = vld [vmem:[%s2668_s29 + $0x70] ss:$8 sps:$4 sm:$0xff]   ;;  %v60_v28 = vld [vmem:[%s2669_s27] sm:$0x1]  ;;  %v1818_v35 = vld [vmem:[%s2649_s4 + $0xa8] ss:$12 sps:$4 sm:$0xff]  }
  0x10   :  { %160 = vmatpush1.bf16.msra.mxu0 %v1769_v4  ;;  %v1795_v33 = vld [vmem:[%s2649_s4 + $0x20] ss:$12 sps:$4 sm:$0xff]   ;;  %v1799_v36 = vld [vmem:[%s2649_s4 + $0x38] ss:$12 sps:$4 sm:$0xff]   ;;  %v1803_v39 = vld [vmem:[%s2649_s4 + $0x50] ss:$12 sps:$4 sm:$0xff]  }
  0x11   :  { %161 = vmatprep.subr.bf16.mxu0 %v1770_v5  ;;  %v1820_v37 = vld [vmem:[%s2649_s4 + $0xc4] ss:$12 sps:$4 sm:$0xff]   ;;  %v1822_v38 = vld [vmem:[%s2649_s4 + $0xc0] ss:$12 sps:$4 sm:$0xff]   ;;  %v1824_v40 = vld [vmem:[%s2649_s4 + $0xdc] ss:$12 sps:$4 sm:$0xff]  }
  0x12   :  { %481 = vmatpush1.bf16.msra.mxu1 %v1802_v21  ;;  %v1807_v41 = vld [vmem:[%s2649_s4 + $0x68] ss:$12 sps:$4 sm:$0xff]   ;;  %v1811_v42 = vld [vmem:[%s2649_s4 + $0x80] ss:$12 sps:$4 sm:$0xff]   ;;  %v1815_v43 = vld [vmem:[%s2649_s4 + $0x98] ss:$12 sps:$4 sm:$0xff]  }
  0x13   :  { %482 = vmatprep.subr.bf16.mxu1 %v1804_v23  ;;  %v1819_v44 = vld [vmem:[%s2649_s4 + $0xb0] ss:$12 sps:$4 sm:$0xff]   ;;  %v1823_v45 = vld [vmem:[%s2649_s4 + $0xc8] ss:$12 sps:$4 sm:$0xff]  }
  0x14   :  { %162 = vmatpush1.bf16.msra.mxu0 %v1772_v6 }
  0x15   :  { %163 = vmatprep.subr.bf16.mxu0 %v1773_v7 }
  0x16   :  { %483 = vmatpush1.bf16.msra.mxu1 %v1806_v26 }
  0x17   :  { %484 = vmatprep.subr.bf16.mxu1 %v1808_v27 }
  0x18   :  { %164 = vmatpush1.bf16.msra.mxu0 %v1775_v8 }
  0x19   :  { %165 = vmatprep.subr.bf16.mxu0 %v1776_v9 }
  0x1a   :  { %485 = vmatpush1.bf16.msra.mxu1 %v1810_v30 }
  0x1b   :  { %486 = vmatprep.subr.bf16.mxu1 %v1812_v31 }
  0x1c   :  { %166 = vmatpush1.bf16.msra.mxu0 %v1778_v14 }
  0x1d   :  { %167 = vmatprep.subr.bf16.mxu0 %v1779_v15 }
  0x1e   :  { %487 = vmatpush1.bf16.msra.mxu1 %v1814_v32 }
  0x1f   :  { %488 = vmatprep.subr.bf16.mxu1 %v1816_v34 }
  0x20   :  { %168 = vmatpush1.bf16.msra.mxu0 %v1781_v17 }
  0x21   :  { %169 = vmatprep.subr.bf16.mxu0 %v1782_v20 }
  0x22   :  { %489 = vmatpush1.bf16.msra.mxu1 %v1818_v35 }
  0x23   :  { %490 = vmatprep.subr.bf16.mxu1 %v1820_v37 }
  0x24   :  { %170 = vmatpush1.bf16.msra.mxu0 %v1784_v22 }
  0x25   :  { %171 = vmatprep.subr.bf16.mxu0 %v1785_v24 }
  0x26   :  { %491 = vmatpush1.bf16.msra.mxu1 %v1822_v38 }
  0x27   :  { %492 = vmatprep.subr.bf16.mxu1 %v1824_v40 }
  0x28   :  { %172 = vmatpush1.bf16.msra.mxu0 %v1787_v25 }
  0x29   :  { %515 = vmatprep.subr.bf16.mxu0 %v2000_v2 }
  0x2b   :  { %190 = vmatmul.mubr.bf16.vlgmr.msra.gmra.mrb[0].mxu0 %v60_v28 }
  0x2c   :  { %516 = vmatpush1.bf16.msra.mxu0 %v1791_v29 }
  0x2d   :  { %517 = vmatprep.subr.bf16.mxu0 %v2000_v2 }
  0x30   :  { %518 = vmatpush1.bf16.msra.mxu0 %v1795_v33 }
  0x31   :  { %519 = vmatprep.subr.bf16.mxu0 %v2000_v2 }
  0x34   :  { %520 = vmatpush1.bf16.msra.mxu0 %v1799_v36 }
  0x35   :  { %521 = vmatprep.subr.bf16.mxu0 %v2000_v2 }
  0x38   :  { %522 = vmatpush1.bf16.msra.mxu0 %v1803_v39 }
  0x39   :  { %523 = vmatprep.subr.bf16.mxu0 %v2000_v2 }
  0x3c   :  { %524 = vmatpush1.bf16.msra.mxu0 %v1807_v41 }
  0x3d   :  { %525 = vmatprep.subr.bf16.mxu0 %v2000_v2 }
  0x40   :  { %526 = vmatpush1.bf16.msra.mxu0 %v1811_v42 }
  0x41   :  { %527 = vmatprep.subr.bf16.mxu0 %v2000_v2 }
  0x44   :  { %528 = vmatpush1.bf16.msra.mxu0 %v1815_v43 }
  0x45   :  { %529 = vmatprep.subr.bf16.mxu0 %v2000_v2 }
  0x48   :  { %530 = vmatpush1.bf16.msra.mxu0 %v1819_v44 }
  0x49   :  { %531 = vmatprep.subr.bf16.mxu0 %v2000_v2 }
  0x4c   :  { %532 = vmatpush1.bf16.msra.mxu0 %v1823_v45 }
  0x4d   :  { %533 = vmatprep.subr.bf16.mxu0 %v2000_v2 }
  0x4e   :  { %24 = vsyncpa [#allocation3], 0  ;;  %v1826_v46 = vld [vmem:[%s2649_s4 + $0xd8] ss:$12 sps:$4 sm:$0xff]   ;;  %v1827_v47 = vld [vmem:[%s2649_s4 + $0xe0] ss:$12 sps:$4 sm:$0xff]   ;;  %v200_v55 = vlaneseq }
  0x4f   :  { %493 = vmatpush1.bf16.msra.mxu1 %v1826_v46  ;;  %v1828_v48 = vld [vmem:[%s2649_s4 + $0xf4] ss:$12 sps:$4 sm:$0xff]   ;;  %v1830_v49 = vld [vmem:[%s2649_s4 + $0xf0] ss:$12 sps:$4 sm:$0xff]   ;;  %v1831_v50 = vld [vmem:[%s2649_s4 + $0xf8] ss:$12 sps:$4 sm:$0xff]  }
  0x50   :  { %534 = vmatpush1.bf16.msra.mxu0 %v1827_v47  ;;  %494 = vmatprep.subr.bf16.mxu1 %v1828_v48  ;;  %v1832_v51 = vld [vmem:[%s2649_s4 + $0x10c] ss:$12 sps:$4 sm:$0xff]   ;;  %v1834_v52 = vld [vmem:[%s2649_s4 + $0x108] ss:$12 sps:$4 sm:$0xff]   ;;  %v1835_v53 = vld [vmem:[%s2649_s4 + $0x110] ss:$12 sps:$4 sm:$0xff]  }
  0x51   :  { %535 = vmatprep.subr.bf16.mxu0 %v2000_v2  ;;  %v1838_v54 = vld [vmem:[%s2652_s7 + $0x4] ss:$8 sps:$4 sm:$0xff]   ;;  %v2274_v56 = vshrl.u32 %v200_v55, 7  ;;  %s2670_s2 = sld [smem:[#allocation7_spill]]  ;;  %v212_v60 = vld [vmem:[%s2648_s3] sm:$0x3] }
  0x52   :  { %vm470_vm0 = vcmask 523264   ;;  %v1836_v13 = vld [vmem:[%s2652_s7] ss:$8 sps:$4 sm:$0xff]   ;;  %v1841_v15 = vld [vmem:[%s2652_s7 + $0x14] ss:$8 sps:$4 sm:$0xff]   ;;  %vm2002_vm1 = vmmov 0  }
  0x53   :  { %495 = vmatpush1.bf16.msra.mxu1 %v1830_v49  ;;  %v2277_v57 = vsub.s32 0, %v2274_v56  ;;  %v2283_v59 = vsub.s32 1, %v2274_v56  ;;  %v1839_v16 = vld [vmem:[%s2652_s7 + $0x10] ss:$8 sps:$4 sm:$0xff]   ;;  %v1844_v17 = vld [vmem:[%s2652_s7 + $0x24] ss:$8 sps:$4 sm:$0xff]  }
  0x54   :  { %536 = vmatpush1.bf16.msra.mxu0 %v1831_v50  ;;  %496 = vmatprep.subr.bf16.mxu1 %v1832_v51  ;;  %v1842_v18 = vld [vmem:[%s2652_s7 + $0x20] ss:$8 sps:$4 sm:$0xff]   ;;  %v1847_v19 = vld [vmem:[%s2652_s7 + $0x34] ss:$8 sps:$4 sm:$0xff]   ;;  %v1845_v20 = vld [vmem:[%s2652_s7 + $0x30] ss:$8 sps:$4 sm:$0xff]  }
  0x55   :  { %537 = vmatprep.subr.bf16.mxu0 %v2000_v2  ;;  %v217_v63 = vrot.slane %v212_v60, %v2277_v57  ;;  %v221_v1 = vrot.slane %v212_v60, %v2283_v59  ;;  %v1850_v21 = vld [vmem:[%s2652_s7 + $0x44] ss:$8 sps:$4 sm:$0xff]   ;;  %v1848_v22 = vld [vmem:[%s2652_s7 + $0x40] ss:$8 sps:$4 sm:$0xff]   ;;  %v1853_v23 = vld [vmem:[%s2652_s7 + $0x54] ss:$8 sps:$4 sm:$0xff]  }
  0x56   :  { %v1851_v24 = vld [vmem:[%s2652_s7 + $0x50] ss:$8 sps:$4 sm:$0xff]   ;;  %v1856_v25 = vld [vmem:[%s2652_s7 + $0x64] ss:$8 sps:$4 sm:$0xff]   ;;  %v1854_v26 = vld [vmem:[%s2652_s7 + $0x60] ss:$8 sps:$4 sm:$0xff]  }
  0x57   :  { %497 = vmatpush1.bf16.msra.mxu1 %v1834_v52  ;;  %v198_v58 = vld [vmem:[%s2670_s2] sm:$0x3]  ;;  %v1859_v27 = vld [vmem:[%s2652_s7 + $0x74] ss:$8 sps:$4 sm:$0xff]   ;;  %v1857_v28 = vld [vmem:[%s2652_s7 + $0x70] ss:$8 sps:$4 sm:$0xff]  }
  0x58   :  { %538 = vmatpush1.bf16.msra.mxu0 %v1835_v53  ;;  %889 = vmatprep.subr.bf16.mxu1 %v1838_v54  ;;  %v203_v61 = vrot.slane %v198_v58, %v2277_v57  ;;  %v207_v62 = vrot.slane %v198_v58, %v2283_v59  ;;  %v1862_v29 = vld [vmem:[%s2652_s7 + $0x84] ss:$8 sps:$4 sm:$0xff]   ;;  %v1860_v30 = vld [vmem:[%s2652_s7 + $0x80] ss:$8 sps:$4 sm:$0xff]   ;;  %v1865_v31 = vld [vmem:[%s2652_s7 + $0x94] ss:$8 sps:$4 sm:$0xff]  }
  0x59   :  { %v1863_v32 = vld [vmem:[%s2652_s7 + $0x90] ss:$8 sps:$4 sm:$0xff]   ;;  %v1868_v33 = vld [vmem:[%s2652_s7 + $0xa4] ss:$8 sps:$4 sm:$0xff]   ;;  %v1866_v34 = vld [vmem:[%s2652_s7 + $0xa0] ss:$8 sps:$4 sm:$0xff]  }
  0x5a   :  { %v1871_v35 = vld [vmem:[%s2652_s7 + $0xb4] ss:$8 sps:$4 sm:$0xff]   ;;  %v1869_v36 = vld [vmem:[%s2652_s7 + $0xb0] ss:$8 sps:$4 sm:$0xff]   ;;  %v1874_v37 = vld [vmem:[%s2652_s7 + $0xc4] ss:$8 sps:$4 sm:$0xff]  }
  0x5b   :  { %v1872_v38 = vld [vmem:[%s2652_s7 + $0xc0] ss:$8 sps:$4 sm:$0xff]   ;;  %v1877_v39 = vld [vmem:[%s2652_s7 + $0xd4] ss:$8 sps:$4 sm:$0xff]   ;;  %v1875_v40 = vld [vmem:[%s2652_s7 + $0xd0] ss:$8 sps:$4 sm:$0xff]  }
  0x5c   :  { %v1880_v41 = vld [vmem:[%s2652_s7 + $0xe4] ss:$8 sps:$4 sm:$0xff]   ;;  %v1878_v42 = vld [vmem:[%s2652_s7 + $0xe0] ss:$8 sps:$4 sm:$0xff]   ;;  %v1883_v43 = vld [vmem:[%s2652_s7 + $0xf4] ss:$8 sps:$4 sm:$0xff]  }
  0x5d   :  { %v1881_v44 = vld [vmem:[%s2652_s7 + $0xf0] ss:$8 sps:$4 sm:$0xff]   ;;  %v1886_v45 = vld [vmem:[%s2652_s7 + $0x104] ss:$8 sps:$4 sm:$0xff]   ;;  %v1908_v46 = vld [vmem:[%s2655_s10] ss:$8 sps:$4 sm:$0xff]  }
  0x5e   :  { %v1910_v47 = vld [vmem:[%s2655_s10 + $0x4] ss:$8 sps:$4 sm:$0xff]   ;;  %v1913_v48 = vld [vmem:[%s2655_s10 + $0x14] ss:$8 sps:$4 sm:$0xff]   ;;  %v1911_v49 = vld [vmem:[%s2655_s10 + $0x10] ss:$8 sps:$4 sm:$0xff]  }
  0x5f   :  { %1195 = vmatprep.subr.bf16.mxu0 %v1910_v47  ;;  %v1916_v50 = vld [vmem:[%s2655_s10 + $0x24] ss:$8 sps:$4 sm:$0xff]   ;;  %v1914_v51 = vld [vmem:[%s2655_s10 + $0x20] ss:$8 sps:$4 sm:$0xff]   ;;  %v1919_v52 = vld [vmem:[%s2655_s10 + $0x34] ss:$8 sps:$4 sm:$0xff]  }
  0x60   :  { %v1917_v53 = vld [vmem:[%s2655_s10 + $0x30] ss:$8 sps:$4 sm:$0xff]   ;;  %v1922_v54 = vld [vmem:[%s2655_s10 + $0x44] ss:$8 sps:$4 sm:$0xff]   ;;  %v1920_v55 = vld [vmem:[%s2655_s10 + $0x40] ss:$8 sps:$4 sm:$0xff]  }
  0x61   :  { %v1925_v58 = vld [vmem:[%s2655_s10 + $0x54] ss:$8 sps:$4 sm:$0xff]   ;;  %v1923_v60 = vld [vmem:[%s2655_s10 + $0x50] ss:$8 sps:$4 sm:$0xff]   ;;  %vm1539_vm2 = vcmask 17408  }
  0xfe   :  { %v191_v0 = vpop.f32.mrb[0].mxu0 }
  0xff   :  { %v210_v3 = vmul.f32 %v203_v61, %v191_v0  ;;  %v193_v4 = vpop.f32.mrb[1].mxu0  ;;  %v1928_v61 = vld [vmem:[%s2655_s10 + $0x64] ss:$8 sps:$4 sm:$0xff]   ;;  %v1929_v0 = vld [vmem:[%s2655_s10 + $0x70] ss:$8 sps:$4 sm:$0xff]  }
 0x100   :  { %v211_v5 = vmul.f32 %v207_v62, %v193_v4  ;;  %v195_v6 = vpop.f32.mrb[2].mxu0  ;;  %v1926_v62 = vld [vmem:[%s2655_s10 + $0x60] ss:$8 sps:$4 sm:$0xff]   ;;  %v1937_v4 = vld [vmem:[%s2655_s10 + $0x94] ss:$8 sps:$4 sm:$0xff]  }
 0x101   :  { %v224_v7 = vadd.f32 %v217_v63, %v210_v3  ;;  %v196_v8 = vpop.f32.mrb[3].mxu0  ;;  %v1931_v63 = vld [vmem:[%s2655_s10 + $0x74] ss:$8 sps:$4 sm:$0xff]   ;;  %v1932_v3 = vld [vmem:[%s2655_s10 + $0x80] ss:$8 sps:$4 sm:$0xff]  }
 0x102   :  { %v225_v9 = vadd.f32 %v221_v1, %v211_v5  ;;  %v1934_v1 = vld [vmem:[%s2655_s10 + $0x84] ss:$8 sps:$4 sm:$0xff]   ;;  %v1935_v5 = vld [vmem:[%s2655_s10 + $0x90] ss:$8 sps:$4 sm:$0xff]   ;;  %v1943_v8 = vld [vmem:[%s2655_s10 + $0xb4] ss:$8 sps:$4 sm:$0xff]  }
 0x103   :  { %v226_v10 = vmax.f32 %v224_v7, 0.0  ;;  %v1940_v6 = vld [vmem:[%s2655_s10 + $0xa4] ss:$8 sps:$4 sm:$0xff]   ;;  %v1938_v7 = vld [vmem:[%s2655_s10 + $0xa0] ss:$8 sps:$4 sm:$0xff]  }
 0x104   :  { %v227_v11 = vmax.f32 %v225_v9, 0.0  ;;  %v1941_v9 = vld [vmem:[%s2655_s10 + $0xb0] ss:$8 sps:$4 sm:$0xff]  }
 0x105   :  { %v228_v14 = vpack.c.bf16 %v226_v10, %v226_v10  ;;  %v1946_v10 = vld [vmem:[%s2655_s10 + $0xc4] ss:$8 sps:$4 sm:$0xff]  }
 0x106   :  { %v229_v12 = vpack.c.bf16 %v227_v11, %v227_v11  ;;  %v1944_v11 = vld [vmem:[%s2655_s10 + $0xc0] ss:$8 sps:$4 sm:$0xff]  }
 0x108   :  { %1611 = vmatprep.mubr.msk.bf16.mxu1 %vm470_vm0, %v229_v12  ;;  %1612 = vmatprep.mubr.msk.bf16.mxu0 %vm470_vm0, %v229_v12  ;;  %v1949_v12 = vld [vmem:[%s2655_s10 + $0xd4] ss:$8 sps:$4 sm:$0xff]  }
 0x109   :  { %507 = vmatmul.mubr.bf16.vlgmr.msra.gmra.mrb[0].mxu1 %v228_v14  ;;  %548 = vmatmul.mubr.bf16.vlgmr.msra.gmra.mrb[4].mxu0 %v228_v14  ;;  %v555_v14 = vld [vmem:[%s2650_s5] sm:$0x7] }
 0x10a   :  { %890 = vmatpush1.bf16.msra.mxu1 %v1836_v13  ;;  %1196 = vmatpush1.bf16.msra.mxu0 %v1908_v46  ;;  %v1947_v13 = vld [vmem:[%s2655_s10 + $0xd0] ss:$8 sps:$4 sm:$0xff]   ;;  %v1901_v46 = vld [vmem:[%s2652_s7 + $0x154] ss:$8 sps:$4 sm:$0xff]  }
 0x10b   :  { %891 = vmatprep.subr.bf16.mxu1 %v1841_v15  ;;  %1197 = vmatprep.subr.bf16.mxu0 %v1913_v48  ;;  %v575_v15 = vld [vmem:[%s2651_s6] sm:$0x7] }
 0x10e   :  { %892 = vmatpush1.bf16.msra.mxu1 %v1839_v16  ;;  %1198 = vmatpush1.bf16.msra.mxu0 %v1911_v49  ;;  %v560_v16 = vrot.slane %v555_v14, %v2277_v57  ;;  %v1904_v49 = vld [vmem:[%s2652_s7 + $0x164] ss:$8 sps:$4 sm:$0xff]  }
 0x10f   :  { %893 = vmatprep.subr.bf16.mxu1 %v1844_v17  ;;  %1199 = vmatprep.subr.bf16.mxu0 %v1916_v50  ;;  %v564_v17 = vrot.slane %v555_v14, %v2283_v59  ;;  %v1902_v50 = vld [vmem:[%s2652_s7 + $0x160] ss:$8 sps:$4 sm:$0xff]  }
 0x112   :  { %894 = vmatpush1.bf16.msra.mxu1 %v1842_v18  ;;  %1200 = vmatpush1.bf16.msra.mxu0 %v1914_v51  ;;  %v580_v18 = vrot.slane %v575_v15, %v2277_v57 }
 0x113   :  { %895 = vmatprep.subr.bf16.mxu1 %v1847_v19  ;;  %1201 = vmatprep.subr.bf16.mxu0 %v1919_v52  ;;  %v1907_v52 = vld [vmem:[%s2652_s7 + $0x174] ss:$8 sps:$4 sm:$0xff]  }
 0x116   :  { %896 = vmatpush1.bf16.msra.mxu1 %v1845_v20  ;;  %1202 = vmatpush1.bf16.msra.mxu0 %v1917_v53  ;;  %v1905_v53 = vld [vmem:[%s2652_s7 + $0x170] ss:$8 sps:$4 sm:$0xff]  }
 0x117   :  { %897 = vmatprep.subr.bf16.mxu1 %v1850_v21  ;;  %1203 = vmatprep.subr.bf16.mxu0 %v1922_v54  ;;  %v584_v21 = vrot.slane %v575_v15, %v2283_v59 }
 0x11a   :  { %898 = vmatpush1.bf16.msra.mxu1 %v1848_v22  ;;  %1204 = vmatpush1.bf16.msra.mxu0 %v1920_v55 }
 0x11b   :  { %899 = vmatprep.subr.bf16.mxu1 %v1853_v23  ;;  %1205 = vmatprep.subr.bf16.mxu0 %v1925_v58  ;;  %v1952_v58 = vld [vmem:[%s2655_s10 + $0xe4] ss:$8 sps:$4 sm:$0xff]  }
 0x11e   :  { %900 = vmatpush1.bf16.msra.mxu1 %v1851_v24  ;;  %1206 = vmatpush1.bf16.msra.mxu0 %v1923_v60  ;;  %v1950_v60 = vld [vmem:[%s2655_s10 + $0xe0] ss:$8 sps:$4 sm:$0xff]  }
 0x11f   :  { %901 = vmatprep.subr.bf16.mxu1 %v1856_v25  ;;  %1207 = vmatprep.subr.bf16.mxu0 %v1928_v61  ;;  %v1955_v61 = vld [vmem:[%s2655_s10 + $0xf4] ss:$8 sps:$4 sm:$0xff]  }
 0x122   :  { %902 = vmatpush1.bf16.msra.mxu1 %v1854_v26  ;;  %1208 = vmatpush1.bf16.msra.mxu0 %v1926_v62  ;;  %v1953_v62 = vld [vmem:[%s2655_s10 + $0xf0] ss:$8 sps:$4 sm:$0xff]  }
 0x123   :  { %903 = vmatprep.subr.bf16.mxu1 %v1859_v27  ;;  %1209 = vmatprep.subr.bf16.mxu0 %v1931_v63  ;;  %v1956_v63 = vld [vmem:[%s2658_s13 + $0x40] sm:$0xff]  }
 0x126   :  { %904 = vmatpush1.bf16.msra.mxu1 %v1857_v28  ;;  %1210 = vmatpush1.bf16.msra.mxu0 %v1929_v0  ;;  %v971_v0 = vld [vmem:[%s2653_s8] sm:$0x3] }
 0x127   :  { %905 = vmatprep.subr.bf16.mxu1 %v1862_v29  ;;  %1211 = vmatprep.subr.bf16.mxu0 %v1934_v1  ;;  %v985_v1 = vld [vmem:[%s2654_s9] sm:$0x3] }
 0x12a   :  { %906 = vmatpush1.bf16.msra.mxu1 %v1860_v30  ;;  %1212 = vmatpush1.bf16.msra.mxu0 %v1932_v3  ;;  %v976_v3 = vrot.slane %v971_v0, %v2277_v57 }
 0x12b   :  { %907 = vmatprep.subr.bf16.mxu1 %v1865_v31  ;;  %1213 = vmatprep.subr.bf16.mxu0 %v1937_v4  ;;  %v980_v4 = vrot.slane %v971_v0, %v2283_v59 }
 0x12e   :  { %908 = vmatpush1.bf16.msra.mxu1 %v1863_v32  ;;  %1214 = vmatpush1.bf16.msra.mxu0 %v1935_v5  ;;  %v990_v5 = vrot.slane %v985_v1, %v2277_v57 }
 0x12f   :  { %909 = vmatprep.subr.bf16.mxu1 %v1868_v33  ;;  %1215 = vmatprep.subr.bf16.mxu0 %v1940_v6 }
 0x132   :  { %910 = vmatpush1.bf16.msra.mxu1 %v1866_v34  ;;  %1216 = vmatpush1.bf16.msra.mxu0 %v1938_v7  ;;  %v994_v7 = vrot.slane %v985_v1, %v2283_v59 }
 0x133   :  { %911 = vmatprep.subr.bf16.mxu1 %v1871_v35  ;;  %1217 = vmatprep.subr.bf16.mxu0 %v1943_v8  ;;  %v1884_v35 = vld [vmem:[%s2652_s7 + $0x100] ss:$8 sps:$4 sm:$0xff]  }
 0x136   :  { %912 = vmatpush1.bf16.msra.mxu1 %v1869_v36  ;;  %1218 = vmatpush1.bf16.msra.mxu0 %v1941_v9 }
 0x137   :  { %913 = vmatprep.subr.bf16.mxu1 %v1874_v37  ;;  %1219 = vmatprep.subr.bf16.mxu0 %v1946_v10  ;;  %v1889_v37 = vld [vmem:[%s2652_s7 + $0x114] ss:$8 sps:$4 sm:$0xff]  }
 0x13a   :  { %914 = vmatpush1.bf16.msra.mxu1 %v1872_v38  ;;  %1220 = vmatpush1.bf16.msra.mxu0 %v1944_v11  ;;  %v1887_v38 = vld [vmem:[%s2652_s7 + $0x110] ss:$8 sps:$4 sm:$0xff]  }
 0x13b   :  { %915 = vmatprep.subr.bf16.mxu1 %v1877_v39  ;;  %1221 = vmatprep.subr.bf16.mxu0 %v1949_v12  ;;  %v1892_v39 = vld [vmem:[%s2652_s7 + $0x124] ss:$8 sps:$4 sm:$0xff]  }
 0x13e   :  { %916 = vmatpush1.bf16.msra.mxu1 %v1875_v40  ;;  %1222 = vmatpush1.bf16.msra.mxu0 %v1947_v13  ;;  %v1890_v40 = vld [vmem:[%s2652_s7 + $0x120] ss:$8 sps:$4 sm:$0xff]  }
 0x13f   :  { %917 = vmatprep.subr.bf16.mxu1 %v1880_v41  ;;  %v1895_v41 = vld [vmem:[%s2652_s7 + $0x134] ss:$8 sps:$4 sm:$0xff]   ;;  %1223 = vmatprep.subr.bf16.mxu0 %v1952_v58 }
 0x142   :  { %918 = vmatpush1.bf16.msra.mxu1 %v1878_v42  ;;  %v567_v42 = vsub.s32 2, %v2274_v56  ;;  %v1899_v56 = vld [vmem:[%s2652_s7 + $0x150] ss:$8 sps:$4 sm:$0xff]   ;;  %1224 = vmatpush1.bf16.msra.mxu0 %v1950_v60 }
 0x143   :  { %919 = vmatprep.subr.bf16.mxu1 %v1883_v43  ;;  %v1898_v43 = vld [vmem:[%s2652_s7 + $0x144] ss:$8 sps:$4 sm:$0xff]   ;;  %1225 = vmatprep.subr.bf16.mxu0 %v1955_v61 }
 0x144   :  { %v588_v48 = vrot.slane %v575_v15, %v567_v42 }
 0x146   :  { %920 = vmatpush1.bf16.msra.mxu1 %v1881_v44  ;;  %v1896_v44 = vld [vmem:[%s2652_s7 + $0x140] ss:$8 sps:$4 sm:$0xff]   ;;  %1226 = vmatpush1.bf16.msra.mxu0 %v1953_v62 }
 0x147   :  { %930 = vmatprep.subr.bf16.mxu1 %v1886_v45  ;;  %v568_v45 = vrot.slane %v555_v14, %v567_v42  ;;  %1717 = vmatprep.subr.bf16.mxu0 %v1956_v63 }
 0x1dc   :  { %v508_v19 = vpop.f32.mrb[0].mxu1  ;;  %v549_v20 = vpop.f32.mrb[4].mxu0 }
 0x1dd   :  { %v572_v22 = vmul.f32 %v560_v16, %v508_v19  ;;  %v510_v23 = vpop.f32.mrb[1].mxu1  ;;  %v551_v24 = vpop.f32.mrb[5].mxu0  ;;  %v574_v47 = vmul.f32 %v568_v45, %v549_v20  ;;  %v1958_v20 = vld [vmem:[%s2658_s13 + $0x48] sm:$0xff]  }
 0x1de   :  { %v573_v25 = vmul.f32 %v564_v17, %v510_v23  ;;  %v512_v26 = vpop.f32.mrb[2].mxu1  ;;  %v552_v27 = vpop.f32.mrb[6].mxu0  ;;  %v1961_v23 = vld [vmem:[%s2658_s13 + $0x10] sm:$0xff]   ;;  %v1962_v24 = vld [vmem:[%s2658_s13 + $0x58] sm:$0xff]  }
 0x1df   :  { %v592_v28 = vadd.f32 %v580_v18, %v572_v22  ;;  %v513_v29 = vpop.f32.mrb[3].mxu1  ;;  %v553_v30 = vpop.f32.mrb[7].mxu0  ;;  %v594_v51 = vadd.f32 %v588_v48, %v574_v47  ;;  %v1957_v18 = vld [vmem:[%s2658_s13] sm:$0xff]   ;;  %v1960_v22 = vld [vmem:[%s2658_s13 + $0x50] sm:$0xff]  }
 0x1e0   :  { %v593_v31 = vadd.f32 %v584_v21, %v573_v25  ;;  %v1959_v21 = vld [vmem:[%s2658_s13 + $0x8] sm:$0xff]   ;;  %v1963_v25 = vld [vmem:[%s2658_s13 + $0x18] sm:$0xff]   ;;  %v1964_v26 = vld [vmem:[%s2658_s13 + $0x60] sm:$0xff]  }
 0x1e1   :  { %v595_v32 = vmax.f32 %v592_v28, 0.0  ;;  %v597_v54 = vmax.f32 %v594_v51, 0.0  ;;  %v1965_v27 = vld [vmem:[%s2658_s13 + $0x20] sm:$0xff]   ;;  %v1966_v28 = vld [vmem:[%s2658_s13 + $0x68] sm:$0xff]   ;;  %v1968_v30 = vld [vmem:[%s2658_s13 + $0x70] sm:$0xff]  }
 0x1e2   :  { %v596_v33 = vmax.f32 %v593_v31, 0.0  ;;  %v1967_v29 = vld [vmem:[%s2658_s13 + $0x28] sm:$0xff]   ;;  %v1969_v31 = vld [vmem:[%s2658_s13 + $0x30] sm:$0xff]  }
 0x1e3   :  { %v598_v36 = vpack.c.bf16 %v595_v32, %v595_v32  ;;  %v600_v55 = vpack.c.bf16 %v597_v54, %v597_v54  ;;  %v1970_v32 = vld [vmem:[%s2658_s13 + $0x78] sm:$0xff]  }
 0x1e4   :  { %v599_v34 = vpack.c.bf16 %v596_v33, %v596_v33  ;;  %v1971_v33 = vld [vmem:[%s2658_s13 + $0x38] sm:$0xff]  }
 0x1e6   :  { %921 = vmatprep.mubr.bf16.mxu1 %v599_v34  ;;  %v1972_v34 = vld [vmem:[%s2660_s15] sm:$0xff]  }
 0x1e7   :  { %922 = vmatmul.mubr.bf16.vlgmr.msra.gmra.mrb[4].mxu1 %v598_v36  ;;  %v1973_v36 = vld [vmem:[%s2660_s15 + $0x8] sm:$0xff]  }
 0x1e8   :  { %931 = vmatpush1.bf16.msra.mxu1 %v1884_v35  ;;  %962 = vmatprep.mubr.bf16.mxu1 %v2000_v2  ;;  %v1893_v2 = vld [vmem:[%s2652_s7 + $0x130] ss:$8 sps:$4 sm:$0xff]   ;;  %v2001_v35 = vmov 0.0  }
 0x1e9   :  { %932 = vmatprep.subr.bf16.mxu1 %v1889_v37  ;;  %v1236_v37 = vld [vmem:[%s2656_s11] sm:$0x3] }
 0x1ec   :  { %933 = vmatpush1.bf16.msra.mxu1 %v1887_v38  ;;  %v1250_v38 = vld [vmem:[%s2657_s12] sm:$0x3] }
 0x1ed   :  { %934 = vmatprep.subr.bf16.mxu1 %v1892_v39  ;;  %v1241_v39 = vrot.slane %v1236_v37, %v2277_v57  ;;  %v1259_v42 = vrot.slane %v1250_v38, %v2283_v59 }
 0x1f0   :  { %935 = vmatpush1.bf16.msra.mxu1 %v1890_v40  ;;  %v1245_v40 = vrot.slane %v1236_v37, %v2283_v59  ;;  %v1975_v59 = vld [vmem:[%s2660_s15 + $0x18] sm:$0xff]  }
 0x1f1   :  { %936 = vmatprep.subr.bf16.mxu1 %v1895_v41  ;;  %v1255_v41 = vrot.slane %v1250_v38, %v2277_v57  ;;  %v1974_v57 = vld [vmem:[%s2660_s15 + $0x10] sm:$0xff]   ;;  %s2003_s15 = smov [#allocation2]  }
 0x1f2   :  { %s1549_s30 = sshll.u32 %s2003_s15, 4  ;;  %s1550_s30 = int_to_ptr.vmem [resolvable:$true] %s1549_s30 }
 0x1f3   :  { %p1981_p1 = scmp.lt.s32.totalorder %s1550_s30, %s1550_s30 }
 0x1f4   :  { %937 = vmatpush1.bf16.msra.mxu1 %v1893_v2 }
 0x1f5   :  { %938 = vmatprep.subr.bf16.mxu1 %v1898_v43 }
 0x1f8   :  { %939 = vmatpush1.bf16.msra.mxu1 %v1896_v44 }
 0x1f9   :  { %940 = vmatprep.subr.bf16.mxu1 %v1901_v46 }
 0x1fc   :  { %941 = vmatpush1.bf16.msra.mxu1 %v1899_v56 }
 0x1fd   :  { %942 = vmatprep.subr.bf16.mxu1 %v1904_v49 }
 0x200   :  { %943 = vmatpush1.bf16.msra.mxu1 %v1902_v50 }
 0x201   :  { %944 = vmatprep.subr.bf16.mxu1 %v1907_v52 }
 0x204   :  { %945 = vmatpush1.bf16.msra.mxu1 %v1905_v53 }
 0x205   :  { %1744 = vmatprep.subr.bf16.mxu1 %v2001_v35 }
 0x207   :  { %963 = vmatmul.mubr.bf16.vlgmr.msra.gmra.mrb[4].mxu1 %v600_v55  ;;  %v1694_v55 = vld [vmem:[%s2659_s14] ss:$0 sm:$0xff]  ;;  %s1976_s14 = scalar_lea.vmem %s1550_s30, 32 }
 0x208   :  { %1745 = vmatpush3.bf16.msra.mxu1 %v1972_v34  ;;  %1752 = vmatprep.mubr.msk.bf16.mxu1 %vm2002_vm1, %v2001_v35  ;;  %p1977_p0 = scmp.ne.s32.totalorder %s1550_s30, %s1976_s14  ;;  %p1982_p2 = scmp.lt.s32.totalorder %s1976_s14, %s1976_s14 }
 0x209   :  { %1746 = vmatprep.subr.bf16.mxu1 %v2001_v35 }
 0x20a   :  { %p1983_p3 = por %p1982_p2, %p1981_p1 }
 0x20c   :  { %1747 = vmatpush3.bf16.msra.mxu1 %v1973_v36  ;;  %p1984_p4 = pnand %p1983_p3, %p1977_p0 }
 0x20d   :  { %1748 = vmatprep.subr.bf16.mxu1 %v2001_v35 }
 0x210   :  { %1749 = vmatpush3.bf16.msra.mxu1 %v1974_v57 }
 0x211   :  { %1750 = vmatprep.subr.bf16.mxu1 %v2001_v35 }
 0x214   :  { %1751 = vmatpush3.bf16.msra.mxu1 %v1975_v59 }
 0x2da   :  { %v964_v6 = vpop.f32.mrb[4].mxu1 }
 0x2db   :  { %v983_v8 = vmul.f32 %v976_v3, %v964_v6  ;;  %v966_v9 = vpop.f32.mrb[5].mxu1  ;;  %v1711_v3 = vld [vmem:[%s2661_s16] ss:$0 sm:$0xff] }
 0x2dc   :  { %v984_v10 = vmul.f32 %v980_v4, %v966_v9  ;;  %v968_v11 = vpop.f32.mrb[6].mxu1 }
 0x2dd   :  { %v997_v12 = vadd.f32 %v990_v5, %v983_v8  ;;  %v969_v13 = vpop.f32.mrb[7].mxu1 }
 0x2de   :  { %v998_v14 = vadd.f32 %v994_v7, %v984_v10 }
 0x2df   :  { %v999_v15 = vmax.f32 %v997_v12, 0.0 }
 0x2e0   :  { %v1000_v16 = vmax.f32 %v998_v14, 0.0 }
 0x2e1   :  { %v1001_v19 = vpack.c.bf16 %v999_v15, %v999_v15 }
 0x2e2   :  { %v1002_v17 = vpack.c.bf16 %v1000_v16, %v1000_v16 }
 0x2e4   :  { %1227 = vmatprep.mubr.bf16.mxu0 %v1002_v17 }
 0x2e5   :  { %1228 = vmatmul.mubr.bf16.vlgmr.msra.gmra.mrb[8].mxu0 %v1001_v19 }
 0x2e6   :  { %1718 = vmatpush3.bf16.msra.mxu0 %v1957_v18 }
 0x2e7   :  { %1719 = vmatprep.subr.bf16.mxu0 %v1958_v20 }
 0x2ea   :  { %1720 = vmatpush3.bf16.msra.mxu0 %v1959_v21 }
 0x2eb   :  { %1721 = vmatprep.subr.bf16.mxu0 %v1960_v22 }
 0x2ee   :  { %1722 = vmatpush3.bf16.msra.mxu0 %v1961_v23 }
 0x2ef   :  { %1723 = vmatprep.subr.bf16.mxu0 %v1962_v24 }
 0x2f2   :  { %1724 = vmatpush3.bf16.msra.mxu0 %v1963_v25 }
 0x2f3   :  { %1725 = vmatprep.subr.bf16.mxu0 %v1964_v26 }
 0x2f6   :  { %1726 = vmatpush3.bf16.msra.mxu0 %v1965_v27 }
 0x2f7   :  { %1727 = vmatprep.subr.bf16.mxu0 %v1966_v28 }
 0x2fa   :  { %1728 = vmatpush3.bf16.msra.mxu0 %v1967_v29 }
 0x2fb   :  { %1729 = vmatprep.subr.bf16.mxu0 %v1968_v30 }
 0x2fe   :  { %1730 = vmatpush3.bf16.msra.mxu0 %v1969_v31 }
 0x2ff   :  { %1731 = vmatprep.subr.bf16.mxu0 %v1970_v32 }
 0x302   :  { %1732 = vmatpush3.bf16.msra.mxu0 %v1971_v33 }
 0x3b8   :  { %v1229_v2 = vpop.f32.mrb[8].mxu0 }
 0x3b9   :  { %v1248_v43 = vmul.f32 %v1241_v39, %v1229_v2  ;;  %v1231_v44 = vpop.f32.mrb[9].mxu0 }
 0x3ba   :  { %v1249_v45 = vmul.f32 %v1245_v40, %v1231_v44  ;;  %v1233_v46 = vpop.f32.mrb[10].mxu0 }
 0x3bb   :  { %v1262_v56 = vadd.f32 %v1255_v41, %v1248_v43  ;;  %v1234_v47 = vpop.f32.mrb[11].mxu0 }
 0x3bc   :  { %v1263_v48 = vadd.f32 %v1259_v42, %v1249_v45 }
 0x3bd   :  { %v1264_v49 = vmax.f32 %v1262_v56, 0.0 }
 0x3be   :  { %v1265_v50 = vmax.f32 %v1263_v48, 0.0 }
 0x3bf   :  { %v1278_v53 = vpack.c.bf16 %v1264_v49, %v1264_v49 }
 0x3c0   :  { %v1268_v51 = vcombine.low %v1264_v49, %v1265_v50  ;;  %v1279_v52 = vpack.c.bf16 %v1265_v50, %v1265_v50 }
 0x3c2   :  { %1693 = vst.sshfl [vmem:[%s2662_s17] sm:$0x33 pattern:$0x76325410] %v1268_v51  ;;  %1447 = vmatprep.mubr.bf16.mxu0 %v1279_v52 }
 0x3c3   :  { %1448 = vmatmul.mubr.bf16.vlgmr.msra.gmra.mrb[12].mxu0 %v1278_v53 }
 0x496   :  { %v1733_v54 = vpop.f32.mrb[12].mxu0 }
 0x497   :  { %v1734_v58 = vpop.f32.mrb[13].mxu0 }
 0x498   :  { %v1735_v60 = vadd.f32 %v1734_v58, %v1733_v54  ;;  %v1736_v61 = vpop.f32.mrb[14].mxu0 }
 0x499   :  { %v1737_v62 = vpop.f32.mrb[15].mxu0 }
 0x49a   :  { %v1450_v63 = vadd.f32 %v1735_v60, %v1694_v55 }
 0x49c   :  { %v1455_v0 = vmax.f32 %v1450_v63, 0.0 }
 0x49e   :  { %v1456_v1 = vpack.c.bf16 %v1455_v0, %v1455_v0 }
 0x4a0   :  { %1753 = vmatmul.mubr.msk.bf16.vlgmr.msra.gmra.mrb[8].mxu1 %vm470_vm0, %v1456_v1 }
 0x573   :  { %v1533_v4 = vpop.f32.mrb[8].mxu1 }
 0x574   :  { %v1534_v5 = vadd.f32 %v1711_v3, %v1533_v4  ;;  %v1754_v6 = vpop.f32.mrb[9].mxu1 }
 0x575   :  { %v1536_v7 = vpop.f32.mrb[10].mxu1 }
 0x576   :  { %v1755_v8 = vpop.f32.mrb[11].mxu1  ;;  %1540 = vst.msk [vmem:[#allocation2] sm:$0x3] %vm1539_vm2, %v1534_v5 }
 0x577   :  { %1987 = shalt.err (!%p1984_p4)
}
 0x578   :  { %s1988_s16 = scalar_lea.hbm %s2663_s18, 32 }
 0x579   :  { %p1989_p5 = scmp.ne.s32.totalorder %s2663_s18, %s1988_s16  ;;  %p1992_p6 = scmp.lt.u32.totalorder %s1988_s16, %s2663_s18 }
 0x57b   :  { %p1994_p7 = pnand %p1992_p6, %p1989_p5 }
 0x57d   :  { %1997 = shalt.err (!%p1994_p7)
}
 0x57e   :  { %1552 = dma.vmem_to_hbm [thread:$0]  %s1550_s30, 32, %s2663_s18, [#allocation3]  }
 0x57f   :  { %1998 = dma.done.wait [#allocation3], 32  }
 0x580   :  { %1999 = vsyncadd [#allocation3], 4294967264 }
 0x581   :  { %1558 = vsyncpa [#allocation3], 1 }

</bundles_post_ra>
